<compile_context>
chip_gen: v6e
topology: v6e:2x2x1
jax: 0.10.0
libtpu: 0.0.40
codegen_flags: <defaults>
</compile_context>

<pallas_src>
import functools
import math

import jax
import jax.numpy as jnp
import numpy as np
from jax import lax
from jax.experimental import pallas as pl
from jax.experimental.pallas import tpu as pltpu


# ----------------------------- in-kernel helpers -----------------------------

_GELU_C = math.sqrt(2.0 / math.pi)


def _gelu(x):
    # tanh-approximate GELU (transcendentals go to the EUP slot).
    # TODO(synk): PyTorch F.gelu default is exact erf; tanh approx differs by <~1e-3.
    return 0.5 * x * (1.0 + jnp.tanh(_GELU_C * (x + 0.044715 * x * x * x)))


def _layernorm(x, g, b, eps=1e-5):
    mu = jnp.mean(x, axis=-1, keepdims=True)
    xc = x - mu
    var = jnp.mean(xc * xc, axis=-1, keepdims=True)
    return xc * lax.rsqrt(var + eps) * g + b


def _bf16(x):
    return x.astype(jnp.bfloat16)


def _par(n_axes=1):
    return pltpu.CompilerParams(dimension_semantics=("parallel",) * n_axes)


def _row_block(n, target=512):
    """Largest row-block <= target that divides n (multiple of 8), else n."""
    if n <= target:
        return n
    blk = target - (target % 8)
    while blk >= 8:
        if n % blk == 0:
            return blk
        blk -= 8
    return n


# --------------------------------- kernels -----------------------------------

def _embed_kernel(x_ref, w0_ref, w1_ref, w2_ref, b_ref, pe_ref, o_ref):
    # circular Conv1d(k=3) over length for one batch: neighbours come from the
    # XLU (pltpu.roll), not permutation matmuls; bf16 weights, f32 accumulation.
    L = x_ref.shape[0]
    x = x_ref[...]                              # (L, Cin) f32
    x_m1 = pltpu.roll(x, 1, axis=0)             # x[t-1], circular
    x_p1 = pltpu.roll(x, L - 1, axis=0)         # x[t+1], circular
    acc = jnp.dot(_bf16(x_m1), w0_ref[...], preferred_element_type=jnp.float32)
    acc = acc + jnp.dot(_bf16(x), w1_ref[...], preferred_element_type=jnp.float32)
    acc = acc + jnp.dot(_bf16(x_p1), w2_ref[...], preferred_element_type=jnp.float32)
    o_ref[...] = acc + b_ref[...] + pe_ref[...]          # PE broadcast per batch


def _qkv_kernel(x_ref, w_ref, b_ref, o_ref):
    # fused Q/K/V projection: (rows, D) @ (D, 3D), row-tiled grid.
    o_ref[...] = jnp.dot(_bf16(x_ref[...]), w_ref[...],
                         preferred_element_type=jnp.float32) + b_ref[...]


def _attn_core_kernel(q_ref, k_ref, v_ref, o_ref, *, scale):
    # all (B,H) pairs in one step: q (BH, u, dk), k/v (BH, L, dk).
    q = _bf16(q_ref[...])
    k = _bf16(k_ref[...])
    v = _bf16(v_ref[...])
    s = jnp.einsum('bud,bld->bul', q, k, preferred_element_type=jnp.float32) * scale
    m = jnp.max(s, axis=-1, keepdims=True)
    e = jnp.exp(s - m)
    attn = e * pl.reciprocal(jnp.sum(e, axis=-1, keepdims=True), approx=True)
    o_ref[...] = jnp.einsum('bul,bld->bud', _bf16(attn), v,
                            preferred_element_type=jnp.float32)


def _post_kernel(x_ref, ctx_ref, wo_ref, bo_ref, w1_ref, b1_ref, w2_ref, b2_ref,
                 g1_ref, t1_ref, g2_ref, t2_ref, gf_ref, tf_ref, o_ref, *, final_norm):
    # attn_out = ctx@Wo+bo ; x = LN1(x + attn_out) ; y = GELU(x@W1+b1)@W2+b2 ;
    # out = LN2(x + y) ; optionally the Encoder's final LayerNorm (last layer).
    x = x_ref[...]
    attn = jnp.dot(_bf16(ctx_ref[...]), wo_ref[...],
                   preferred_element_type=jnp.float32) + bo_ref[...]
    xn = _layernorm(x + attn, g1_ref[...], t1_ref[...])
    h = _gelu(jnp.dot(_bf16(xn), w1_ref[...],
                      preferred_element_type=jnp.float32) + b1_ref[...])
    y = jnp.dot(_bf16(h), w2_ref[...], preferred_element_type=jnp.float32) + b2_ref[...]
    out = _layernorm(xn + y, g2_ref[...], t2_ref[...])
    if final_norm:
        out = _layernorm(out, gf_ref[...], tf_ref[...])
    o_ref[...] = out


def _conv_layer_kernel(x_ref, w0_ref, w1_ref, w2_ref, b_ref, g_ref, be_ref,
                       rm_ref, rv_ref, o_ref, m_scr):
    # circular Conv1d(k=3) + BatchNorm1d (inference) + ELU + MaxPool1d(3, s=2, p=1)
    # for one batch: rolls for neighbours, iota masks for the pool boundary,
    # stride-2 downsample via a strided pl.ds read from VMEM scratch.
    L = x_ref.shape[0]
    Lout = o_ref.shape[0]
    x = x_ref[...]                              # (L, C) f32
    x_m1 = pltpu.roll(x, 1, axis=0)
    x_p1 = pltpu.roll(x, L - 1, axis=0)
    c = jnp.dot(_bf16(x_m1), w0_ref[...], preferred_element_type=jnp.float32)
    c = c + jnp.dot(_bf16(x), w1_ref[...], preferred_element_type=jnp.float32)
    c = c + jnp.dot(_bf16(x_p1), w2_ref[...], preferred_element_type=jnp.float32)
    c = c + b_ref[...]
    c = (c - rm_ref[...]) * lax.rsqrt(rv_ref[...] + 1e-5) * g_ref[...] + be_ref[...]
    a = jnp.where(c > 0, c, jnp.exp(c) - 1.0)                   # ELU(alpha=1)
    t = lax.broadcasted_iota(jnp.int32, (L, 1), 0)
    neg = jnp.float32(-1e30)                                    # f32 pool sentinel
    a_prev = jnp.where(t == 0, neg, pltpu.roll(a, 1, axis=0))
    a_next = jnp.where(t == L - 1, neg, pltpu.roll(a, L - 1, axis=0))
    m_scr[...] = jnp.maximum(jnp.maximum(a_prev, a), a_next)
    o_ref[...] = m_scr[pl.ds(0, Lout, stride=2), :]             # even rows


# ------------------------------ pallas wrappers -------------------------------

def token_embed(x, emb, pe):
    B, L, Cin = x.shape
    D = emb['w'][0].shape[1]
    out = pl.pallas_call(
        _embed_kernel,
        out_shape=jax.ShapeDtypeStruct((B, L, D), jnp.float32),
        grid=(B,),
        in_specs=[pl.BlockSpec((None, L, Cin), lambda b: (b, 0, 0)),
                  pl.BlockSpec((Cin, D), lambda b: (0, 0)),
                  pl.BlockSpec((Cin, D), lambda b: (0, 0)),
                  pl.BlockSpec((Cin, D), lambda b: (0, 0)),
                  pl.BlockSpec((1, D), lambda b: (0, 0)),
                  pl.BlockSpec((L, D), lambda b: (0, 0))],
        out_specs=pl.BlockSpec((None, L, D), lambda b: (b, 0, 0)),
        compiler_params=_par(),
    )(x, emb['w'][0], emb['w'][1], emb['w'][2], emb['b'], pe)
    return out.reshape(B * L, D)


def conv_layer_forward(x_flat, B, L, cp):
    C = x_flat.shape[-1]
    Lout = L // 2
    out = pl.pallas_call(
        _conv_layer_kernel,
        out_shape=jax.ShapeDtypeStruct((B, Lout, C), jnp.float32),
        grid=(B,),
        in_specs=[pl.BlockSpec((None, L, C), lambda b: (b, 0, 0))] +
                 [pl.BlockSpec((C, C), lambda b: (0, 0))] * 3 +
                 [pl.BlockSpec((1, C), lambda b: (0, 0))] * 5,
        out_specs=pl.BlockSpec((None, Lout, C), lambda b: (b, 0, 0)),
        scratch_shapes=[pltpu.VMEM((L, C), jnp.float32)],
        compiler_params=_par(),
    )(x_flat.reshape(B, L, C), cp['w'][0], cp['w'][1], cp['w'][2], cp['b'],
      cp['bn_g'], cp['bn_b'], cp['bn_m'], cp['bn_v'])
    return out.reshape(B * Lout, C)


def encoder_layer_forward(x_flat, B, L, lp, n_heads, factor, key,
                          final_norm, norm_g, norm_b):
    D = x_flat.shape[-1]
    d_ff = lp['W1'].shape[1]
    H = n_heads
    dk = D // H
    rows = B * L
    blk = _row_block(rows)

    # (1) fused QKV projection, row-tiled ("parallel" -> megacore sharding)
    qkv = pl.pallas_call(
        _qkv_kernel,
        out_shape=jax.ShapeDtypeStruct((rows, 3 * D), jnp.float32),
        grid=(rows // blk,),
        in_specs=[pl.BlockSpec((blk, D), lambda i: (i, 0)),
                  pl.BlockSpec((D, 3 * D), lambda i: (0, 0)),
                  pl.BlockSpec((1, 3 * D), lambda i: (0, 0))],
        out_specs=pl.BlockSpec((blk, 3 * D), lambda i: (i, 0)),
        compiler_params=_par(),
    )(x_flat, lp['Wqkv'], lp['bqkv'])

    qkv = qkv.reshape(B, L, 3, H, dk)
    Q = jnp.transpose(qkv[:, :, 0], (0, 2, 1, 3))        # (B, H, L, dk)
    K = jnp.transpose(qkv[:, :, 1], (0, 2, 1, 3))
    V = jnp.transpose(qkv[:, :, 2], (0, 2, 1, 3))

    # --- ProbSparse sparsity measurement / top-u query selection (XLA glue) ---
    # TODO(synk): fuse sampled-QK measurement + top-k context scatter into Pallas
    # via scalar-prefetched idx_sample / M_top to remove these HBM round-trips.
    # TODO(synk): torch.randint RNG cannot be matched bit-for-bit; jax.random used.
    U_part = min(int(factor * math.ceil(math.log(L))), L)
    u = min(int(factor * math.ceil(math.log(L))), L)
    idx_sample = jax.random.randint(key, (L, U_part), 0, L)
    K_sample = K[:, :, idx_sample, :]                                # (B,H,L,U_part,dk)
    QK_sample = jnp.einsum('bhld,bhlsd->bhls', Q, K_sample)
    M = QK_sample.max(-1) - QK_sample.sum(-1) / L
    _, M_top = lax.top_k(M, u)                                       # (B,H,u)
    Q_reduce = jnp.take_along_axis(Q, M_top[..., None], axis=2)      # (B,H,u,dk)

    # (2) heavy attention math, all (B,H) pairs in one kernel step
    scale = 1.0 / math.sqrt(dk)
    upd = pl.pallas_call(
        functools.partial(_attn_core_kernel, scale=scale),
        out_shape=jax.ShapeDtypeStruct((B * H, u, dk), jnp.float32),
    )(Q_reduce.reshape(B * H, u, dk),
      K.reshape(B * H, L, dk),
      V.reshape(B * H, L, dk)).reshape(B, H, u, dk)

    # initial context = mean(V) (mask_flag=False), scatter selected rows (XLA)
    vmean = jnp.mean(V, axis=2, keepdims=True)
    context = jnp.broadcast_to(vmean, (B, H, L, dk))
    b_idx = jnp.arange(B)[:, None, None]
    h_idx = jnp.arange(H)[None, :, None]
    context = context.at[b_idx, h_idx, M_top, :].set(upd)
    ctx_flat = jnp.transpose(context, (0, 2, 1, 3)).reshape(rows, D)

    # (3) fused out-proj + residual + LN1 + FFN(GELU) + LN2 (+ final encoder norm)
    return pl.pallas_call(
        functools.partial(_post_kernel, final_norm=final_norm),
        out_shape=jax.ShapeDtypeStruct((rows, D), jnp.float32),
        grid=(rows // blk,),
        in_specs=[pl.BlockSpec((blk, D), lambda i: (i, 0)),
                  pl.BlockSpec((blk, D), lambda i: (i, 0)),
                  pl.BlockSpec((D, D), lambda i: (0, 0)),
                  pl.BlockSpec((1, D), lambda i: (0, 0)),
                  pl.BlockSpec((D, d_ff), lambda i: (0, 0)),
                  pl.BlockSpec((1, d_ff), lambda i: (0, 0)),
                  pl.BlockSpec((d_ff, D), lambda i: (0, 0)),
                  pl.BlockSpec((1, D), lambda i: (0, 0)),
                  pl.BlockSpec((1, D), lambda i: (0, 0)),
                  pl.BlockSpec((1, D), lambda i: (0, 0)),
                  pl.BlockSpec((1, D), lambda i: (0, 0)),
                  pl.BlockSpec((1, D), lambda i: (0, 0)),
                  pl.BlockSpec((1, D), lambda i: (0, 0)),
                  pl.BlockSpec((1, D), lambda i: (0, 0))],
        out_specs=pl.BlockSpec((blk, D), lambda i: (i, 0)),
        compiler_params=_par(),
    )(x_flat, ctx_flat, lp['Wo'], lp['bo'], lp['W1'], lp['b1'], lp['W2'], lp['b2'],
      lp['ln1_g'], lp['ln1_b'], lp['ln2_g'], lp['ln2_b'], norm_g, norm_b)


# ------------------------------ model (JAX glue) ------------------------------

def positional_encoding(L, d_model):
    pos = np.arange(L, dtype=np.float32)[:, None]
    div = np.exp(np.arange(0, d_model, 2, dtype=np.float32) * -(math.log(10000.0) / d_model))
    pe = np.zeros((L, d_model), np.float32)
    pe[:, 0::2] = np.sin(pos * div)
    pe[:, 1::2] = np.cos(pos * div)
    return pe


def myformer_forward(params, x_enc, x_mark_enc, sample_keys, *, n_heads, factor):
    del x_mark_enc                      # DataEmbedding.forward ignores x_mark
    B, L, _ = x_enc.shape
    d_model = params['norm_g'].shape[1]
    pe = jnp.asarray(positional_encoding(L, d_model))   # (L, D), broadcast in-kernel
    x = token_embed(x_enc, params['embed'], pe)          # (B*L, d_model)
    attns = []
    n_layers = len(params['layers'])
    cur_L = L
    for l, lp in enumerate(params['layers']):
        is_last = (l == n_layers - 1)
        x = encoder_layer_forward(x, B, cur_L, lp, n_heads, factor, sample_keys[l],
                                  final_norm=is_last,
                                  norm_g=params['norm_g'], norm_b=params['norm_b'])
        attns.append(None)                               # output_attention=False
        if not is_last:                                  # distil=True -> ConvLayer
            x = conv_layer_forward(x, B, cur_L, params['convs'][l])
            cur_L //= 2
    return x.reshape(B, cur_L, d_model), attns


# ------------------------------ parameter init --------------------------------

def _uni(key, shape, scale):
    return jax.random.uniform(key, shape, jnp.float32, -scale, scale)


def init_params(key, enc_in, d_model, n_heads, d_ff, e_layers):
    keys = jax.random.split(key, 64)
    it = iter(range(64))
    nk = lambda: keys[next(it)]
    bf = jnp.bfloat16                                    # matmul weights in bf16
    params = {}
    s_emb = 1.0 / math.sqrt(enc_in * 3)
    params['embed'] = {'w': [_uni(nk(), (enc_in, d_model), s_emb).astype(bf) for _ in range(3)],
                       'b': _uni(nk(), (1, d_model), s_emb)}
    sd = 1.0 / math.sqrt(d_model)
    sf = 1.0 / math.sqrt(d_ff)
    layers = []
    for _ in range(e_layers):
        layers.append({
            'Wqkv': _uni(nk(), (d_model, 3 * d_model), sd).astype(bf),   # [Wq | Wk | Wv]
            'bqkv': _uni(nk(), (1, 3 * d_model), sd),
            'Wo': _uni(nk(), (d_model, d_model), sd).astype(bf),
            'bo': _uni(nk(), (1, d_model), sd),
            'W1': _uni(nk(), (d_model, d_ff), sd).astype(bf),
            'b1': _uni(nk(), (1, d_ff), sd),
            'W2': _uni(nk(), (d_ff, d_model), sf).astype(bf),
            'b2': _uni(nk(), (1, d_model), sf),
            'ln1_g': jnp.ones((1, d_model), jnp.float32), 'ln1_b': jnp.zeros((1, d_model), jnp.float32),
            'ln2_g': jnp.ones((1, d_model), jnp.float32), 'ln2_b': jnp.zeros((1, d_model), jnp.float32),
        })
    sc = 1.0 / math.sqrt(d_model * 3)
    convs = []
    for _ in range(e_layers - 1):
        convs.append({
            'w': [_uni(nk(), (d_model, d_model), sc).astype(bf) for _ in range(3)],
            'b': _uni(nk(), (1, d_model), sc),
            'bn_g': jnp.ones((1, d_model), jnp.float32), 'bn_b': jnp.zeros((1, d_model), jnp.float32),
            'bn_m': jnp.zeros((1, d_model), jnp.float32), 'bn_v': jnp.ones((1, d_model), jnp.float32),
        })
    params['layers'] = layers
    params['convs'] = convs
    params['norm_g'] = jnp.ones((1, d_model), jnp.float32)
    params['norm_b'] = jnp.zeros((1, d_model), jnp.float32)
    return params


# ----------------------------------- main --------------------------------------

if __name__ == "__main__":
    B, L, ENC_IN = 2, 16, 8
    D_MODEL, N_HEADS, D_FF, E_LAYERS, FACTOR = 32, 4, 64, 3, 5
    # TODO(synk): for production shapes pad d_model / d_ff to multiples of 128 so
    # every kernel output is lane-dense (toy dims here are below one lane tile).

    key = jax.random.PRNGKey(0)
    k_param, k_x, k_mark, k_samp = jax.random.split(key, 4)
    params = init_params(k_param, ENC_IN, D_MODEL, N_HEADS, D_FF, E_LAYERS)
    x_enc = jax.random.normal(k_x, (B, L, ENC_IN), jnp.float32)
    x_mark_enc = jax.random.normal(k_mark, (B, L, 4), jnp.float32)   # unused by forward
    sample_keys = jax.random.split(k_samp, E_LAYERS)

    fwd = jax.jit(functools.partial(myformer_forward, n_heads=N_HEADS, factor=FACTOR))
    enc_out, attns = fwd(params, x_enc, x_mark_enc, sample_keys)
    jax.block_until_ready(enc_out)

    assert enc_out.shape == (B, L // 4, D_MODEL)   # two distil ConvLayers halve L twice
    assert all(a is None for a in attns)
    assert bool(jnp.all(jnp.isfinite(enc_out)))
    print("KERNEL_OK")
</pallas_src>

<mosaic_0001>
module attributes {stable_mosaic.version = 11 : i64} {
  func.func @_embed_kernel(%arg0: i32, %arg1: memref<1x16x8xf32, #tpu.memory_space<vmem>>, %arg2: memref<8x32xbf16, #tpu.memory_space<vmem>>, %arg3: memref<8x32xbf16, #tpu.memory_space<vmem>>, %arg4: memref<8x32xbf16, #tpu.memory_space<vmem>>, %arg5: memref<1x32xf32, #tpu.memory_space<vmem>>, %arg6: memref<16x32xf32, #tpu.memory_space<vmem>>, %arg7: memref<1x16x32xf32, #tpu.memory_space<vmem>>) attributes {dimension_semantics = [#tpu.dimension_semantics<parallel>], iteration_bounds = array<i64: 2>, scalar_prefetch = 0 : i64, scratch_operands = 0 : i64, tpu.core_type = #tpu.core_type<tc>, window_params = [{transform_indices = @transform_0, window_bounds = array<i64: 1, 16, 8>}, {pipeline_mode = #tpu.pipeline_mode<synchronous>, transform_indices = @transform_1, window_bounds = array<i64: 8, 32>}, {pipeline_mode = #tpu.pipeline_mode<synchronous>, transform_indices = @transform_2, window_bounds = array<i64: 8, 32>}, {pipeline_mode = #tpu.pipeline_mode<synchronous>, transform_indices = @transform_3, window_bounds = array<i64: 8, 32>}, {pipeline_mode = #tpu.pipeline_mode<synchronous>, transform_indices = @transform_4, window_bounds = array<i64: 1, 32>}, {pipeline_mode = #tpu.pipeline_mode<synchronous>, transform_indices = @transform_5, window_bounds = array<i64: 16, 32>}, {transform_indices = @transform_6, window_bounds = array<i64: 1, 16, 32>}]} {
    %c0 = arith.constant 0 : index
    %c0_0 = arith.constant 0 : index
    %c0_1 = arith.constant 0 : index
    %0 = vector.load %arg1[%c0, %c0_0, %c0_1] : memref<1x16x8xf32, #tpu.memory_space<vmem>>, vector<1x16x8xf32>
    %1 = vector.shape_cast %0 : vector<1x16x8xf32> to vector<16x8xf32>
    %c1_i32 = arith.constant 1 : i32
    %2 = tpu.dynamic_rotate %1 by %c1_i32 dim 0 : vector<16x8xf32>, i32 -> vector<16x8xf32>
    %c15_i32 = arith.constant 15 : i32
    %3 = tpu.dynamic_rotate %1 by %c15_i32 dim 0 : vector<16x8xf32>, i32 -> vector<16x8xf32>
    %4 = arith.truncf %2 : vector<16x8xf32> to vector<16x8xbf16>
    %c0_2 = arith.constant 0 : index
    %c0_3 = arith.constant 0 : index
    %5 = vector.load %arg2[%c0_2, %c0_3] : memref<8x32xbf16, #tpu.memory_space<vmem>>, vector<8x32xbf16>
    %cst = arith.constant dense<0.000000e+00> : vector<16x32xf32>
    %6 = tpu.matmul %4, %5, %cst {dimension_numbers = #tpu.dot_dimension_numbers<[1], [0], [0], [1], [0, 0, 1, 1], [], []>} : vector<16x8xbf16>, vector<8x32xbf16>, vector<16x32xf32> -> vector<16x32xf32>
    %7 = arith.truncf %1 : vector<16x8xf32> to vector<16x8xbf16>
    %c0_4 = arith.constant 0 : index
    %c0_5 = arith.constant 0 : index
    %8 = vector.load %arg3[%c0_4, %c0_5] : memref<8x32xbf16, #tpu.memory_space<vmem>>, vector<8x32xbf16>
    %cst_6 = arith.constant dense<0.000000e+00> : vector<16x32xf32>
    %9 = tpu.matmul %7, %8, %cst_6 {dimension_numbers = #tpu.dot_dimension_numbers<[1], [0], [0], [1], [0, 0, 1, 1], [], []>} : vector<16x8xbf16>, vector<8x32xbf16>, vector<16x32xf32> -> vector<16x32xf32>
    %10 = arith.addf %6, %9 : vector<16x32xf32>
    %11 = arith.truncf %3 : vector<16x8xf32> to vector<16x8xbf16>
    %c0_7 = arith.constant 0 : index
    %c0_8 = arith.constant 0 : index
    %12 = vector.load %arg4[%c0_7, %c0_8] : memref<8x32xbf16, #tpu.memory_space<vmem>>, vector<8x32xbf16>
    %cst_9 = arith.constant dense<0.000000e+00> : vector<16x32xf32>
    %13 = tpu.matmul %11, %12, %cst_9 {dimension_numbers = #tpu.dot_dimension_numbers<[1], [0], [0], [1], [0, 0, 1, 1], [], []>} : vector<16x8xbf16>, vector<8x32xbf16>, vector<16x32xf32> -> vector<16x32xf32>
    %14 = arith.addf %10, %13 : vector<16x32xf32>
    %c0_10 = arith.constant 0 : index
    %c0_11 = arith.constant 0 : index
    %15 = vector.load %arg5[%c0_10, %c0_11] : memref<1x32xf32, #tpu.memory_space<vmem>>, vector<1x32xf32>
    %16 = vector.broadcast %15 : vector<1x32xf32> to vector<16x32xf32>
    %17 = arith.addf %14, %16 : vector<16x32xf32>
    %c0_12 = arith.constant 0 : index
    %c0_13 = arith.constant 0 : index
    %18 = vector.load %arg6[%c0_12, %c0_13] : memref<16x32xf32, #tpu.memory_space<vmem>>, vector<16x32xf32>
    %19 = arith.addf %17, %18 : vector<16x32xf32>
    %c0_14 = arith.constant 0 : index
    %c0_15 = arith.constant 0 : index
    %c0_16 = arith.constant 0 : index
    %20 = vector.load %arg7[%c0_14, %c0_15, %c0_16] : memref<1x16x32xf32, #tpu.memory_space<vmem>>, vector<1x16x32xf32>
    %21 = vector.shape_cast %20 : vector<1x16x32xf32> to vector<16x32xf32>
    %22 = vector.shape_cast %19 : vector<16x32xf32> to vector<1x16x32xf32>
    tpu.vector_store %arg7[%c0_14, %c0_15, %c0_16], %22 {strides = array<i32>} : memref<1x16x32xf32, #tpu.memory_space<vmem>>, vector<1x16x32xf32>,
    return
  }
  func.func @transform_0(%arg0: i32) -> (i32, i32, i32) {
    %c0_i32 = arith.constant 0 : i32
    %c0_i32_0 = arith.constant 0 : i32
    %c0_i32_1 = arith.constant 0 : i32
    return %arg0, %c0_i32, %c0_i32_0 : i32, i32, i32
  }
  func.func @transform_1(%arg0: i32) -> (i32, i32) {
    %c0_i32 = arith.constant 0 : i32
    %c0_i32_0 = arith.constant 0 : i32
    %c0_i32_1 = arith.constant 0 : i32
    return %c0_i32, %c0_i32_0 : i32, i32
  }
  func.func @transform_2(%arg0: i32) -> (i32, i32) {
    %c0_i32 = arith.constant 0 : i32
    %c0_i32_0 = arith.constant 0 : i32
    %c0_i32_1 = arith.constant 0 : i32
    return %c0_i32, %c0_i32_0 : i32, i32
  }
  func.func @transform_3(%arg0: i32) -> (i32, i32) {
    %c0_i32 = arith.constant 0 : i32
    %c0_i32_0 = arith.constant 0 : i32
    %c0_i32_1 = arith.constant 0 : i32
    return %c0_i32, %c0_i32_0 : i32, i32
  }
  func.func @transform_4(%arg0: i32) -> (i32, i32) {
    %c0_i32 = arith.constant 0 : i32
    %c0_i32_0 = arith.constant 0 : i32
    %c0_i32_1 = arith.constant 0 : i32
    return %c0_i32, %c0_i32_0 : i32, i32
  }
  func.func @transform_5(%arg0: i32) -> (i32, i32) {
    %c0_i32 = arith.constant 0 : i32
    %c0_i32_0 = arith.constant 0 : i32
    %c0_i32_1 = arith.constant 0 : i32
    return %c0_i32, %c0_i32_0 : i32, i32
  }
  func.func @transform_6(%arg0: i32) -> (i32, i32, i32) {
    %c0_i32 = arith.constant 0 : i32
    %c0_i32_0 = arith.constant 0 : i32
    %c0_i32_1 = arith.constant 0 : i32
    return %arg0, %c0_i32, %c0_i32_0 : i32, i32, i32
  }
}

module attributes {stable_mosaic.version = 11 : i64} {
  func.func @_qkv_kernel(%arg0: i32, %arg1: memref<32x32xf32, #tpu.memory_space<vmem>>, %arg2: memref<32x96xbf16, #tpu.memory_space<vmem>>, %arg3: memref<1x96xf32, #tpu.memory_space<vmem>>, %arg4: memref<32x96xf32, #tpu.memory_space<vmem>>) attributes {dimension_semantics = [#tpu.dimension_semantics<parallel>], iteration_bounds = array<i64: 1>, scalar_prefetch = 0 : i64, scratch_operands = 0 : i64, tpu.core_type = #tpu.core_type<tc>, window_params = [{transform_indices = @transform_0, window_bounds = array<i64: 32, 32>}, {pipeline_mode = #tpu.pipeline_mode<synchronous>, transform_indices = @transform_1, window_bounds = array<i64: 32, 96>}, {pipeline_mode = #tpu.pipeline_mode<synchronous>, transform_indices = @transform_2, window_bounds = array<i64: 1, 96>}, {transform_indices = @transform_3, window_bounds = array<i64: 32, 96>}]} {
    %c0 = arith.constant 0 : index
    %c0_0 = arith.constant 0 : index
    %0 = vector.load %arg1[%c0, %c0_0] : memref<32x32xf32, #tpu.memory_space<vmem>>, vector<32x32xf32>
    %1 = arith.truncf %0 : vector<32x32xf32> to vector<32x32xbf16>
    %c0_1 = arith.constant 0 : index
    %c0_2 = arith.constant 0 : index
    %2 = vector.load %arg2[%c0_1, %c0_2] : memref<32x96xbf16, #tpu.memory_space<vmem>>, vector<32x96xbf16>
    %cst = arith.constant dense<0.000000e+00> : vector<32x96xf32>
    %3 = tpu.matmul %1, %2, %cst {dimension_numbers = #tpu.dot_dimension_numbers<[1], [0], [0], [1], [0, 0, 1, 1], [], []>} : vector<32x32xbf16>, vector<32x96xbf16>, vector<32x96xf32> -> vector<32x96xf32>
    %c0_3 = arith.constant 0 : index
    %c0_4 = arith.constant 0 : index
    %4 = vector.load %arg3[%c0_3, %c0_4] : memref<1x96xf32, #tpu.memory_space<vmem>>, vector<1x96xf32>
    %5 = vector.broadcast %4 : vector<1x96xf32> to vector<32x96xf32>
    %6 = arith.addf %3, %5 : vector<32x96xf32>
    %c0_5 = arith.constant 0 : index
    %c0_6 = arith.constant 0 : index
    %7 = vector.load %arg4[%c0_5, %c0_6] : memref<32x96xf32, #tpu.memory_space<vmem>>, vector<32x96xf32>
    tpu.vector_store %arg4[%c0_5, %c0_6], %6 {strides = array<i32>} : memref<32x96xf32, #tpu.memory_space<vmem>>, vector<32x96xf32>,
    return
  }
  func.func @transform_0(%arg0: i32) -> (i32, i32) {
    %c0_i32 = arith.constant 0 : i32
    %c0_i32_0 = arith.constant 0 : i32
    return %arg0, %c0_i32 : i32, i32
  }
  func.func @transform_1(%arg0: i32) -> (i32, i32) {
    %c0_i32 = arith.constant 0 : i32
    %c0_i32_0 = arith.constant 0 : i32
    %c0_i32_1 = arith.constant 0 : i32
    return %c0_i32, %c0_i32_0 : i32, i32
  }
  func.func @transform_2(%arg0: i32) -> (i32, i32) {
    %c0_i32 = arith.constant 0 : i32
    %c0_i32_0 = arith.constant 0 : i32
    %c0_i32_1 = arith.constant 0 : i32
    return %c0_i32, %c0_i32_0 : i32, i32
  }
  func.func @transform_3(%arg0: i32) -> (i32, i32) {
    %c0_i32 = arith.constant 0 : i32
    %c0_i32_0 = arith.constant 0 : i32
    return %arg0, %c0_i32 : i32, i32
  }
}

module attributes {stable_mosaic.version = 11 : i64} {
  func.func @_attn_core_kernel(%arg0: memref<8x15x8xf32, #tpu.memory_space<vmem>>, %arg1: memref<8x16x8xf32, #tpu.memory_space<vmem>>, %arg2: memref<8x16x8xf32, #tpu.memory_space<vmem>>, %arg3: memref<8x15x8xf32, #tpu.memory_space<vmem>>) attributes {dimension_semantics = [], scalar_prefetch = 0 : i64, scratch_operands = 0 : i64, tpu.core_type = #tpu.core_type<tc>} {
    %c0 = arith.constant 0 : index
    %c0_0 = arith.constant 0 : index
    %c0_1 = arith.constant 0 : index
    %0 = vector.load %arg0[%c0, %c0_0, %c0_1] : memref<8x15x8xf32, #tpu.memory_space<vmem>>, vector<8x15x8xf32>
    %1 = arith.truncf %0 : vector<8x15x8xf32> to vector<8x15x8xbf16>
    %c0_2 = arith.constant 0 : index
    %c0_3 = arith.constant 0 : index
    %c0_4 = arith.constant 0 : index
    %2 = vector.load %arg1[%c0_2, %c0_3, %c0_4] : memref<8x16x8xf32, #tpu.memory_space<vmem>>, vector<8x16x8xf32>
    %3 = arith.truncf %2 : vector<8x16x8xf32> to vector<8x16x8xbf16>
    %c0_5 = arith.constant 0 : index
    %c0_6 = arith.constant 0 : index
    %c0_7 = arith.constant 0 : index
    %4 = vector.load %arg2[%c0_5, %c0_6, %c0_7] : memref<8x16x8xf32, #tpu.memory_space<vmem>>, vector<8x16x8xf32>
    %5 = arith.truncf %4 : vector<8x16x8xf32> to vector<8x16x8xbf16>
    "tpu.trace_start"() <{level = 10 : i32, message = "bud,bld->bul"}> : () -> ()
    %cst = arith.constant dense<0.000000e+00> : vector<8x15x16xf32>
    %6 = tpu.matmul %1, %3, %cst {dimension_numbers = #tpu.dot_dimension_numbers<[2], [2], [1], [1], [0, 0, 0, 1, 1, 1], [0], [0]>} : vector<8x15x8xbf16>, vector<8x16x8xbf16>, vector<8x15x16xf32> -> vector<8x15x16xf32>
    "tpu.trace_stop"() : () -> ()
    %cst_8 = arith.constant 0.353553385 : f32
    %7 = vector.broadcast %cst_8 : f32 to vector<8x15x16xf32>
    %8 = arith.mulf %6, %7 : vector<8x15x16xf32>
    %cst_9 = arith.constant dense<0xFF800000> : vector<8x15xf32>
    %9 = vector.multi_reduction <maximumf>, %8, %cst_9 [2] : vector<8x15x16xf32> to vector<8x15xf32>
    %10 = vector.shape_cast %9 : vector<8x15xf32> to vector<8x15x1xf32>
    %11 = vector.broadcast %10 : vector<8x15x1xf32> to vector<8x15x16xf32>
    %12 = arith.subf %8, %11 : vector<8x15x16xf32>
    %13 = math.exp %12 : vector<8x15x16xf32>
    %cst_10 = arith.constant dense<0.000000e+00> : vector<8x15xf32>
    %14 = vector.multi_reduction <add>, %13, %cst_10 [2] : vector<8x15x16xf32> to vector<8x15xf32>
    %15 = vector.shape_cast %14 : vector<8x15xf32> to vector<8x15x1xf32>
    %16 = tpu.reciprocal %15 {approx = true} : vector<8x15x1xf32> -> vector<8x15x1xf32>
    %17 = vector.broadcast %16 : vector<8x15x1xf32> to vector<8x15x16xf32>
    %18 = arith.mulf %13, %17 : vector<8x15x16xf32>
    %19 = arith.truncf %18 : vector<8x15x16xf32> to vector<8x15x16xbf16>
    "tpu.trace_start"() <{level = 10 : i32, message = "bul,bld->bud"}> : () -> ()
    %cst_11 = arith.constant dense<0.000000e+00> : vector<8x15x8xf32>
    %20 = tpu.matmul %19, %5, %cst_11 {dimension_numbers = #tpu.dot_dimension_numbers<[2], [1], [1], [2], [0, 0, 0, 1, 1, 2], [0], [0]>} : vector<8x15x16xbf16>, vector<8x16x8xbf16>, vector<8x15x8xf32> -> vector<8x15x8xf32>
    "tpu.trace_stop"() : () -> ()
    %c0_12 = arith.constant 0 : index
    %c0_13 = arith.constant 0 : index
    %c0_14 = arith.constant 0 : index
    %21 = vector.load %arg3[%c0_12, %c0_13, %c0_14] : memref<8x15x8xf32, #tpu.memory_space<vmem>>, vector<8x15x8xf32>
    tpu.vector_store %arg3[%c0_12, %c0_13, %c0_14], %20 {strides = array<i32>} : memref<8x15x8xf32, #tpu.memory_space<vmem>>, vector<8x15x8xf32>,
    return
  }
}

module attributes {stable_mosaic.version = 11 : i64} {
  func.func @_post_kernel(%arg0: i32, %arg1: memref<32x32xf32, #tpu.memory_space<vmem>>, %arg2: memref<32x32xf32, #tpu.memory_space<vmem>>, %arg3: memref<32x32xbf16, #tpu.memory_space<vmem>>, %arg4: memref<1x32xf32, #tpu.memory_space<vmem>>, %arg5: memref<32x64xbf16, #tpu.memory_space<vmem>>, %arg6: memref<1x64xf32, #tpu.memory_space<vmem>>, %arg7: memref<64x32xbf16, #tpu.memory_space<vmem>>, %arg8: memref<1x32xf32, #tpu.memory_space<vmem>>, %arg9: memref<1x32xf32, #tpu.memory_space<vmem>>, %arg10: memref<1x32xf32, #tpu.memory_space<vmem>>, %arg11: memref<1x32xf32, #tpu.memory_space<vmem>>, %arg12: memref<1x32xf32, #tpu.memory_space<vmem>>, %arg13: memref<1x32xf32, #tpu.memory_space<vmem>>, %arg14: memref<1x32xf32, #tpu.memory_space<vmem>>, %arg15: memref<32x32xf32, #tpu.memory_space<vmem>>) attributes {dimension_semantics = [#tpu.dimension_semantics<parallel>], iteration_bounds = array<i64: 1>, scalar_prefetch = 0 : i64, scratch_operands = 0 : i64, tpu.core_type = #tpu.core_type<tc>, window_params = [{transform_indices = @transform_0, window_bounds = array<i64: 32, 32>}, {transform_indices = @transform_1, window_bounds = array<i64: 32, 32>}, {pipeline_mode = #tpu.pipeline_mode<synchronous>, transform_indices = @transform_2, window_bounds = array<i64: 32, 32>}, {pipeline_mode = #tpu.pipeline_mode<synchronous>, transform_indices = @transform_3, window_bounds = array<i64: 1, 32>}, {pipeline_mode = #tpu.pipeline_mode<synchronous>, transform_indices = @transform_4, window_bounds = array<i64: 32, 64>}, {pipeline_mode = #tpu.pipeline_mode<synchronous>, transform_indices = @transform_5, window_bounds = array<i64: 1, 64>}, {pipeline_mode = #tpu.pipeline_mode<synchronous>, transform_indices = @transform_6, window_bounds = array<i64: 64, 32>}, {pipeline_mode = #tpu.pipeline_mode<synchronous>, transform_indices = @transform_7, window_bounds = array<i64: 1, 32>}, {pipeline_mode = #tpu.pipeline_mode<synchronous>, transform_indices = @transform_8, window_bounds = array<i64: 1, 32>}, {pipeline_mode = #tpu.pipeline_mode<synchronous>, transform_indices = @transform_9, window_bounds = array<i64: 1, 32>}, {pipeline_mode = #tpu.pipeline_mode<synchronous>, transform_indices = @transform_10, window_bounds = array<i64: 1, 32>}, {pipeline_mode = #tpu.pipeline_mode<synchronous>, transform_indices = @transform_11, window_bounds = array<i64: 1, 32>}, {pipeline_mode = #tpu.pipeline_mode<synchronous>, transform_indices = @transform_12, window_bounds = array<i64: 1, 32>}, {pipeline_mode = #tpu.pipeline_mode<synchronous>, transform_indices = @transform_13, window_bounds = array<i64: 1, 32>}, {transform_indices = @transform_14, window_bounds = array<i64: 32, 32>}]} {
    %c0 = arith.constant 0 : index
    %c0_0 = arith.constant 0 : index
    %0 = vector.load %arg1[%c0, %c0_0] : memref<32x32xf32, #tpu.memory_space<vmem>>, vector<32x32xf32>
    %c0_1 = arith.constant 0 : index
    %c0_2 = arith.constant 0 : index
    %1 = vector.load %arg2[%c0_1, %c0_2] : memref<32x32xf32, #tpu.memory_space<vmem>>, vector<32x32xf32>
    %2 = arith.truncf %1 : vector<32x32xf32> to vector<32x32xbf16>
    %c0_3 = arith.constant 0 : index
    %c0_4 = arith.constant 0 : index
    %3 = vector.load %arg3[%c0_3, %c0_4] : memref<32x32xbf16, #tpu.memory_space<vmem>>, vector<32x32xbf16>
    %cst = arith.constant dense<0.000000e+00> : vector<32x32xf32>
    %4 = tpu.matmul %2, %3, %cst {dimension_numbers = #tpu.dot_dimension_numbers<[1], [0], [0], [1], [0, 0, 1, 1], [], []>} : vector<32x32xbf16>, vector<32x32xbf16>, vector<32x32xf32> -> vector<32x32xf32>
    %c0_5 = arith.constant 0 : index
    %c0_6 = arith.constant 0 : index
    %5 = vector.load %arg4[%c0_5, %c0_6] : memref<1x32xf32, #tpu.memory_space<vmem>>, vector<1x32xf32>
    %6 = vector.broadcast %5 : vector<1x32xf32> to vector<32x32xf32>
    %7 = arith.addf %4, %6 : vector<32x32xf32>
    %8 = arith.addf %0, %7 : vector<32x32xf32>
    %c0_7 = arith.constant 0 : index
    %c0_8 = arith.constant 0 : index
    %9 = vector.load %arg9[%c0_7, %c0_8] : memref<1x32xf32, #tpu.memory_space<vmem>>, vector<1x32xf32>
    %c0_9 = arith.constant 0 : index
    %c0_10 = arith.constant 0 : index
    %10 = vector.load %arg10[%c0_9, %c0_10] : memref<1x32xf32, #tpu.memory_space<vmem>>, vector<1x32xf32>
    %cst_11 = arith.constant dense<0.000000e+00> : vector<32xf32>
    %11 = vector.multi_reduction <add>, %8, %cst_11 [1] : vector<32x32xf32> to vector<32xf32>
    %12 = vector.shape_cast %11 : vector<32xf32> to vector<32x1xf32>
    %cst_12 = arith.constant 3.200000e+01 : f32
    %13 = vector.broadcast %cst_12 : f32 to vector<32x1xf32>
    %14 = arith.divf %12, %13 : vector<32x1xf32>
    %15 = vector.broadcast %14 : vector<32x1xf32> to vector<32x32xf32>
    %16 = arith.subf %8, %15 : vector<32x32xf32>
    %17 = arith.mulf %16, %16 : vector<32x32xf32>
    %cst_13 = arith.constant dense<0.000000e+00> : vector<32xf32>
    %18 = vector.multi_reduction <add>, %17, %cst_13 [1] : vector<32x32xf32> to vector<32xf32>
    %19 = vector.shape_cast %18 : vector<32xf32> to vector<32x1xf32>
    %cst_14 = arith.constant 3.200000e+01 : f32
    %20 = vector.broadcast %cst_14 : f32 to vector<32x1xf32>
    %21 = arith.divf %19, %20 : vector<32x1xf32>
    %cst_15 = arith.constant 9.99999974E-6 : f32
    %22 = vector.broadcast %cst_15 : f32 to vector<32x1xf32>
    %23 = arith.addf %21, %22 : vector<32x1xf32>
    %24 = math.rsqrt %23 : vector<32x1xf32>
    %25 = vector.broadcast %24 : vector<32x1xf32> to vector<32x32xf32>
    %26 = arith.mulf %16, %25 : vector<32x32xf32>
    %27 = vector.broadcast %9 : vector<1x32xf32> to vector<32x32xf32>
    %28 = arith.mulf %26, %27 : vector<32x32xf32>
    %29 = vector.broadcast %10 : vector<1x32xf32> to vector<32x32xf32>
    %30 = arith.addf %28, %29 : vector<32x32xf32>
    %31 = arith.truncf %30 : vector<32x32xf32> to vector<32x32xbf16>
    %c0_16 = arith.constant 0 : index
    %c0_17 = arith.constant 0 : index
    %32 = vector.load %arg5[%c0_16, %c0_17] : memref<32x64xbf16, #tpu.memory_space<vmem>>, vector<32x64xbf16>
    %cst_18 = arith.constant dense<0.000000e+00> : vector<32x64xf32>
    %33 = tpu.matmul %31, %32, %cst_18 {dimension_numbers = #tpu.dot_dimension_numbers<[1], [0], [0], [1], [0, 0, 1, 1], [], []>} : vector<32x32xbf16>, vector<32x64xbf16>, vector<32x64xf32> -> vector<32x64xf32>
    %c0_19 = arith.constant 0 : index
    %c0_20 = arith.constant 0 : index
    %34 = vector.load %arg6[%c0_19, %c0_20] : memref<1x64xf32, #tpu.memory_space<vmem>>, vector<1x64xf32>
    %35 = vector.broadcast %34 : vector<1x64xf32> to vector<32x64xf32>
    %36 = arith.addf %33, %35 : vector<32x64xf32>
    %cst_21 = arith.constant 5.000000e-01 : f32
    %37 = vector.broadcast %cst_21 : f32 to vector<32x64xf32>
    %38 = arith.mulf %37, %36 : vector<32x64xf32>
    %cst_22 = arith.constant 4.471500e-02 : f32
    %39 = vector.broadcast %cst_22 : f32 to vector<32x64xf32>
    %40 = arith.mulf %39, %36 : vector<32x64xf32>
    %41 = arith.mulf %40, %36 : vector<32x64xf32>
    %42 = arith.mulf %41, %36 : vector<32x64xf32>
    %43 = arith.addf %36, %42 : vector<32x64xf32>
    %cst_23 = arith.constant 0.797884583 : f32
    %44 = vector.broadcast %cst_23 : f32 to vector<32x64xf32>
    %45 = arith.mulf %44, %43 : vector<32x64xf32>
    %46 = math.tanh %45 : vector<32x64xf32>
    %cst_24 = arith.constant 1.000000e+00 : f32
    %47 = vector.broadcast %cst_24 : f32 to vector<32x64xf32>
    %48 = arith.addf %47, %46 : vector<32x64xf32>
    %49 = arith.mulf %38, %48 : vector<32x64xf32>
    %50 = arith.truncf %49 : vector<32x64xf32> to vector<32x64xbf16>
    %c0_25 = arith.constant 0 : index
    %c0_26 = arith.constant 0 : index
    %51 = vector.load %arg7[%c0_25, %c0_26] : memref<64x32xbf16, #tpu.memory_space<vmem>>, vector<64x32xbf16>
    %cst_27 = arith.constant dense<0.000000e+00> : vector<32x32xf32>
    %52 = tpu.matmul %50, %51, %cst_27 {dimension_numbers = #tpu.dot_dimension_numbers<[1], [0], [0], [1], [0, 0, 1, 1], [], []>} : vector<32x64xbf16>, vector<64x32xbf16>, vector<32x32xf32> -> vector<32x32xf32>
    %c0_28 = arith.constant 0 : index
    %c0_29 = arith.constant 0 : index
    %53 = vector.load %arg8[%c0_28, %c0_29] : memref<1x32xf32, #tpu.memory_space<vmem>>, vector<1x32xf32>
    %54 = vector.broadcast %53 : vector<1x32xf32> to vector<32x32xf32>
    %55 = arith.addf %52, %54 : vector<32x32xf32>
    %56 = arith.addf %30, %55 : vector<32x32xf32>
    %c0_30 = arith.constant 0 : index
    %c0_31 = arith.constant 0 : index
    %57 = vector.load %arg11[%c0_30, %c0_31] : memref<1x32xf32, #tpu.memory_space<vmem>>, vector<1x32xf32>
    %c0_32 = arith.constant 0 : index
    %c0_33 = arith.constant 0 : index
    %58 = vector.load %arg12[%c0_32, %c0_33] : memref<1x32xf32, #tpu.memory_space<vmem>>, vector<1x32xf32>
    %cst_34 = arith.constant dense<0.000000e+00> : vector<32xf32>
    %59 = vector.multi_reduction <add>, %56, %cst_34 [1] : vector<32x32xf32> to vector<32xf32>
    %60 = vector.shape_cast %59 : vector<32xf32> to vector<32x1xf32>
    %cst_35 = arith.constant 3.200000e+01 : f32
    %61 = vector.broadcast %cst_35 : f32 to vector<32x1xf32>
    %62 = arith.divf %60, %61 : vector<32x1xf32>
    %63 = vector.broadcast %62 : vector<32x1xf32> to vector<32x32xf32>
    %64 = arith.subf %56, %63 : vector<32x32xf32>
    %65 = arith.mulf %64, %64 : vector<32x32xf32>
    %cst_36 = arith.constant dense<0.000000e+00> : vector<32xf32>
    %66 = vector.multi_reduction <add>, %65, %cst_36 [1] : vector<32x32xf32> to vector<32xf32>
    %67 = vector.shape_cast %66 : vector<32xf32> to vector<32x1xf32>
    %cst_37 = arith.constant 3.200000e+01 : f32
    %68 = vector.broadcast %cst_37 : f32 to vector<32x1xf32>
    %69 = arith.divf %67, %68 : vector<32x1xf32>
    %cst_38 = arith.constant 9.99999974E-6 : f32
    %70 = vector.broadcast %cst_38 : f32 to vector<32x1xf32>
    %71 = arith.addf %69, %70 : vector<32x1xf32>
    %72 = math.rsqrt %71 : vector<32x1xf32>
    %73 = vector.broadcast %72 : vector<32x1xf32> to vector<32x32xf32>
    %74 = arith.mulf %64, %73 : vector<32x32xf32>
    %75 = vector.broadcast %57 : vector<1x32xf32> to vector<32x32xf32>
    %76 = arith.mulf %74, %75 : vector<32x32xf32>
    %77 = vector.broadcast %58 : vector<1x32xf32> to vector<32x32xf32>
    %78 = arith.addf %76, %77 : vector<32x32xf32>
    %c0_39 = arith.constant 0 : index
    %c0_40 = arith.constant 0 : index
    %79 = vector.load %arg15[%c0_39, %c0_40] : memref<32x32xf32, #tpu.memory_space<vmem>>, vector<32x32xf32>
    tpu.vector_store %arg15[%c0_39, %c0_40], %78 {strides = array<i32>} : memref<32x32xf32, #tpu.memory_space<vmem>>, vector<32x32xf32>,
    return
  }
  func.func @transform_0(%arg0: i32) -> (i32, i32) {
    %c0_i32 = arith.constant 0 : i32
    %c0_i32_0 = arith.constant 0 : i32
    return %arg0, %c0_i32 : i32, i32
  }
  func.func @transform_1(%arg0: i32) -> (i32, i32) {
    %c0_i32 = arith.constant 0 : i32
    %c0_i32_0 = arith.constant 0 : i32
    return %arg0, %c0_i32 : i32, i32
  }
  func.func @transform_2(%arg0: i32) -> (i32, i32) {
    %c0_i32 = arith.constant 0 : i32
    %c0_i32_0 = arith.constant 0 : i32
    %c0_i32_1 = arith.constant 0 : i32
    return %c0_i32, %c0_i32_0 : i32, i32
  }
  func.func @transform_3(%arg0: i32) -> (i32, i32) {
    %c0_i32 = arith.constant 0 : i32
    %c0_i32_0 = arith.constant 0 : i32
    %c0_i32_1 = arith.constant 0 : i32
    return %c0_i32, %c0_i32_0 : i32, i32
  }
  func.func @transform_4(%arg0: i32) -> (i32, i32) {
    %c0_i32 = arith.constant 0 : i32
    %c0_i32_0 = arith.constant 0 : i32
    %c0_i32_1 = arith.constant 0 : i32
    return %c0_i32, %c0_i32_0 : i32, i32
  }
  func.func @transform_5(%arg0: i32) -> (i32, i32) {
    %c0_i32 = arith.constant 0 : i32
    %c0_i32_0 = arith.constant 0 : i32
    %c0_i32_1 = arith.constant 0 : i32
    return %c0_i32, %c0_i32_0 : i32, i32
  }
  func.func @transform_6(%arg0: i32) -> (i32, i32) {
    %c0_i32 = arith.constant 0 : i32
    %c0_i32_0 = arith.constant 0 : i32
    %c0_i32_1 = arith.constant 0 : i32
    return %c0_i32, %c0_i32_0 : i32, i32
  }
  func.func @transform_7(%arg0: i32) -> (i32, i32) {
    %c0_i32 = arith.constant 0 : i32
    %c0_i32_0 = arith.constant 0 : i32
    %c0_i32_1 = arith.constant 0 : i32
    return %c0_i32, %c0_i32_0 : i32, i32
  }
  func.func @transform_8(%arg0: i32) -> (i32, i32) {
    %c0_i32 = arith.constant 0 : i32
    %c0_i32_0 = arith.constant 0 : i32
    %c0_i32_1 = arith.constant 0 : i32
    return %c0_i32, %c0_i32_0 : i32, i32
  }
  func.func @transform_9(%arg0: i32) -> (i32, i32) {
    %c0_i32 = arith.constant 0 : i32
    %c0_i32_0 = arith.constant 0 : i32
    %c0_i32_1 = arith.constant 0 : i32
    return %c0_i32, %c0_i32_0 : i32, i32
  }
  func.func @transform_10(%arg0: i32) -> (i32, i32) {
    %c0_i32 = arith.constant 0 : i32
    %c0_i32_0 = arith.constant 0 : i32
    %c0_i32_1 = arith.constant 0 : i32
    return %c0_i32, %c0_i32_0 : i32, i32
  }
  func.func @transform_11(%arg0: i32) -> (i32, i32) {
    %c0_i32 = arith.constant 0 : i32
    %c0_i32_0 = arith.constant 0 : i32
    %c0_i32_1 = arith.constant 0 : i32
    return %c0_i32, %c0_i32_0 : i32, i32
  }
  func.func @transform_12(%arg0: i32) -> (i32, i32) {
    %c0_i32 = arith.constant 0 : i32
    %c0_i32_0 = arith.constant 0 : i32
    %c0_i32_1 = arith.constant 0 : i32
    return %c0_i32, %c0_i32_0 : i32, i32
  }
  func.func @transform_13(%arg0: i32) -> (i32, i32) {
    %c0_i32 = arith.constant 0 : i32
    %c0_i32_0 = arith.constant 0 : i32
    %c0_i32_1 = arith.constant 0 : i32
    return %c0_i32, %c0_i32_0 : i32, i32
  }
  func.func @transform_14(%arg0: i32) -> (i32, i32) {
    %c0_i32 = arith.constant 0 : i32
    %c0_i32_0 = arith.constant 0 : i32
    return %arg0, %c0_i32 : i32, i32
  }
}

module attributes {stable_mosaic.version = 11 : i64} {
  func.func @_conv_layer_kernel(%arg0: i32, %arg1: memref<1x16x32xf32, #tpu.memory_space<vmem>>, %arg2: memref<32x32xbf16, #tpu.memory_space<vmem>>, %arg3: memref<32x32xbf16, #tpu.memory_space<vmem>>, %arg4: memref<32x32xbf16, #tpu.memory_space<vmem>>, %arg5: memref<1x32xf32, #tpu.memory_space<vmem>>, %arg6: memref<1x32xf32, #tpu.memory_space<vmem>>, %arg7: memref<1x32xf32, #tpu.memory_space<vmem>>, %arg8: memref<1x32xf32, #tpu.memory_space<vmem>>, %arg9: memref<1x32xf32, #tpu.memory_space<vmem>>, %arg10: memref<1x8x32xf32, #tpu.memory_space<vmem>>, %arg11: memref<16x32xf32, #tpu.memory_space<vmem>>) attributes {dimension_semantics = [#tpu.dimension_semantics<parallel>], iteration_bounds = array<i64: 2>, scalar_prefetch = 0 : i64, scratch_operands = 1 : i64, tpu.core_type = #tpu.core_type<tc>, window_params = [{transform_indices = @transform_0, window_bounds = array<i64: 1, 16, 32>}, {pipeline_mode = #tpu.pipeline_mode<synchronous>, transform_indices = @transform_1, window_bounds = array<i64: 32, 32>}, {pipeline_mode = #tpu.pipeline_mode<synchronous>, transform_indices = @transform_2, window_bounds = array<i64: 32, 32>}, {pipeline_mode = #tpu.pipeline_mode<synchronous>, transform_indices = @transform_3, window_bounds = array<i64: 32, 32>}, {pipeline_mode = #tpu.pipeline_mode<synchronous>, transform_indices = @transform_4, window_bounds = array<i64: 1, 32>}, {pipeline_mode = #tpu.pipeline_mode<synchronous>, transform_indices = @transform_5, window_bounds = array<i64: 1, 32>}, {pipeline_mode = #tpu.pipeline_mode<synchronous>, transform_indices = @transform_6, window_bounds = array<i64: 1, 32>}, {pipeline_mode = #tpu.pipeline_mode<synchronous>, transform_indices = @transform_7, window_bounds = array<i64: 1, 32>}, {pipeline_mode = #tpu.pipeline_mode<synchronous>, transform_indices = @transform_8, window_bounds = array<i64: 1, 32>}, {transform_indices = @transform_9, window_bounds = array<i64: 1, 8, 32>}]} {
    %c0 = arith.constant 0 : index
    %c0_0 = arith.constant 0 : index
    %c0_1 = arith.constant 0 : index
    %0 = vector.load %arg1[%c0, %c0_0, %c0_1] : memref<1x16x32xf32, #tpu.memory_space<vmem>>, vector<1x16x32xf32>
    %1 = vector.shape_cast %0 : vector<1x16x32xf32> to vector<16x32xf32>
    %c1_i32 = arith.constant 1 : i32
    %2 = tpu.dynamic_rotate %1 by %c1_i32 dim 0 : vector<16x32xf32>, i32 -> vector<16x32xf32>
    %c15_i32 = arith.constant 15 : i32
    %3 = tpu.dynamic_rotate %1 by %c15_i32 dim 0 : vector<16x32xf32>, i32 -> vector<16x32xf32>
    %4 = arith.truncf %2 : vector<16x32xf32> to vector<16x32xbf16>
    %c0_2 = arith.constant 0 : index
    %c0_3 = arith.constant 0 : index
    %5 = vector.load %arg2[%c0_2, %c0_3] : memref<32x32xbf16, #tpu.memory_space<vmem>>, vector<32x32xbf16>
    %cst = arith.constant dense<0.000000e+00> : vector<16x32xf32>
    %6 = tpu.matmul %4, %5, %cst {dimension_numbers = #tpu.dot_dimension_numbers<[1], [0], [0], [1], [0, 0, 1, 1], [], []>} : vector<16x32xbf16>, vector<32x32xbf16>, vector<16x32xf32> -> vector<16x32xf32>
    %7 = arith.truncf %1 : vector<16x32xf32> to vector<16x32xbf16>
    %c0_4 = arith.constant 0 : index
    %c0_5 = arith.constant 0 : index
    %8 = vector.load %arg3[%c0_4, %c0_5] : memref<32x32xbf16, #tpu.memory_space<vmem>>, vector<32x32xbf16>
    %cst_6 = arith.constant dense<0.000000e+00> : vector<16x32xf32>
    %9 = tpu.matmul %7, %8, %cst_6 {dimension_numbers = #tpu.dot_dimension_numbers<[1], [0], [0], [1], [0, 0, 1, 1], [], []>} : vector<16x32xbf16>, vector<32x32xbf16>, vector<16x32xf32> -> vector<16x32xf32>
    %10 = arith.addf %6, %9 : vector<16x32xf32>
    %11 = arith.truncf %3 : vector<16x32xf32> to vector<16x32xbf16>
    %c0_7 = arith.constant 0 : index
    %c0_8 = arith.constant 0 : index
    %12 = vector.load %arg4[%c0_7, %c0_8] : memref<32x32xbf16, #tpu.memory_space<vmem>>, vector<32x32xbf16>
    %cst_9 = arith.constant dense<0.000000e+00> : vector<16x32xf32>
    %13 = tpu.matmul %11, %12, %cst_9 {dimension_numbers = #tpu.dot_dimension_numbers<[1], [0], [0], [1], [0, 0, 1, 1], [], []>} : vector<16x32xbf16>, vector<32x32xbf16>, vector<16x32xf32> -> vector<16x32xf32>
    %14 = arith.addf %10, %13 : vector<16x32xf32>
    %c0_10 = arith.constant 0 : index
    %c0_11 = arith.constant 0 : index
    %15 = vector.load %arg5[%c0_10, %c0_11] : memref<1x32xf32, #tpu.memory_space<vmem>>, vector<1x32xf32>
    %16 = vector.broadcast %15 : vector<1x32xf32> to vector<16x32xf32>
    %17 = arith.addf %14, %16 : vector<16x32xf32>
    %c0_12 = arith.constant 0 : index
    %c0_13 = arith.constant 0 : index
    %18 = vector.load %arg8[%c0_12, %c0_13] : memref<1x32xf32, #tpu.memory_space<vmem>>, vector<1x32xf32>
    %19 = vector.broadcast %18 : vector<1x32xf32> to vector<16x32xf32>
    %20 = arith.subf %17, %19 : vector<16x32xf32>
    %c0_14 = arith.constant 0 : index
    %c0_15 = arith.constant 0 : index
    %21 = vector.load %arg9[%c0_14, %c0_15] : memref<1x32xf32, #tpu.memory_space<vmem>>, vector<1x32xf32>
    %cst_16 = arith.constant 9.99999974E-6 : f32
    %22 = vector.broadcast %cst_16 : f32 to vector<1x32xf32>
    %23 = arith.addf %21, %22 : vector<1x32xf32>
    %24 = math.rsqrt %23 : vector<1x32xf32>
    %25 = vector.broadcast %24 : vector<1x32xf32> to vector<16x32xf32>
    %26 = arith.mulf %20, %25 : vector<16x32xf32>
    %c0_17 = arith.constant 0 : index
    %c0_18 = arith.constant 0 : index
    %27 = vector.load %arg6[%c0_17, %c0_18] : memref<1x32xf32, #tpu.memory_space<vmem>>, vector<1x32xf32>
    %28 = vector.broadcast %27 : vector<1x32xf32> to vector<16x32xf32>
    %29 = arith.mulf %26, %28 : vector<16x32xf32>
    %c0_19 = arith.constant 0 : index
    %c0_20 = arith.constant 0 : index
    %30 = vector.load %arg7[%c0_19, %c0_20] : memref<1x32xf32, #tpu.memory_space<vmem>>, vector<1x32xf32>
    %31 = vector.broadcast %30 : vector<1x32xf32> to vector<16x32xf32>
    %32 = arith.addf %29, %31 : vector<16x32xf32>
    %cst_21 = arith.constant 0.000000e+00 : f32
    %33 = vector.broadcast %cst_21 : f32 to vector<16x32xf32>
    %34 = arith.cmpf ogt, %32, %33 : vector<16x32xf32>
    %35 = math.exp %32 : vector<16x32xf32>
    %cst_22 = arith.constant 1.000000e+00 : f32
    %36 = vector.broadcast %cst_22 : f32 to vector<16x32xf32>
    %37 = arith.subf %35, %36 : vector<16x32xf32>
    %38 = arith.select %34, %32, %37 : vector<16x32xi1>, vector<16x32xf32>
    %39 = tpu.iota {dimensions = array<i32: 0>} : vector<16x1xi32>
    %c0_i32 = arith.constant 0 : i32
    %40 = vector.broadcast %c0_i32 : i32 to vector<16x1xi32>
    %41 = arith.cmpi eq, %39, %40 : vector<16x1xi32>
    %c1_i32_23 = arith.constant 1 : i32
    %42 = tpu.dynamic_rotate %38 by %c1_i32_23 dim 0 : vector<16x32xf32>, i32 -> vector<16x32xf32>
    %cst_24 = arith.constant -1.000000e+30 : f32
    %43 = vector.shape_cast %41 : vector<16x1xi1> to vector<16x1xi1>
    %44 = vector.broadcast %43 : vector<16x1xi1> to vector<16x32xi1>
    %45 = vector.broadcast %cst_24 : f32 to vector<16x32xf32>
    %46 = arith.select %44, %45, %42 : vector<16x32xi1>, vector<16x32xf32>
    %c15_i32_25 = arith.constant 15 : i32
    %47 = vector.broadcast %c15_i32_25 : i32 to vector<16x1xi32>
    %48 = arith.cmpi eq, %39, %47 : vector<16x1xi32>
    %c15_i32_26 = arith.constant 15 : i32
    %49 = tpu.dynamic_rotate %38 by %c15_i32_26 dim 0 : vector<16x32xf32>, i32 -> vector<16x32xf32>
    %cst_27 = arith.constant -1.000000e+30 : f32
    %50 = vector.shape_cast %48 : vector<16x1xi1> to vector<16x1xi1>
    %51 = vector.broadcast %50 : vector<16x1xi1> to vector<16x32xi1>
    %52 = vector.broadcast %cst_27 : f32 to vector<16x32xf32>
    %53 = arith.select %51, %52, %49 : vector<16x32xi1>, vector<16x32xf32>
    %54 = arith.maximumf %46, %38 : vector<16x32xf32>
    %55 = arith.maximumf %54, %53 : vector<16x32xf32>
    %c0_28 = arith.constant 0 : index
    %c0_29 = arith.constant 0 : index
    %56 = vector.load %arg11[%c0_28, %c0_29] : memref<16x32xf32, #tpu.memory_space<vmem>>, vector<16x32xf32>
    tpu.vector_store %arg11[%c0_28, %c0_29], %55 {strides = array<i32>} : memref<16x32xf32, #tpu.memory_space<vmem>>, vector<16x32xf32>,
    %c0_30 = arith.constant 0 : index
    %c0_31 = arith.constant 0 : index
    %57 = tpu.strided_load %arg11[%c0_30, %c0_31] {strides = array<i32: 2, 1>} : memref<16x32xf32, #tpu.memory_space<vmem>>, vector<8x32xf32>
    %c0_32 = arith.constant 0 : index
    %c0_33 = arith.constant 0 : index
    %c0_34 = arith.constant 0 : index
    %58 = vector.load %arg10[%c0_32, %c0_33, %c0_34] : memref<1x8x32xf32, #tpu.memory_space<vmem>>, vector<1x8x32xf32>
    %59 = vector.shape_cast %58 : vector<1x8x32xf32> to vector<8x32xf32>
    %60 = vector.shape_cast %57 : vector<8x32xf32> to vector<1x8x32xf32>
    tpu.vector_store %arg10[%c0_32, %c0_33, %c0_34], %60 {strides = array<i32>} : memref<1x8x32xf32, #tpu.memory_space<vmem>>, vector<1x8x32xf32>,
    return
  }
  func.func @transform_0(%arg0: i32) -> (i32, i32, i32) {
    %c0_i32 = arith.constant 0 : i32
    %c0_i32_0 = arith.constant 0 : i32
    %c0_i32_1 = arith.constant 0 : i32
    return %arg0, %c0_i32, %c0_i32_0 : i32, i32, i32
  }
  func.func @transform_1(%arg0: i32) -> (i32, i32) {
    %c0_i32 = arith.constant 0 : i32
    %c0_i32_0 = arith.constant 0 : i32
    %c0_i32_1 = arith.constant 0 : i32
    return %c0_i32, %c0_i32_0 : i32, i32
  }
  func.func @transform_2(%arg0: i32) -> (i32, i32) {
    %c0_i32 = arith.constant 0 : i32
    %c0_i32_0 = arith.constant 0 : i32
    %c0_i32_1 = arith.constant 0 : i32
    return %c0_i32, %c0_i32_0 : i32, i32
  }
  func.func @transform_3(%arg0: i32) -> (i32, i32) {
    %c0_i32 = arith.constant 0 : i32
    %c0_i32_0 = arith.constant 0 : i32
    %c0_i32_1 = arith.constant 0 : i32
    return %c0_i32, %c0_i32_0 : i32, i32
  }
  func.func @transform_4(%arg0: i32) -> (i32, i32) {
    %c0_i32 = arith.constant 0 : i32
    %c0_i32_0 = arith.constant 0 : i32
    %c0_i32_1 = arith.constant 0 : i32
    return %c0_i32, %c0_i32_0 : i32, i32
  }
  func.func @transform_5(%arg0: i32) -> (i32, i32) {
    %c0_i32 = arith.constant 0 : i32
    %c0_i32_0 = arith.constant 0 : i32
    %c0_i32_1 = arith.constant 0 : i32
    return %c0_i32, %c0_i32_0 : i32, i32
  }
  func.func @transform_6(%arg0: i32) -> (i32, i32) {
    %c0_i32 = arith.constant 0 : i32
    %c0_i32_0 = arith.constant 0 : i32
    %c0_i32_1 = arith.constant 0 : i32
    return %c0_i32, %c0_i32_0 : i32, i32
  }
  func.func @transform_7(%arg0: i32) -> (i32, i32) {
    %c0_i32 = arith.constant 0 : i32
    %c0_i32_0 = arith.constant 0 : i32
    %c0_i32_1 = arith.constant 0 : i32
    return %c0_i32, %c0_i32_0 : i32, i32
  }
  func.func @transform_8(%arg0: i32) -> (i32, i32) {
    %c0_i32 = arith.constant 0 : i32
    %c0_i32_0 = arith.constant 0 : i32
    %c0_i32_1 = arith.constant 0 : i32
    return %c0_i32, %c0_i32_0 : i32, i32
  }
  func.func @transform_9(%arg0: i32) -> (i32, i32, i32) {
    %c0_i32 = arith.constant 0 : i32
    %c0_i32_0 = arith.constant 0 : i32
    %c0_i32_1 = arith.constant 0 : i32
    return %arg0, %c0_i32, %c0_i32_0 : i32, i32, i32
  }
}

module attributes {stable_mosaic.version = 11 : i64} {
  func.func @_qkv_kernel(%arg0: i32, %arg1: memref<16x32xf32, #tpu.memory_space<vmem>>, %arg2: memref<32x96xbf16, #tpu.memory_space<vmem>>, %arg3: memref<1x96xf32, #tpu.memory_space<vmem>>, %arg4: memref<16x96xf32, #tpu.memory_space<vmem>>) attributes {dimension_semantics = [#tpu.dimension_semantics<parallel>], iteration_bounds = array<i64: 1>, scalar_prefetch = 0 : i64, scratch_operands = 0 : i64, tpu.core_type = #tpu.core_type<tc>, window_params = [{transform_indices = @transform_0, window_bounds = array<i64: 16, 32>}, {pipeline_mode = #tpu.pipeline_mode<synchronous>, transform_indices = @transform_1, window_bounds = array<i64: 32, 96>}, {pipeline_mode = #tpu.pipeline_mode<synchronous>, transform_indices = @transform_2, window_bounds = array<i64: 1, 96>}, {transform_indices = @transform_3, window_bounds = array<i64: 16, 96>}]} {
    %c0 = arith.constant 0 : index
    %c0_0 = arith.constant 0 : index
    %0 = vector.load %arg1[%c0, %c0_0] : memref<16x32xf32, #tpu.memory_space<vmem>>, vector<16x32xf32>
    %1 = arith.truncf %0 : vector<16x32xf32> to vector<16x32xbf16>
    %c0_1 = arith.constant 0 : index
    %c0_2 = arith.constant 0 : index
    %2 = vector.load %arg2[%c0_1, %c0_2] : memref<32x96xbf16, #tpu.memory_space<vmem>>, vector<32x96xbf16>
    %cst = arith.constant dense<0.000000e+00> : vector<16x96xf32>
    %3 = tpu.matmul %1, %2, %cst {dimension_numbers = #tpu.dot_dimension_numbers<[1], [0], [0], [1], [0, 0, 1, 1], [], []>} : vector<16x32xbf16>, vector<32x96xbf16>, vector<16x96xf32> -> vector<16x96xf32>
    %c0_3 = arith.constant 0 : index
    %c0_4 = arith.constant 0 : index
    %4 = vector.load %arg3[%c0_3, %c0_4] : memref<1x96xf32, #tpu.memory_space<vmem>>, vector<1x96xf32>
    %5 = vector.broadcast %4 : vector<1x96xf32> to vector<16x96xf32>
    %6 = arith.addf %3, %5 : vector<16x96xf32>
    %c0_5 = arith.constant 0 : index
    %c0_6 = arith.constant 0 : index
    %7 = vector.load %arg4[%c0_5, %c0_6] : memref<16x96xf32, #tpu.memory_space<vmem>>, vector<16x96xf32>
    tpu.vector_store %arg4[%c0_5, %c0_6], %6 {strides = array<i32>} : memref<16x96xf32, #tpu.memory_space<vmem>>, vector<16x96xf32>,
    return
  }
  func.func @transform_0(%arg0: i32) -> (i32, i32) {
    %c0_i32 = arith.constant 0 : i32
    %c0_i32_0 = arith.constant 0 : i32
    return %arg0, %c0_i32 : i32, i32
  }
  func.func @transform_1(%arg0: i32) -> (i32, i32) {
    %c0_i32 = arith.constant 0 : i32
    %c0_i32_0 = arith.constant 0 : i32
    %c0_i32_1 = arith.constant 0 : i32
    return %c0_i32, %c0_i32_0 : i32, i32
  }
  func.func @transform_2(%arg0: i32) -> (i32, i32) {
    %c0_i32 = arith.constant 0 : i32
    %c0_i32_0 = arith.constant 0 : i32
    %c0_i32_1 = arith.constant 0 : i32
    return %c0_i32, %c0_i32_0 : i32, i32
  }
  func.func @transform_3(%arg0: i32) -> (i32, i32) {
    %c0_i32 = arith.constant 0 : i32
    %c0_i32_0 = arith.constant 0 : i32
    return %arg0, %c0_i32 : i32, i32
  }
}

module attributes {stable_mosaic.version = 11 : i64} {
  func.func @_attn_core_kernel(%arg0: memref<8x8x8xf32, #tpu.memory_space<vmem>>, %arg1: memref<8x8x8xf32, #tpu.memory_space<vmem>>, %arg2: memref<8x8x8xf32, #tpu.memory_space<vmem>>, %arg3: memref<8x8x8xf32, #tpu.memory_space<vmem>>) attributes {dimension_semantics = [], scalar_prefetch = 0 : i64, scratch_operands = 0 : i64, tpu.core_type = #tpu.core_type<tc>} {
    %c0 = arith.constant 0 : index
    %c0_0 = arith.constant 0 : index
    %c0_1 = arith.constant 0 : index
    %0 = vector.load %arg0[%c0, %c0_0, %c0_1] : memref<8x8x8xf32, #tpu.memory_space<vmem>>, vector<8x8x8xf32>
    %1 = arith.truncf %0 : vector<8x8x8xf32> to vector<8x8x8xbf16>
    %c0_2 = arith.constant 0 : index
    %c0_3 = arith.constant 0 : index
    %c0_4 = arith.constant 0 : index
    %2 = vector.load %arg1[%c0_2, %c0_3, %c0_4] : memref<8x8x8xf32, #tpu.memory_space<vmem>>, vector<8x8x8xf32>
    %3 = arith.truncf %2 : vector<8x8x8xf32> to vector<8x8x8xbf16>
    %c0_5 = arith.constant 0 : index
    %c0_6 = arith.constant 0 : index
    %c0_7 = arith.constant 0 : index
    %4 = vector.load %arg2[%c0_5, %c0_6, %c0_7] : memref<8x8x8xf32, #tpu.memory_space<vmem>>, vector<8x8x8xf32>
    %5 = arith.truncf %4 : vector<8x8x8xf32> to vector<8x8x8xbf16>
    "tpu.trace_start"() <{level = 10 : i32, message = "bud,bld->bul"}> : () -> ()
    %cst = arith.constant dense<0.000000e+00> : vector<8x8x8xf32>
    %6 = tpu.matmul %1, %3, %cst {dimension_numbers = #tpu.dot_dimension_numbers<[2], [2], [1], [1], [0, 0, 0, 1, 1, 1], [0], [0]>} : vector<8x8x8xbf16>, vector<8x8x8xbf16>, vector<8x8x8xf32> -> vector<8x8x8xf32>
    "tpu.trace_stop"() : () -> ()
    %cst_8 = arith.constant 0.353553385 : f32
    %7 = vector.broadcast %cst_8 : f32 to vector<8x8x8xf32>
    %8 = arith.mulf %6, %7 : vector<8x8x8xf32>
    %cst_9 = arith.constant dense<0xFF800000> : vector<8x8xf32>
    %9 = vector.multi_reduction <maximumf>, %8, %cst_9 [2] : vector<8x8x8xf32> to vector<8x8xf32>
    %10 = vector.shape_cast %9 : vector<8x8xf32> to vector<8x8x1xf32>
    %11 = vector.broadcast %10 : vector<8x8x1xf32> to vector<8x8x8xf32>
    %12 = arith.subf %8, %11 : vector<8x8x8xf32>
    %13 = math.exp %12 : vector<8x8x8xf32>
    %cst_10 = arith.constant dense<0.000000e+00> : vector<8x8xf32>
    %14 = vector.multi_reduction <add>, %13, %cst_10 [2] : vector<8x8x8xf32> to vector<8x8xf32>
    %15 = vector.shape_cast %14 : vector<8x8xf32> to vector<8x8x1xf32>
    %16 = tpu.reciprocal %15 {approx = true} : vector<8x8x1xf32> -> vector<8x8x1xf32>
    %17 = vector.broadcast %16 : vector<8x8x1xf32> to vector<8x8x8xf32>
    %18 = arith.mulf %13, %17 : vector<8x8x8xf32>
    %19 = arith.truncf %18 : vector<8x8x8xf32> to vector<8x8x8xbf16>
    "tpu.trace_start"() <{level = 10 : i32, message = "bul,bld->bud"}> : () -> ()
    %cst_11 = arith.constant dense<0.000000e+00> : vector<8x8x8xf32>
    %20 = tpu.matmul %19, %5, %cst_11 {dimension_numbers = #tpu.dot_dimension_numbers<[2], [1], [1], [2], [0, 0, 0, 1, 1, 2], [0], [0]>} : vector<8x8x8xbf16>, vector<8x8x8xbf16>, vector<8x8x8xf32> -> vector<8x8x8xf32>
    "tpu.trace_stop"() : () -> ()
    %c0_12 = arith.constant 0 : index
    %c0_13 = arith.constant 0 : index
    %c0_14 = arith.constant 0 : index
    %21 = vector.load %arg3[%c0_12, %c0_13, %c0_14] : memref<8x8x8xf32, #tpu.memory_space<vmem>>, vector<8x8x8xf32>
    tpu.vector_store %arg3[%c0_12, %c0_13, %c0_14], %20 {strides = array<i32>} : memref<8x8x8xf32, #tpu.memory_space<vmem>>, vector<8x8x8xf32>,
    return
  }
}

module attributes {stable_mosaic.version = 11 : i64} {
  func.func @_conv_layer_kernel(%arg0: i32, %arg1: memref<1x8x32xf32, #tpu.memory_space<vmem>>, %arg2: memref<32x32xbf16, #tpu.memory_space<vmem>>, %arg3: memref<32x32xbf16, #tpu.memory_space<vmem>>, %arg4: memref<32x32xbf16, #tpu.memory_space<vmem>>, %arg5: memref<1x32xf32, #tpu.memory_space<vmem>>, %arg6: memref<1x32xf32, #tpu.memory_space<vmem>>, %arg7: memref<1x32xf32, #tpu.memory_space<vmem>>, %arg8: memref<1x32xf32, #tpu.memory_space<vmem>>, %arg9: memref<1x32xf32, #tpu.memory_space<vmem>>, %arg10: memref<1x4x32xf32, #tpu.memory_space<vmem>>, %arg11: memref<8x32xf32, #tpu.memory_space<vmem>>) attributes {dimension_semantics = [#tpu.dimension_semantics<parallel>], iteration_bounds = array<i64: 2>, scalar_prefetch = 0 : i64, scratch_operands = 1 : i64, tpu.core_type = #tpu.core_type<tc>, window_params = [{transform_indices = @transform_0, window_bounds = array<i64: 1, 8, 32>}, {pipeline_mode = #tpu.pipeline_mode<synchronous>, transform_indices = @transform_1, window_bounds = array<i64: 32, 32>}, {pipeline_mode = #tpu.pipeline_mode<synchronous>, transform_indices = @transform_2, window_bounds = array<i64: 32, 32>}, {pipeline_mode = #tpu.pipeline_mode<synchronous>, transform_indices = @transform_3, window_bounds = array<i64: 32, 32>}, {pipeline_mode = #tpu.pipeline_mode<synchronous>, transform_indices = @transform_4, window_bounds = array<i64: 1, 32>}, {pipeline_mode = #tpu.pipeline_mode<synchronous>, transform_indices = @transform_5, window_bounds = array<i64: 1, 32>}, {pipeline_mode = #tpu.pipeline_mode<synchronous>, transform_indices = @transform_6, window_bounds = array<i64: 1, 32>}, {pipeline_mode = #tpu.pipeline_mode<synchronous>, transform_indices = @transform_7, window_bounds = array<i64: 1, 32>}, {pipeline_mode = #tpu.pipeline_mode<synchronous>, transform_indices = @transform_8, window_bounds = array<i64: 1, 32>}, {transform_indices = @transform_9, window_bounds = array<i64: 1, 4, 32>}]} {
    %c0 = arith.constant 0 : index
    %c0_0 = arith.constant 0 : index
    %c0_1 = arith.constant 0 : index
    %0 = vector.load %arg1[%c0, %c0_0, %c0_1] : memref<1x8x32xf32, #tpu.memory_space<vmem>>, vector<1x8x32xf32>
    %1 = vector.shape_cast %0 : vector<1x8x32xf32> to vector<8x32xf32>
    %c1_i32 = arith.constant 1 : i32
    %2 = tpu.dynamic_rotate %1 by %c1_i32 dim 0 : vector<8x32xf32>, i32 -> vector<8x32xf32>
    %c7_i32 = arith.constant 7 : i32
    %3 = tpu.dynamic_rotate %1 by %c7_i32 dim 0 : vector<8x32xf32>, i32 -> vector<8x32xf32>
    %4 = arith.truncf %2 : vector<8x32xf32> to vector<8x32xbf16>
    %c0_2 = arith.constant 0 : index
    %c0_3 = arith.constant 0 : index
    %5 = vector.load %arg2[%c0_2, %c0_3] : memref<32x32xbf16, #tpu.memory_space<vmem>>, vector<32x32xbf16>
    %cst = arith.constant dense<0.000000e+00> : vector<8x32xf32>
    %6 = tpu.matmul %4, %5, %cst {dimension_numbers = #tpu.dot_dimension_numbers<[1], [0], [0], [1], [0, 0, 1, 1], [], []>} : vector<8x32xbf16>, vector<32x32xbf16>, vector<8x32xf32> -> vector<8x32xf32>
    %7 = arith.truncf %1 : vector<8x32xf32> to vector<8x32xbf16>
    %c0_4 = arith.constant 0 : index
    %c0_5 = arith.constant 0 : index
    %8 = vector.load %arg3[%c0_4, %c0_5] : memref<32x32xbf16, #tpu.memory_space<vmem>>, vector<32x32xbf16>
    %cst_6 = arith.constant dense<0.000000e+00> : vector<8x32xf32>
    %9 = tpu.matmul %7, %8, %cst_6 {dimension_numbers = #tpu.dot_dimension_numbers<[1], [0], [0], [1], [0, 0, 1, 1], [], []>} : vector<8x32xbf16>, vector<32x32xbf16>, vector<8x32xf32> -> vector<8x32xf32>
    %10 = arith.addf %6, %9 : vector<8x32xf32>
    %11 = arith.truncf %3 : vector<8x32xf32> to vector<8x32xbf16>
    %c0_7 = arith.constant 0 : index
    %c0_8 = arith.constant 0 : index
    %12 = vector.load %arg4[%c0_7, %c0_8] : memref<32x32xbf16, #tpu.memory_space<vmem>>, vector<32x32xbf16>
    %cst_9 = arith.constant dense<0.000000e+00> : vector<8x32xf32>
    %13 = tpu.matmul %11, %12, %cst_9 {dimension_numbers = #tpu.dot_dimension_numbers<[1], [0], [0], [1], [0, 0, 1, 1], [], []>} : vector<8x32xbf16>, vector<32x32xbf16>, vector<8x32xf32> -> vector<8x32xf32>
    %14 = arith.addf %10, %13 : vector<8x32xf32>
    %c0_10 = arith.constant 0 : index
    %c0_11 = arith.constant 0 : index
    %15 = vector.load %arg5[%c0_10, %c0_11] : memref<1x32xf32, #tpu.memory_space<vmem>>, vector<1x32xf32>
    %16 = vector.broadcast %15 : vector<1x32xf32> to vector<8x32xf32>
    %17 = arith.addf %14, %16 : vector<8x32xf32>
    %c0_12 = arith.constant 0 : index
    %c0_13 = arith.constant 0 : index
    %18 = vector.load %arg8[%c0_12, %c0_13] : memref<1x32xf32, #tpu.memory_space<vmem>>, vector<1x32xf32>
    %19 = vector.broadcast %18 : vector<1x32xf32> to vector<8x32xf32>
    %20 = arith.subf %17, %19 : vector<8x32xf32>
    %c0_14 = arith.constant 0 : index
    %c0_15 = arith.constant 0 : index
    %21 = vector.load %arg9[%c0_14, %c0_15] : memref<1x32xf32, #tpu.memory_space<vmem>>, vector<1x32xf32>
    %cst_16 = arith.constant 9.99999974E-6 : f32
    %22 = vector.broadcast %cst_16 : f32 to vector<1x32xf32>
    %23 = arith.addf %21, %22 : vector<1x32xf32>
    %24 = math.rsqrt %23 : vector<1x32xf32>
    %25 = vector.broadcast %24 : vector<1x32xf32> to vector<8x32xf32>
    %26 = arith.mulf %20, %25 : vector<8x32xf32>
    %c0_17 = arith.constant 0 : index
    %c0_18 = arith.constant 0 : index
    %27 = vector.load %arg6[%c0_17, %c0_18] : memref<1x32xf32, #tpu.memory_space<vmem>>, vector<1x32xf32>
    %28 = vector.broadcast %27 : vector<1x32xf32> to vector<8x32xf32>
    %29 = arith.mulf %26, %28 : vector<8x32xf32>
    %c0_19 = arith.constant 0 : index
    %c0_20 = arith.constant 0 : index
    %30 = vector.load %arg7[%c0_19, %c0_20] : memref<1x32xf32, #tpu.memory_space<vmem>>, vector<1x32xf32>
    %31 = vector.broadcast %30 : vector<1x32xf32> to vector<8x32xf32>
    %32 = arith.addf %29, %31 : vector<8x32xf32>
    %cst_21 = arith.constant 0.000000e+00 : f32
    %33 = vector.broadcast %cst_21 : f32 to vector<8x32xf32>
    %34 = arith.cmpf ogt, %32, %33 : vector<8x32xf32>
    %35 = math.exp %32 : vector<8x32xf32>
    %cst_22 = arith.constant 1.000000e+00 : f32
    %36 = vector.broadcast %cst_22 : f32 to vector<8x32xf32>
    %37 = arith.subf %35, %36 : vector<8x32xf32>
    %38 = arith.select %34, %32, %37 : vector<8x32xi1>, vector<8x32xf32>
    %39 = tpu.iota {dimensions = array<i32: 0>} : vector<8x1xi32>
    %c0_i32 = arith.constant 0 : i32
    %40 = vector.broadcast %c0_i32 : i32 to vector<8x1xi32>
    %41 = arith.cmpi eq, %39, %40 : vector<8x1xi32>
    %c1_i32_23 = arith.constant 1 : i32
    %42 = tpu.dynamic_rotate %38 by %c1_i32_23 dim 0 : vector<8x32xf32>, i32 -> vector<8x32xf32>
    %cst_24 = arith.constant -1.000000e+30 : f32
    %43 = vector.shape_cast %41 : vector<8x1xi1> to vector<8x1xi1>
    %44 = vector.broadcast %43 : vector<8x1xi1> to vector<8x32xi1>
    %45 = vector.broadcast %cst_24 : f32 to vector<8x32xf32>
    %46 = arith.select %44, %45, %42 : vector<8x32xi1>, vector<8x32xf32>
    %c7_i32_25 = arith.constant 7 : i32
    %47 = vector.broadcast %c7_i32_25 : i32 to vector<8x1xi32>
    %48 = arith.cmpi eq, %39, %47 : vector<8x1xi32>
    %c7_i32_26 = arith.constant 7 : i32
    %49 = tpu.dynamic_rotate %38 by %c7_i32_26 dim 0 : vector<8x32xf32>, i32 -> vector<8x32xf32>
    %cst_27 = arith.constant -1.000000e+30 : f32
    %50 = vector.shape_cast %48 : vector<8x1xi1> to vector<8x1xi1>
    %51 = vector.broadcast %50 : vector<8x1xi1> to vector<8x32xi1>
    %52 = vector.broadcast %cst_27 : f32 to vector<8x32xf32>
    %53 = arith.select %51, %52, %49 : vector<8x32xi1>, vector<8x32xf32>
    %54 = arith.maximumf %46, %38 : vector<8x32xf32>
    %55 = arith.maximumf %54, %53 : vector<8x32xf32>
    %c0_28 = arith.constant 0 : index
    %c0_29 = arith.constant 0 : index
    %56 = vector.load %arg11[%c0_28, %c0_29] : memref<8x32xf32, #tpu.memory_space<vmem>>, vector<8x32xf32>
    tpu.vector_store %arg11[%c0_28, %c0_29], %55 {strides = array<i32>} : memref<8x32xf32, #tpu.memory_space<vmem>>, vector<8x32xf32>,
    %c0_30 = arith.constant 0 : index
    %c0_31 = arith.constant 0 : index
    %57 = tpu.strided_load %arg11[%c0_30, %c0_31] {strides = array<i32: 2, 1>} : memref<8x32xf32, #tpu.memory_space<vmem>>, vector<4x32xf32>
    %c0_32 = arith.constant 0 : index
    %c0_33 = arith.constant 0 : index
    %c0_34 = arith.constant 0 : index
    %58 = vector.load %arg10[%c0_32, %c0_33, %c0_34] : memref<1x4x32xf32, #tpu.memory_space<vmem>>, vector<1x4x32xf32>
    %59 = vector.shape_cast %58 : vector<1x4x32xf32> to vector<4x32xf32>
    %60 = vector.shape_cast %57 : vector<4x32xf32> to vector<1x4x32xf32>
    tpu.vector_store %arg10[%c0_32, %c0_33, %c0_34], %60 {strides = array<i32>} : memref<1x4x32xf32, #tpu.memory_space<vmem>>, vector<1x4x32xf32>,
    return
  }
  func.func @transform_0(%arg0: i32) -> (i32, i32, i32) {
    %c0_i32 = arith.constant 0 : i32
    %c0_i32_0 = arith.constant 0 : i32
    %c0_i32_1 = arith.constant 0 : i32
    return %arg0, %c0_i32, %c0_i32_0 : i32, i32, i32
  }
  func.func @transform_1(%arg0: i32) -> (i32, i32) {
    %c0_i32 = arith.constant 0 : i32
    %c0_i32_0 = arith.constant 0 : i32
    %c0_i32_1 = arith.constant 0 : i32
    return %c0_i32, %c0_i32_0 : i32, i32
  }
  func.func @transform_2(%arg0: i32) -> (i32, i32) {
    %c0_i32 = arith.constant 0 : i32
    %c0_i32_0 = arith.constant 0 : i32
    %c0_i32_1 = arith.constant 0 : i32
    return %c0_i32, %c0_i32_0 : i32, i32
  }
  func.func @transform_3(%arg0: i32) -> (i32, i32) {
    %c0_i32 = arith.constant 0 : i32
    %c0_i32_0 = arith.constant 0 : i32
    %c0_i32_1 = arith.constant 0 : i32
    return %c0_i32, %c0_i32_0 : i32, i32
  }
  func.func @transform_4(%arg0: i32) -> (i32, i32) {
    %c0_i32 = arith.constant 0 : i32
    %c0_i32_0 = arith.constant 0 : i32
    %c0_i32_1 = arith.constant 0 : i32
    return %c0_i32, %c0_i32_0 : i32, i32
  }
  func.func @transform_5(%arg0: i32) -> (i32, i32) {
    %c0_i32 = arith.constant 0 : i32
    %c0_i32_0 = arith.constant 0 : i32
    %c0_i32_1 = arith.constant 0 : i32
    return %c0_i32, %c0_i32_0 : i32, i32
  }
  func.func @transform_6(%arg0: i32) -> (i32, i32) {
    %c0_i32 = arith.constant 0 : i32
    %c0_i32_0 = arith.constant 0 : i32
    %c0_i32_1 = arith.constant 0 : i32
    return %c0_i32, %c0_i32_0 : i32, i32
  }
  func.func @transform_7(%arg0: i32) -> (i32, i32) {
    %c0_i32 = arith.constant 0 : i32
    %c0_i32_0 = arith.constant 0 : i32
    %c0_i32_1 = arith.constant 0 : i32
    return %c0_i32, %c0_i32_0 : i32, i32
  }
  func.func @transform_8(%arg0: i32) -> (i32, i32) {
    %c0_i32 = arith.constant 0 : i32
    %c0_i32_0 = arith.constant 0 : i32
    %c0_i32_1 = arith.constant 0 : i32
    return %c0_i32, %c0_i32_0 : i32, i32
  }
  func.func @transform_9(%arg0: i32) -> (i32, i32, i32) {
    %c0_i32 = arith.constant 0 : i32
    %c0_i32_0 = arith.constant 0 : i32
    %c0_i32_1 = arith.constant 0 : i32
    return %arg0, %c0_i32, %c0_i32_0 : i32, i32, i32
  }
}

module attributes {stable_mosaic.version = 11 : i64} {
  func.func @_post_kernel(%arg0: i32, %arg1: memref<16x32xf32, #tpu.memory_space<vmem>>, %arg2: memref<16x32xf32, #tpu.memory_space<vmem>>, %arg3: memref<32x32xbf16, #tpu.memory_space<vmem>>, %arg4: memref<1x32xf32, #tpu.memory_space<vmem>>, %arg5: memref<32x64xbf16, #tpu.memory_space<vmem>>, %arg6: memref<1x64xf32, #tpu.memory_space<vmem>>, %arg7: memref<64x32xbf16, #tpu.memory_space<vmem>>, %arg8: memref<1x32xf32, #tpu.memory_space<vmem>>, %arg9: memref<1x32xf32, #tpu.memory_space<vmem>>, %arg10: memref<1x32xf32, #tpu.memory_space<vmem>>, %arg11: memref<1x32xf32, #tpu.memory_space<vmem>>, %arg12: memref<1x32xf32, #tpu.memory_space<vmem>>, %arg13: memref<1x32xf32, #tpu.memory_space<vmem>>, %arg14: memref<1x32xf32, #tpu.memory_space<vmem>>, %arg15: memref<16x32xf32, #tpu.memory_space<vmem>>) attributes {dimension_semantics = [#tpu.dimension_semantics<parallel>], iteration_bounds = array<i64: 1>, scalar_prefetch = 0 : i64, scratch_operands = 0 : i64, tpu.core_type = #tpu.core_type<tc>, window_params = [{transform_indices = @transform_0, window_bounds = array<i64: 16, 32>}, {transform_indices = @transform_1, window_bounds = array<i64: 16, 32>}, {pipeline_mode = #tpu.pipeline_mode<synchronous>, transform_indices = @transform_2, window_bounds = array<i64: 32, 32>}, {pipeline_mode = #tpu.pipeline_mode<synchronous>, transform_indices = @transform_3, window_bounds = array<i64: 1, 32>}, {pipeline_mode = #tpu.pipeline_mode<synchronous>, transform_indices = @transform_4, window_bounds = array<i64: 32, 64>}, {pipeline_mode = #tpu.pipeline_mode<synchronous>, transform_indices = @transform_5, window_bounds = array<i64: 1, 64>}, {pipeline_mode = #tpu.pipeline_mode<synchronous>, transform_indices = @transform_6, window_bounds = array<i64: 64, 32>}, {pipeline_mode = #tpu.pipeline_mode<synchronous>, transform_indices = @transform_7, window_bounds = array<i64: 1, 32>}, {pipeline_mode = #tpu.pipeline_mode<synchronous>, transform_indices = @transform_8, window_bounds = array<i64: 1, 32>}, {pipeline_mode = #tpu.pipeline_mode<synchronous>, transform_indices = @transform_9, window_bounds = array<i64: 1, 32>}, {pipeline_mode = #tpu.pipeline_mode<synchronous>, transform_indices = @transform_10, window_bounds = array<i64: 1, 32>}, {pipeline_mode = #tpu.pipeline_mode<synchronous>, transform_indices = @transform_11, window_bounds = array<i64: 1, 32>}, {pipeline_mode = #tpu.pipeline_mode<synchronous>, transform_indices = @transform_12, window_bounds = array<i64: 1, 32>}, {pipeline_mode = #tpu.pipeline_mode<synchronous>, transform_indices = @transform_13, window_bounds = array<i64: 1, 32>}, {transform_indices = @transform_14, window_bounds = array<i64: 16, 32>}]} {
    %c0 = arith.constant 0 : index
    %c0_0 = arith.constant 0 : index
    %0 = vector.load %arg1[%c0, %c0_0] : memref<16x32xf32, #tpu.memory_space<vmem>>, vector<16x32xf32>
    %c0_1 = arith.constant 0 : index
    %c0_2 = arith.constant 0 : index
    %1 = vector.load %arg2[%c0_1, %c0_2] : memref<16x32xf32, #tpu.memory_space<vmem>>, vector<16x32xf32>
    %2 = arith.truncf %1 : vector<16x32xf32> to vector<16x32xbf16>
    %c0_3 = arith.constant 0 : index
    %c0_4 = arith.constant 0 : index
    %3 = vector.load %arg3[%c0_3, %c0_4] : memref<32x32xbf16, #tpu.memory_space<vmem>>, vector<32x32xbf16>
    %cst = arith.constant dense<0.000000e+00> : vector<16x32xf32>
    %4 = tpu.matmul %2, %3, %cst {dimension_numbers = #tpu.dot_dimension_numbers<[1], [0], [0], [1], [0, 0, 1, 1], [], []>} : vector<16x32xbf16>, vector<32x32xbf16>, vector<16x32xf32> -> vector<16x32xf32>
    %c0_5 = arith.constant 0 : index
    %c0_6 = arith.constant 0 : index
    %5 = vector.load %arg4[%c0_5, %c0_6] : memref<1x32xf32, #tpu.memory_space<vmem>>, vector<1x32xf32>
    %6 = vector.broadcast %5 : vector<1x32xf32> to vector<16x32xf32>
    %7 = arith.addf %4, %6 : vector<16x32xf32>
    %8 = arith.addf %0, %7 : vector<16x32xf32>
    %c0_7 = arith.constant 0 : index
    %c0_8 = arith.constant 0 : index
    %9 = vector.load %arg9[%c0_7, %c0_8] : memref<1x32xf32, #tpu.memory_space<vmem>>, vector<1x32xf32>
    %c0_9 = arith.constant 0 : index
    %c0_10 = arith.constant 0 : index
    %10 = vector.load %arg10[%c0_9, %c0_10] : memref<1x32xf32, #tpu.memory_space<vmem>>, vector<1x32xf32>
    %cst_11 = arith.constant dense<0.000000e+00> : vector<16xf32>
    %11 = vector.multi_reduction <add>, %8, %cst_11 [1] : vector<16x32xf32> to vector<16xf32>
    %12 = vector.shape_cast %11 : vector<16xf32> to vector<16x1xf32>
    %cst_12 = arith.constant 3.200000e+01 : f32
    %13 = vector.broadcast %cst_12 : f32 to vector<16x1xf32>
    %14 = arith.divf %12, %13 : vector<16x1xf32>
    %15 = vector.broadcast %14 : vector<16x1xf32> to vector<16x32xf32>
    %16 = arith.subf %8, %15 : vector<16x32xf32>
    %17 = arith.mulf %16, %16 : vector<16x32xf32>
    %cst_13 = arith.constant dense<0.000000e+00> : vector<16xf32>
    %18 = vector.multi_reduction <add>, %17, %cst_13 [1] : vector<16x32xf32> to vector<16xf32>
    %19 = vector.shape_cast %18 : vector<16xf32> to vector<16x1xf32>
    %cst_14 = arith.constant 3.200000e+01 : f32
    %20 = vector.broadcast %cst_14 : f32 to vector<16x1xf32>
    %21 = arith.divf %19, %20 : vector<16x1xf32>
    %cst_15 = arith.constant 9.99999974E-6 : f32
    %22 = vector.broadcast %cst_15 : f32 to vector<16x1xf32>
    %23 = arith.addf %21, %22 : vector<16x1xf32>
    %24 = math.rsqrt %23 : vector<16x1xf32>
    %25 = vector.broadcast %24 : vector<16x1xf32> to vector<16x32xf32>
    %26 = arith.mulf %16, %25 : vector<16x32xf32>
    %27 = vector.broadcast %9 : vector<1x32xf32> to vector<16x32xf32>
    %28 = arith.mulf %26, %27 : vector<16x32xf32>
    %29 = vector.broadcast %10 : vector<1x32xf32> to vector<16x32xf32>
    %30 = arith.addf %28, %29 : vector<16x32xf32>
    %31 = arith.truncf %30 : vector<16x32xf32> to vector<16x32xbf16>
    %c0_16 = arith.constant 0 : index
    %c0_17 = arith.constant 0 : index
    %32 = vector.load %arg5[%c0_16, %c0_17] : memref<32x64xbf16, #tpu.memory_space<vmem>>, vector<32x64xbf16>
    %cst_18 = arith.constant dense<0.000000e+00> : vector<16x64xf32>
    %33 = tpu.matmul %31, %32, %cst_18 {dimension_numbers = #tpu.dot_dimension_numbers<[1], [0], [0], [1], [0, 0, 1, 1], [], []>} : vector<16x32xbf16>, vector<32x64xbf16>, vector<16x64xf32> -> vector<16x64xf32>
    %c0_19 = arith.constant 0 : index
    %c0_20 = arith.constant 0 : index
    %34 = vector.load %arg6[%c0_19, %c0_20] : memref<1x64xf32, #tpu.memory_space<vmem>>, vector<1x64xf32>
    %35 = vector.broadcast %34 : vector<1x64xf32> to vector<16x64xf32>
    %36 = arith.addf %33, %35 : vector<16x64xf32>
    %cst_21 = arith.constant 5.000000e-01 : f32
    %37 = vector.broadcast %cst_21 : f32 to vector<16x64xf32>
    %38 = arith.mulf %37, %36 : vector<16x64xf32>
    %cst_22 = arith.constant 4.471500e-02 : f32
    %39 = vector.broadcast %cst_22 : f32 to vector<16x64xf32>
    %40 = arith.mulf %39, %36 : vector<16x64xf32>
    %41 = arith.mulf %40, %36 : vector<16x64xf32>
    %42 = arith.mulf %41, %36 : vector<16x64xf32>
    %43 = arith.addf %36, %42 : vector<16x64xf32>
    %cst_23 = arith.constant 0.797884583 : f32
    %44 = vector.broadcast %cst_23 : f32 to vector<16x64xf32>
    %45 = arith.mulf %44, %43 : vector<16x64xf32>
    %46 = math.tanh %45 : vector<16x64xf32>
    %cst_24 = arith.constant 1.000000e+00 : f32
    %47 = vector.broadcast %cst_24 : f32 to vector<16x64xf32>
    %48 = arith.addf %47, %46 : vector<16x64xf32>
    %49 = arith.mulf %38, %48 : vector<16x64xf32>
    %50 = arith.truncf %49 : vector<16x64xf32> to vector<16x64xbf16>
    %c0_25 = arith.constant 0 : index
    %c0_26 = arith.constant 0 : index
    %51 = vector.load %arg7[%c0_25, %c0_26] : memref<64x32xbf16, #tpu.memory_space<vmem>>, vector<64x32xbf16>
    %cst_27 = arith.constant dense<0.000000e+00> : vector<16x32xf32>
    %52 = tpu.matmul %50, %51, %cst_27 {dimension_numbers = #tpu.dot_dimension_numbers<[1], [0], [0], [1], [0, 0, 1, 1], [], []>} : vector<16x64xbf16>, vector<64x32xbf16>, vector<16x32xf32> -> vector<16x32xf32>
    %c0_28 = arith.constant 0 : index
    %c0_29 = arith.constant 0 : index
    %53 = vector.load %arg8[%c0_28, %c0_29] : memref<1x32xf32, #tpu.memory_space<vmem>>, vector<1x32xf32>
    %54 = vector.broadcast %53 : vector<1x32xf32> to vector<16x32xf32>
    %55 = arith.addf %52, %54 : vector<16x32xf32>
    %56 = arith.addf %30, %55 : vector<16x32xf32>
    %c0_30 = arith.constant 0 : index
    %c0_31 = arith.constant 0 : index
    %57 = vector.load %arg11[%c0_30, %c0_31] : memref<1x32xf32, #tpu.memory_space<vmem>>, vector<1x32xf32>
    %c0_32 = arith.constant 0 : index
    %c0_33 = arith.constant 0 : index
    %58 = vector.load %arg12[%c0_32, %c0_33] : memref<1x32xf32, #tpu.memory_space<vmem>>, vector<1x32xf32>
    %cst_34 = arith.constant dense<0.000000e+00> : vector<16xf32>
    %59 = vector.multi_reduction <add>, %56, %cst_34 [1] : vector<16x32xf32> to vector<16xf32>
    %60 = vector.shape_cast %59 : vector<16xf32> to vector<16x1xf32>
    %cst_35 = arith.constant 3.200000e+01 : f32
    %61 = vector.broadcast %cst_35 : f32 to vector<16x1xf32>
    %62 = arith.divf %60, %61 : vector<16x1xf32>
    %63 = vector.broadcast %62 : vector<16x1xf32> to vector<16x32xf32>
    %64 = arith.subf %56, %63 : vector<16x32xf32>
    %65 = arith.mulf %64, %64 : vector<16x32xf32>
    %cst_36 = arith.constant dense<0.000000e+00> : vector<16xf32>
    %66 = vector.multi_reduction <add>, %65, %cst_36 [1] : vector<16x32xf32> to vector<16xf32>
    %67 = vector.shape_cast %66 : vector<16xf32> to vector<16x1xf32>
    %cst_37 = arith.constant 3.200000e+01 : f32
    %68 = vector.broadcast %cst_37 : f32 to vector<16x1xf32>
    %69 = arith.divf %67, %68 : vector<16x1xf32>
    %cst_38 = arith.constant 9.99999974E-6 : f32
    %70 = vector.broadcast %cst_38 : f32 to vector<16x1xf32>
    %71 = arith.addf %69, %70 : vector<16x1xf32>
    %72 = math.rsqrt %71 : vector<16x1xf32>
    %73 = vector.broadcast %72 : vector<16x1xf32> to vector<16x32xf32>
    %74 = arith.mulf %64, %73 : vector<16x32xf32>
    %75 = vector.broadcast %57 : vector<1x32xf32> to vector<16x32xf32>
    %76 = arith.mulf %74, %75 : vector<16x32xf32>
    %77 = vector.broadcast %58 : vector<1x32xf32> to vector<16x32xf32>
    %78 = arith.addf %76, %77 : vector<16x32xf32>
    %c0_39 = arith.constant 0 : index
    %c0_40 = arith.constant 0 : index
    %79 = vector.load %arg15[%c0_39, %c0_40] : memref<16x32xf32, #tpu.memory_space<vmem>>, vector<16x32xf32>
    tpu.vector_store %arg15[%c0_39, %c0_40], %78 {strides = array<i32>} : memref<16x32xf32, #tpu.memory_space<vmem>>, vector<16x32xf32>,
    return
  }
  func.func @transform_0(%arg0: i32) -> (i32, i32) {
    %c0_i32 = arith.constant 0 : i32
    %c0_i32_0 = arith.constant 0 : i32
    return %arg0, %c0_i32 : i32, i32
  }
  func.func @transform_1(%arg0: i32) -> (i32, i32) {
    %c0_i32 = arith.constant 0 : i32
    %c0_i32_0 = arith.constant 0 : i32
    return %arg0, %c0_i32 : i32, i32
  }
  func.func @transform_2(%arg0: i32) -> (i32, i32) {
    %c0_i32 = arith.constant 0 : i32
    %c0_i32_0 = arith.constant 0 : i32
    %c0_i32_1 = arith.constant 0 : i32
    return %c0_i32, %c0_i32_0 : i32, i32
  }
  func.func @transform_3(%arg0: i32) -> (i32, i32) {
    %c0_i32 = arith.constant 0 : i32
    %c0_i32_0 = arith.constant 0 : i32
    %c0_i32_1 = arith.constant 0 : i32
    return %c0_i32, %c0_i32_0 : i32, i32
  }
  func.func @transform_4(%arg0: i32) -> (i32, i32) {
    %c0_i32 = arith.constant 0 : i32
    %c0_i32_0 = arith.constant 0 : i32
    %c0_i32_1 = arith.constant 0 : i32
    return %c0_i32, %c0_i32_0 : i32, i32
  }
  func.func @transform_5(%arg0: i32) -> (i32, i32) {
    %c0_i32 = arith.constant 0 : i32
    %c0_i32_0 = arith.constant 0 : i32
    %c0_i32_1 = arith.constant 0 : i32
    return %c0_i32, %c0_i32_0 : i32, i32
  }
  func.func @transform_6(%arg0: i32) -> (i32, i32) {
    %c0_i32 = arith.constant 0 : i32
    %c0_i32_0 = arith.constant 0 : i32
    %c0_i32_1 = arith.constant 0 : i32
    return %c0_i32, %c0_i32_0 : i32, i32
  }
  func.func @transform_7(%arg0: i32) -> (i32, i32) {
    %c0_i32 = arith.constant 0 : i32
    %c0_i32_0 = arith.constant 0 : i32
    %c0_i32_1 = arith.constant 0 : i32
    return %c0_i32, %c0_i32_0 : i32, i32
  }
  func.func @transform_8(%arg0: i32) -> (i32, i32) {
    %c0_i32 = arith.constant 0 : i32
    %c0_i32_0 = arith.constant 0 : i32
    %c0_i32_1 = arith.constant 0 : i32
    return %c0_i32, %c0_i32_0 : i32, i32
  }
  func.func @transform_9(%arg0: i32) -> (i32, i32) {
    %c0_i32 = arith.constant 0 : i32
    %c0_i32_0 = arith.constant 0 : i32
    %c0_i32_1 = arith.constant 0 : i32
    return %c0_i32, %c0_i32_0 : i32, i32
  }
  func.func @transform_10(%arg0: i32) -> (i32, i32) {
    %c0_i32 = arith.constant 0 : i32
    %c0_i32_0 = arith.constant 0 : i32
    %c0_i32_1 = arith.constant 0 : i32
    return %c0_i32, %c0_i32_0 : i32, i32
  }
  func.func @transform_11(%arg0: i32) -> (i32, i32) {
    %c0_i32 = arith.constant 0 : i32
    %c0_i32_0 = arith.constant 0 : i32
    %c0_i32_1 = arith.constant 0 : i32
    return %c0_i32, %c0_i32_0 : i32, i32
  }
  func.func @transform_12(%arg0: i32) -> (i32, i32) {
    %c0_i32 = arith.constant 0 : i32
    %c0_i32_0 = arith.constant 0 : i32
    %c0_i32_1 = arith.constant 0 : i32
    return %c0_i32, %c0_i32_0 : i32, i32
  }
  func.func @transform_13(%arg0: i32) -> (i32, i32) {
    %c0_i32 = arith.constant 0 : i32
    %c0_i32_0 = arith.constant 0 : i32
    %c0_i32_1 = arith.constant 0 : i32
    return %c0_i32, %c0_i32_0 : i32, i32
  }
  func.func @transform_14(%arg0: i32) -> (i32, i32) {
    %c0_i32 = arith.constant 0 : i32
    %c0_i32_0 = arith.constant 0 : i32
    return %arg0, %c0_i32 : i32, i32
  }
}

module attributes {stable_mosaic.version = 11 : i64} {
  func.func @_qkv_kernel(%arg0: i32, %arg1: memref<8x32xf32, #tpu.memory_space<vmem>>, %arg2: memref<32x96xbf16, #tpu.memory_space<vmem>>, %arg3: memref<1x96xf32, #tpu.memory_space<vmem>>, %arg4: memref<8x96xf32, #tpu.memory_space<vmem>>) attributes {dimension_semantics = [#tpu.dimension_semantics<parallel>], iteration_bounds = array<i64: 1>, scalar_prefetch = 0 : i64, scratch_operands = 0 : i64, tpu.core_type = #tpu.core_type<tc>, window_params = [{transform_indices = @transform_0, window_bounds = array<i64: 8, 32>}, {pipeline_mode = #tpu.pipeline_mode<synchronous>, transform_indices = @transform_1, window_bounds = array<i64: 32, 96>}, {pipeline_mode = #tpu.pipeline_mode<synchronous>, transform_indices = @transform_2, window_bounds = array<i64: 1, 96>}, {transform_indices = @transform_3, window_bounds = array<i64: 8, 96>}]} {
    %c0 = arith.constant 0 : index
    %c0_0 = arith.constant 0 : index
    %0 = vector.load %arg1[%c0, %c0_0] : memref<8x32xf32, #tpu.memory_space<vmem>>, vector<8x32xf32>
    %1 = arith.truncf %0 : vector<8x32xf32> to vector<8x32xbf16>
    %c0_1 = arith.constant 0 : index
    %c0_2 = arith.constant 0 : index
    %2 = vector.load %arg2[%c0_1, %c0_2] : memref<32x96xbf16, #tpu.memory_space<vmem>>, vector<32x96xbf16>
    %cst = arith.constant dense<0.000000e+00> : vector<8x96xf32>
    %3 = tpu.matmul %1, %2, %cst {dimension_numbers = #tpu.dot_dimension_numbers<[1], [0], [0], [1], [0, 0, 1, 1], [], []>} : vector<8x32xbf16>, vector<32x96xbf16>, vector<8x96xf32> -> vector<8x96xf32>
    %c0_3 = arith.constant 0 : index
    %c0_4 = arith.constant 0 : index
    %4 = vector.load %arg3[%c0_3, %c0_4] : memref<1x96xf32, #tpu.memory_space<vmem>>, vector<1x96xf32>
    %5 = vector.broadcast %4 : vector<1x96xf32> to vector<8x96xf32>
    %6 = arith.addf %3, %5 : vector<8x96xf32>
    %c0_5 = arith.constant 0 : index
    %c0_6 = arith.constant 0 : index
    %7 = vector.load %arg4[%c0_5, %c0_6] : memref<8x96xf32, #tpu.memory_space<vmem>>, vector<8x96xf32>
    tpu.vector_store %arg4[%c0_5, %c0_6], %6 {strides = array<i32>} : memref<8x96xf32, #tpu.memory_space<vmem>>, vector<8x96xf32>,
    return
  }
  func.func @transform_0(%arg0: i32) -> (i32, i32) {
    %c0_i32 = arith.constant 0 : i32
    %c0_i32_0 = arith.constant 0 : i32
    return %arg0, %c0_i32 : i32, i32
  }
  func.func @transform_1(%arg0: i32) -> (i32, i32) {
    %c0_i32 = arith.constant 0 : i32
    %c0_i32_0 = arith.constant 0 : i32
    %c0_i32_1 = arith.constant 0 : i32
    return %c0_i32, %c0_i32_0 : i32, i32
  }
  func.func @transform_2(%arg0: i32) -> (i32, i32) {
    %c0_i32 = arith.constant 0 : i32
    %c0_i32_0 = arith.constant 0 : i32
    %c0_i32_1 = arith.constant 0 : i32
    return %c0_i32, %c0_i32_0 : i32, i32
  }
  func.func @transform_3(%arg0: i32) -> (i32, i32) {
    %c0_i32 = arith.constant 0 : i32
    %c0_i32_0 = arith.constant 0 : i32
    return %arg0, %c0_i32 : i32, i32
  }
}

module attributes {stable_mosaic.version = 11 : i64} {
  func.func @_attn_core_kernel(%arg0: memref<8x4x8xf32, #tpu.memory_space<vmem>>, %arg1: memref<8x4x8xf32, #tpu.memory_space<vmem>>, %arg2: memref<8x4x8xf32, #tpu.memory_space<vmem>>, %arg3: memref<8x4x8xf32, #tpu.memory_space<vmem>>) attributes {dimension_semantics = [], scalar_prefetch = 0 : i64, scratch_operands = 0 : i64, tpu.core_type = #tpu.core_type<tc>} {
    %c0 = arith.constant 0 : index
    %c0_0 = arith.constant 0 : index
    %c0_1 = arith.constant 0 : index
    %0 = vector.load %arg0[%c0, %c0_0, %c0_1] : memref<8x4x8xf32, #tpu.memory_space<vmem>>, vector<8x4x8xf32>
    %1 = arith.truncf %0 : vector<8x4x8xf32> to vector<8x4x8xbf16>
    %c0_2 = arith.constant 0 : index
    %c0_3 = arith.constant 0 : index
    %c0_4 = arith.constant 0 : index
    %2 = vector.load %arg1[%c0_2, %c0_3, %c0_4] : memref<8x4x8xf32, #tpu.memory_space<vmem>>, vector<8x4x8xf32>
    %3 = arith.truncf %2 : vector<8x4x8xf32> to vector<8x4x8xbf16>
    %c0_5 = arith.constant 0 : index
    %c0_6 = arith.constant 0 : index
    %c0_7 = arith.constant 0 : index
    %4 = vector.load %arg2[%c0_5, %c0_6, %c0_7] : memref<8x4x8xf32, #tpu.memory_space<vmem>>, vector<8x4x8xf32>
    %5 = arith.truncf %4 : vector<8x4x8xf32> to vector<8x4x8xbf16>
    "tpu.trace_start"() <{level = 10 : i32, message = "bud,bld->bul"}> : () -> ()
    %cst = arith.constant dense<0.000000e+00> : vector<8x4x4xf32>
    %6 = tpu.matmul %1, %3, %cst {dimension_numbers = #tpu.dot_dimension_numbers<[2], [2], [1], [1], [0, 0, 0, 1, 1, 1], [0], [0]>} : vector<8x4x8xbf16>, vector<8x4x8xbf16>, vector<8x4x4xf32> -> vector<8x4x4xf32>
    "tpu.trace_stop"() : () -> ()
    %cst_8 = arith.constant 0.353553385 : f32
    %7 = vector.broadcast %cst_8 : f32 to vector<8x4x4xf32>
    %8 = arith.mulf %6, %7 : vector<8x4x4xf32>
    %cst_9 = arith.constant dense<0xFF800000> : vector<8x4xf32>
    %9 = vector.multi_reduction <maximumf>, %8, %cst_9 [2] : vector<8x4x4xf32> to vector<8x4xf32>
    %10 = vector.shape_cast %9 : vector<8x4xf32> to vector<8x4x1xf32>
    %11 = vector.broadcast %10 : vector<8x4x1xf32> to vector<8x4x4xf32>
    %12 = arith.subf %8, %11 : vector<8x4x4xf32>
    %13 = math.exp %12 : vector<8x4x4xf32>
    %cst_10 = arith.constant dense<0.000000e+00> : vector<8x4xf32>
    %14 = vector.multi_reduction <add>, %13, %cst_10 [2] : vector<8x4x4xf32> to vector<8x4xf32>
    %15 = vector.shape_cast %14 : vector<8x4xf32> to vector<8x4x1xf32>
    %16 = tpu.reciprocal %15 {approx = true} : vector<8x4x1xf32> -> vector<8x4x1xf32>
    %17 = vector.broadcast %16 : vector<8x4x1xf32> to vector<8x4x4xf32>
    %18 = arith.mulf %13, %17 : vector<8x4x4xf32>
    %19 = arith.truncf %18 : vector<8x4x4xf32> to vector<8x4x4xbf16>
    "tpu.trace_start"() <{level = 10 : i32, message = "bul,bld->bud"}> : () -> ()
    %cst_11 = arith.constant dense<0.000000e+00> : vector<8x4x8xf32>
    %20 = tpu.matmul %19, %5, %cst_11 {dimension_numbers = #tpu.dot_dimension_numbers<[2], [1], [1], [2], [0, 0, 0, 1, 1, 2], [0], [0]>} : vector<8x4x4xbf16>, vector<8x4x8xbf16>, vector<8x4x8xf32> -> vector<8x4x8xf32>
    "tpu.trace_stop"() : () -> ()
    %c0_12 = arith.constant 0 : index
    %c0_13 = arith.constant 0 : index
    %c0_14 = arith.constant 0 : index
    %21 = vector.load %arg3[%c0_12, %c0_13, %c0_14] : memref<8x4x8xf32, #tpu.memory_space<vmem>>, vector<8x4x8xf32>
    tpu.vector_store %arg3[%c0_12, %c0_13, %c0_14], %20 {strides = array<i32>} : memref<8x4x8xf32, #tpu.memory_space<vmem>>, vector<8x4x8xf32>,
    return
  }
}

module attributes {stable_mosaic.version = 11 : i64} {
  func.func @_post_kernel(%arg0: i32, %arg1: memref<8x32xf32, #tpu.memory_space<vmem>>, %arg2: memref<8x32xf32, #tpu.memory_space<vmem>>, %arg3: memref<32x32xbf16, #tpu.memory_space<vmem>>, %arg4: memref<1x32xf32, #tpu.memory_space<vmem>>, %arg5: memref<32x64xbf16, #tpu.memory_space<vmem>>, %arg6: memref<1x64xf32, #tpu.memory_space<vmem>>, %arg7: memref<64x32xbf16, #tpu.memory_space<vmem>>, %arg8: memref<1x32xf32, #tpu.memory_space<vmem>>, %arg9: memref<1x32xf32, #tpu.memory_space<vmem>>, %arg10: memref<1x32xf32, #tpu.memory_space<vmem>>, %arg11: memref<1x32xf32, #tpu.memory_space<vmem>>, %arg12: memref<1x32xf32, #tpu.memory_space<vmem>>, %arg13: memref<1x32xf32, #tpu.memory_space<vmem>>, %arg14: memref<1x32xf32, #tpu.memory_space<vmem>>, %arg15: memref<8x32xf32, #tpu.memory_space<vmem>>) attributes {dimension_semantics = [#tpu.dimension_semantics<parallel>], iteration_bounds = array<i64: 1>, scalar_prefetch = 0 : i64, scratch_operands = 0 : i64, tpu.core_type = #tpu.core_type<tc>, window_params = [{transform_indices = @transform_0, window_bounds = array<i64: 8, 32>}, {transform_indices = @transform_1, window_bounds = array<i64: 8, 32>}, {pipeline_mode = #tpu.pipeline_mode<synchronous>, transform_indices = @transform_2, window_bounds = array<i64: 32, 32>}, {pipeline_mode = #tpu.pipeline_mode<synchronous>, transform_indices = @transform_3, window_bounds = array<i64: 1, 32>}, {pipeline_mode = #tpu.pipeline_mode<synchronous>, transform_indices = @transform_4, window_bounds = array<i64: 32, 64>}, {pipeline_mode = #tpu.pipeline_mode<synchronous>, transform_indices = @transform_5, window_bounds = array<i64: 1, 64>}, {pipeline_mode = #tpu.pipeline_mode<synchronous>, transform_indices = @transform_6, window_bounds = array<i64: 64, 32>}, {pipeline_mode = #tpu.pipeline_mode<synchronous>, transform_indices = @transform_7, window_bounds = array<i64: 1, 32>}, {pipeline_mode = #tpu.pipeline_mode<synchronous>, transform_indices = @transform_8, window_bounds = array<i64: 1, 32>}, {pipeline_mode = #tpu.pipeline_mode<synchronous>, transform_indices = @transform_9, window_bounds = array<i64: 1, 32>}, {pipeline_mode = #tpu.pipeline_mode<synchronous>, transform_indices = @transform_10, window_bounds = array<i64: 1, 32>}, {pipeline_mode = #tpu.pipeline_mode<synchronous>, transform_indices = @transform_11, window_bounds = array<i64: 1, 32>}, {pipeline_mode = #tpu.pipeline_mode<synchronous>, transform_indices = @transform_12, window_bounds = array<i64: 1, 32>}, {pipeline_mode = #tpu.pipeline_mode<synchronous>, transform_indices = @transform_13, window_bounds = array<i64: 1, 32>}, {transform_indices = @transform_14, window_bounds = array<i64: 8, 32>}]} {
    %c0 = arith.constant 0 : index
    %c0_0 = arith.constant 0 : index
    %0 = vector.load %arg1[%c0, %c0_0] : memref<8x32xf32, #tpu.memory_space<vmem>>, vector<8x32xf32>
    %c0_1 = arith.constant 0 : index
    %c0_2 = arith.constant 0 : index
    %1 = vector.load %arg2[%c0_1, %c0_2] : memref<8x32xf32, #tpu.memory_space<vmem>>, vector<8x32xf32>
    %2 = arith.truncf %1 : vector<8x32xf32> to vector<8x32xbf16>
    %c0_3 = arith.constant 0 : index
    %c0_4 = arith.constant 0 : index
    %3 = vector.load %arg3[%c0_3, %c0_4] : memref<32x32xbf16, #tpu.memory_space<vmem>>, vector<32x32xbf16>
    %cst = arith.constant dense<0.000000e+00> : vector<8x32xf32>
    %4 = tpu.matmul %2, %3, %cst {dimension_numbers = #tpu.dot_dimension_numbers<[1], [0], [0], [1], [0, 0, 1, 1], [], []>} : vector<8x32xbf16>, vector<32x32xbf16>, vector<8x32xf32> -> vector<8x32xf32>
    %c0_5 = arith.constant 0 : index
    %c0_6 = arith.constant 0 : index
    %5 = vector.load %arg4[%c0_5, %c0_6] : memref<1x32xf32, #tpu.memory_space<vmem>>, vector<1x32xf32>
    %6 = vector.broadcast %5 : vector<1x32xf32> to vector<8x32xf32>
    %7 = arith.addf %4, %6 : vector<8x32xf32>
    %8 = arith.addf %0, %7 : vector<8x32xf32>
    %c0_7 = arith.constant 0 : index
    %c0_8 = arith.constant 0 : index
    %9 = vector.load %arg9[%c0_7, %c0_8] : memref<1x32xf32, #tpu.memory_space<vmem>>, vector<1x32xf32>
    %c0_9 = arith.constant 0 : index
    %c0_10 = arith.constant 0 : index
    %10 = vector.load %arg10[%c0_9, %c0_10] : memref<1x32xf32, #tpu.memory_space<vmem>>, vector<1x32xf32>
    %cst_11 = arith.constant dense<0.000000e+00> : vector<8xf32>
    %11 = vector.multi_reduction <add>, %8, %cst_11 [1] : vector<8x32xf32> to vector<8xf32>
    %12 = vector.shape_cast %11 : vector<8xf32> to vector<8x1xf32>
    %cst_12 = arith.constant 3.200000e+01 : f32
    %13 = vector.broadcast %cst_12 : f32 to vector<8x1xf32>
    %14 = arith.divf %12, %13 : vector<8x1xf32>
    %15 = vector.broadcast %14 : vector<8x1xf32> to vector<8x32xf32>
    %16 = arith.subf %8, %15 : vector<8x32xf32>
    %17 = arith.mulf %16, %16 : vector<8x32xf32>
    %cst_13 = arith.constant dense<0.000000e+00> : vector<8xf32>
    %18 = vector.multi_reduction <add>, %17, %cst_13 [1] : vector<8x32xf32> to vector<8xf32>
    %19 = vector.shape_cast %18 : vector<8xf32> to vector<8x1xf32>
    %cst_14 = arith.constant 3.200000e+01 : f32
    %20 = vector.broadcast %cst_14 : f32 to vector<8x1xf32>
    %21 = arith.divf %19, %20 : vector<8x1xf32>
    %cst_15 = arith.constant 9.99999974E-6 : f32
    %22 = vector.broadcast %cst_15 : f32 to vector<8x1xf32>
    %23 = arith.addf %21, %22 : vector<8x1xf32>
    %24 = math.rsqrt %23 : vector<8x1xf32>
    %25 = vector.broadcast %24 : vector<8x1xf32> to vector<8x32xf32>
    %26 = arith.mulf %16, %25 : vector<8x32xf32>
    %27 = vector.broadcast %9 : vector<1x32xf32> to vector<8x32xf32>
    %28 = arith.mulf %26, %27 : vector<8x32xf32>
    %29 = vector.broadcast %10 : vector<1x32xf32> to vector<8x32xf32>
    %30 = arith.addf %28, %29 : vector<8x32xf32>
    %31 = arith.truncf %30 : vector<8x32xf32> to vector<8x32xbf16>
    %c0_16 = arith.constant 0 : index
    %c0_17 = arith.constant 0 : index
    %32 = vector.load %arg5[%c0_16, %c0_17] : memref<32x64xbf16, #tpu.memory_space<vmem>>, vector<32x64xbf16>
    %cst_18 = arith.constant dense<0.000000e+00> : vector<8x64xf32>
    %33 = tpu.matmul %31, %32, %cst_18 {dimension_numbers = #tpu.dot_dimension_numbers<[1], [0], [0], [1], [0, 0, 1, 1], [], []>} : vector<8x32xbf16>, vector<32x64xbf16>, vector<8x64xf32> -> vector<8x64xf32>
    %c0_19 = arith.constant 0 : index
    %c0_20 = arith.constant 0 : index
    %34 = vector.load %arg6[%c0_19, %c0_20] : memref<1x64xf32, #tpu.memory_space<vmem>>, vector<1x64xf32>
    %35 = vector.broadcast %34 : vector<1x64xf32> to vector<8x64xf32>
    %36 = arith.addf %33, %35 : vector<8x64xf32>
    %cst_21 = arith.constant 5.000000e-01 : f32
    %37 = vector.broadcast %cst_21 : f32 to vector<8x64xf32>
    %38 = arith.mulf %37, %36 : vector<8x64xf32>
    %cst_22 = arith.constant 4.471500e-02 : f32
    %39 = vector.broadcast %cst_22 : f32 to vector<8x64xf32>
    %40 = arith.mulf %39, %36 : vector<8x64xf32>
    %41 = arith.mulf %40, %36 : vector<8x64xf32>
    %42 = arith.mulf %41, %36 : vector<8x64xf32>
    %43 = arith.addf %36, %42 : vector<8x64xf32>
    %cst_23 = arith.constant 0.797884583 : f32
    %44 = vector.broadcast %cst_23 : f32 to vector<8x64xf32>
    %45 = arith.mulf %44, %43 : vector<8x64xf32>
    %46 = math.tanh %45 : vector<8x64xf32>
    %cst_24 = arith.constant 1.000000e+00 : f32
    %47 = vector.broadcast %cst_24 : f32 to vector<8x64xf32>
    %48 = arith.addf %47, %46 : vector<8x64xf32>
    %49 = arith.mulf %38, %48 : vector<8x64xf32>
    %50 = arith.truncf %49 : vector<8x64xf32> to vector<8x64xbf16>
    %c0_25 = arith.constant 0 : index
    %c0_26 = arith.constant 0 : index
    %51 = vector.load %arg7[%c0_25, %c0_26] : memref<64x32xbf16, #tpu.memory_space<vmem>>, vector<64x32xbf16>
    %cst_27 = arith.constant dense<0.000000e+00> : vector<8x32xf32>
    %52 = tpu.matmul %50, %51, %cst_27 {dimension_numbers = #tpu.dot_dimension_numbers<[1], [0], [0], [1], [0, 0, 1, 1], [], []>} : vector<8x64xbf16>, vector<64x32xbf16>, vector<8x32xf32> -> vector<8x32xf32>
    %c0_28 = arith.constant 0 : index
    %c0_29 = arith.constant 0 : index
    %53 = vector.load %arg8[%c0_28, %c0_29] : memref<1x32xf32, #tpu.memory_space<vmem>>, vector<1x32xf32>
    %54 = vector.broadcast %53 : vector<1x32xf32> to vector<8x32xf32>
    %55 = arith.addf %52, %54 : vector<8x32xf32>
    %56 = arith.addf %30, %55 : vector<8x32xf32>
    %c0_30 = arith.constant 0 : index
    %c0_31 = arith.constant 0 : index
    %57 = vector.load %arg11[%c0_30, %c0_31] : memref<1x32xf32, #tpu.memory_space<vmem>>, vector<1x32xf32>
    %c0_32 = arith.constant 0 : index
    %c0_33 = arith.constant 0 : index
    %58 = vector.load %arg12[%c0_32, %c0_33] : memref<1x32xf32, #tpu.memory_space<vmem>>, vector<1x32xf32>
    %cst_34 = arith.constant dense<0.000000e+00> : vector<8xf32>
    %59 = vector.multi_reduction <add>, %56, %cst_34 [1] : vector<8x32xf32> to vector<8xf32>
    %60 = vector.shape_cast %59 : vector<8xf32> to vector<8x1xf32>
    %cst_35 = arith.constant 3.200000e+01 : f32
    %61 = vector.broadcast %cst_35 : f32 to vector<8x1xf32>
    %62 = arith.divf %60, %61 : vector<8x1xf32>
    %63 = vector.broadcast %62 : vector<8x1xf32> to vector<8x32xf32>
    %64 = arith.subf %56, %63 : vector<8x32xf32>
    %65 = arith.mulf %64, %64 : vector<8x32xf32>
    %cst_36 = arith.constant dense<0.000000e+00> : vector<8xf32>
    %66 = vector.multi_reduction <add>, %65, %cst_36 [1] : vector<8x32xf32> to vector<8xf32>
    %67 = vector.shape_cast %66 : vector<8xf32> to vector<8x1xf32>
    %cst_37 = arith.constant 3.200000e+01 : f32
    %68 = vector.broadcast %cst_37 : f32 to vector<8x1xf32>
    %69 = arith.divf %67, %68 : vector<8x1xf32>
    %cst_38 = arith.constant 9.99999974E-6 : f32
    %70 = vector.broadcast %cst_38 : f32 to vector<8x1xf32>
    %71 = arith.addf %69, %70 : vector<8x1xf32>
    %72 = math.rsqrt %71 : vector<8x1xf32>
    %73 = vector.broadcast %72 : vector<8x1xf32> to vector<8x32xf32>
    %74 = arith.mulf %64, %73 : vector<8x32xf32>
    %75 = vector.broadcast %57 : vector<1x32xf32> to vector<8x32xf32>
    %76 = arith.mulf %74, %75 : vector<8x32xf32>
    %77 = vector.broadcast %58 : vector<1x32xf32> to vector<8x32xf32>
    %78 = arith.addf %76, %77 : vector<8x32xf32>
    %c0_39 = arith.constant 0 : index
    %c0_40 = arith.constant 0 : index
    %79 = vector.load %arg13[%c0_39, %c0_40] : memref<1x32xf32, #tpu.memory_space<vmem>>, vector<1x32xf32>
    %c0_41 = arith.constant 0 : index
    %c0_42 = arith.constant 0 : index
    %80 = vector.load %arg14[%c0_41, %c0_42] : memref<1x32xf32, #tpu.memory_space<vmem>>, vector<1x32xf32>
    %cst_43 = arith.constant dense<0.000000e+00> : vector<8xf32>
    %81 = vector.multi_reduction <add>, %78, %cst_43 [1] : vector<8x32xf32> to vector<8xf32>
    %82 = vector.shape_cast %81 : vector<8xf32> to vector<8x1xf32>
    %cst_44 = arith.constant 3.200000e+01 : f32
    %83 = vector.broadcast %cst_44 : f32 to vector<8x1xf32>
    %84 = arith.divf %82, %83 : vector<8x1xf32>
    %85 = vector.broadcast %84 : vector<8x1xf32> to vector<8x32xf32>
    %86 = arith.subf %78, %85 : vector<8x32xf32>
    %87 = arith.mulf %86, %86 : vector<8x32xf32>
    %cst_45 = arith.constant dense<0.000000e+00> : vector<8xf32>
    %88 = vector.multi_reduction <add>, %87, %cst_45 [1] : vector<8x32xf32> to vector<8xf32>
    %89 = vector.shape_cast %88 : vector<8xf32> to vector<8x1xf32>
    %cst_46 = arith.constant 3.200000e+01 : f32
    %90 = vector.broadcast %cst_46 : f32 to vector<8x1xf32>
    %91 = arith.divf %89, %90 : vector<8x1xf32>
    %cst_47 = arith.constant 9.99999974E-6 : f32
    %92 = vector.broadcast %cst_47 : f32 to vector<8x1xf32>
    %93 = arith.addf %91, %92 : vector<8x1xf32>
    %94 = math.rsqrt %93 : vector<8x1xf32>
    %95 = vector.broadcast %94 : vector<8x1xf32> to vector<8x32xf32>
    %96 = arith.mulf %86, %95 : vector<8x32xf32>
    %97 = vector.broadcast %79 : vector<1x32xf32> to vector<8x32xf32>
    %98 = arith.mulf %96, %97 : vector<8x32xf32>
    %99 = vector.broadcast %80 : vector<1x32xf32> to vector<8x32xf32>
    %100 = arith.addf %98, %99 : vector<8x32xf32>
    %c0_48 = arith.constant 0 : index
    %c0_49 = arith.constant 0 : index
    %101 = vector.load %arg15[%c0_48, %c0_49] : memref<8x32xf32, #tpu.memory_space<vmem>>, vector<8x32xf32>
    tpu.vector_store %arg15[%c0_48, %c0_49], %100 {strides = array<i32>} : memref<8x32xf32, #tpu.memory_space<vmem>>, vector<8x32xf32>,
    return
  }
  func.func @transform_0(%arg0: i32) -> (i32, i32) {
    %c0_i32 = arith.constant 0 : i32
    %c0_i32_0 = arith.constant 0 : i32
    return %arg0, %c0_i32 : i32, i32
  }
  func.func @transform_1(%arg0: i32) -> (i32, i32) {
    %c0_i32 = arith.constant 0 : i32
    %c0_i32_0 = arith.constant 0 : i32
    return %arg0, %c0_i32 : i32, i32
  }
  func.func @transform_2(%arg0: i32) -> (i32, i32) {
    %c0_i32 = arith.constant 0 : i32
    %c0_i32_0 = arith.constant 0 : i32
    %c0_i32_1 = arith.constant 0 : i32
    return %c0_i32, %c0_i32_0 : i32, i32
  }
  func.func @transform_3(%arg0: i32) -> (i32, i32) {
    %c0_i32 = arith.constant 0 : i32
    %c0_i32_0 = arith.constant 0 : i32
    %c0_i32_1 = arith.constant 0 : i32
    return %c0_i32, %c0_i32_0 : i32, i32
  }
  func.func @transform_4(%arg0: i32) -> (i32, i32) {
    %c0_i32 = arith.constant 0 : i32
    %c0_i32_0 = arith.constant 0 : i32
    %c0_i32_1 = arith.constant 0 : i32
    return %c0_i32, %c0_i32_0 : i32, i32
  }
  func.func @transform_5(%arg0: i32) -> (i32, i32) {
    %c0_i32 = arith.constant 0 : i32
    %c0_i32_0 = arith.constant 0 : i32
    %c0_i32_1 = arith.constant 0 : i32
    return %c0_i32, %c0_i32_0 : i32, i32
  }
  func.func @transform_6(%arg0: i32) -> (i32, i32) {
    %c0_i32 = arith.constant 0 : i32
    %c0_i32_0 = arith.constant 0 : i32
    %c0_i32_1 = arith.constant 0 : i32
    return %c0_i32, %c0_i32_0 : i32, i32
  }
  func.func @transform_7(%arg0: i32) -> (i32, i32) {
    %c0_i32 = arith.constant 0 : i32
    %c0_i32_0 = arith.constant 0 : i32
    %c0_i32_1 = arith.constant 0 : i32
    return %c0_i32, %c0_i32_0 : i32, i32
  }
  func.func @transform_8(%arg0: i32) -> (i32, i32) {
    %c0_i32 = arith.constant 0 : i32
    %c0_i32_0 = arith.constant 0 : i32
    %c0_i32_1 = arith.constant 0 : i32
    return %c0_i32, %c0_i32_0 : i32, i32
  }
  func.func @transform_9(%arg0: i32) -> (i32, i32) {
    %c0_i32 = arith.constant 0 : i32
    %c0_i32_0 = arith.constant 0 : i32
    %c0_i32_1 = arith.constant 0 : i32
    return %c0_i32, %c0_i32_0 : i32, i32
  }
  func.func @transform_10(%arg0: i32) -> (i32, i32) {
    %c0_i32 = arith.constant 0 : i32
    %c0_i32_0 = arith.constant 0 : i32
    %c0_i32_1 = arith.constant 0 : i32
    return %c0_i32, %c0_i32_0 : i32, i32
  }
  func.func @transform_11(%arg0: i32) -> (i32, i32) {
    %c0_i32 = arith.constant 0 : i32
    %c0_i32_0 = arith.constant 0 : i32
    %c0_i32_1 = arith.constant 0 : i32
    return %c0_i32, %c0_i32_0 : i32, i32
  }
  func.func @transform_12(%arg0: i32) -> (i32, i32) {
    %c0_i32 = arith.constant 0 : i32
    %c0_i32_0 = arith.constant 0 : i32
    %c0_i32_1 = arith.constant 0 : i32
    return %c0_i32, %c0_i32_0 : i32, i32
  }
  func.func @transform_13(%arg0: i32) -> (i32, i32) {
    %c0_i32 = arith.constant 0 : i32
    %c0_i32_0 = arith.constant 0 : i32
    %c0_i32_1 = arith.constant 0 : i32
    return %c0_i32, %c0_i32_0 : i32, i32
  }
  func.func @transform_14(%arg0: i32) -> (i32, i32) {
    %c0_i32 = arith.constant 0 : i32
    %c0_i32_0 = arith.constant 0 : i32
    return %arg0, %c0_i32 : i32, i32
  }
}

</mosaic_0001>

<bundles_post_ra>
// kernel: myformer_forward.12
= control target key start
LH: loop header
LB: loop body
LE: loop exit
PB: predicated region body
PF: predicated region fallthrough
CT: control target
= control target key end

     0   :  { %s585_s21 = smov 0   ;;  %s636_s0 = inlined_call_operand.vmem [shape: f32[2,16,8], index: 0, kind: input, shape index: {}]   ;;  %s637_s1 = inlined_call_operand.vmem [shape: bf16[8,32], index: 1, kind: input, shape index: {}]   ;;  %s638_s2 = inlined_call_operand.vmem [shape: bf16[8,32], index: 2, kind: input, shape index: {}]   ;;  %s639_s3 = inlined_call_operand.vmem [shape: bf16[8,32], index: 3, kind: input, shape index: {}]   ;;  %s640_s4 = inlined_call_operand.vmem [shape: f32[1,32], index: 4, kind: input, shape index: {}]   ;;  %s641_s5 = inlined_call_operand.vmem [shape: f32[16,32], index: 5, kind: input, shape index: {}]   ;;  %s642_s6 = inlined_call_operand.vmem [shape: f32[2,16,32], index: 6, kind: output, shape index: {}]  }
   0x1 LB: > { %s489_s22 = sadd.s32 4294967295, %s546_s21   ;;  %p493_p0 = scmp.ge.s32.totalorder %s546_s21, 1  ;;  %s546_s21 = sphi %s585_s21, %s16_s21  }
   0x2   : > { %p212_p1 = scmp.lt.s32.totalorder %s546_s21, 3 }
   0x4   : > { %p213_p2 = pnand %p493_p0, %p212_p1 }
   0x5   : > { %p242_p3 = scmp.lt.s32.totalorder (!%p213_p2), %s489_s22, 1 }
   0x6   : > { %216 = sbr.rel (%p213_p2) target bundleno = 230 (0xe6), region = 44 }
   0xb   : > { %v270_v0 = vld [vmem:[%s638_s2] sm:$0xf]  ;;  %vm275_vm0 = vcmask 1043456   ;;  %v257_v1 = vlaneseq  ;;  %v548_v2 = vmov 0.0   ;;  %vm549_vm1 = vmmov 0   ;;  %s644_s22 = smov (!%p242_p3, %s489_s22), 1 }
   0xc   : > { %512 = vmatprep.subr.bf16.mxu0 %v548_v2  ;;  %v277_v3 = vsel %vm275_vm0, %v270_v0, 0  ;;  %514 = vmatprep.mubr.msk.bf16.mxu0 %vm549_vm1, %v548_v2  ;;  %v268_v4 = vld [vmem:[%s637_s1] sm:$0xf]  ;;  %s504_s27 = sshll.u32 %s644_s22, 4  ;;  %vm271_vm2 = vcmask 64512   ;;  %vm431_vm5 = vcmask 261120  }
   0xd   : > { %513 = vmatpush3.bf16.msra.mxu0 %v277_v3  ;;  %518 = vmatprep.subr.bf16.mxu1 %v548_v2  ;;  %v324_v5 = vsel %vm275_vm0, %v268_v4, 0  ;;  %v258_v6 = vshrl.u32 %v257_v1, 7  ;;  %s246_s30 = scalar_lea.vmem %s636_s0, %s504_s27  ;;  %v368_v7 = vld [vmem:[%s639_s3] sm:$0xf]  ;;  %s251_s15 = scalar_lea.vmem %s642_s6, %s504_s27  ;;  %v428_v41 = vld [vmem:[%s641_s5 + $0x8] sm:$0xff] }
   0xe   : > { %524 = vmatprep.subr.bf16.mxu0 %v548_v2  ;;  %519 = vmatpush3.bf16.msra.mxu1 %v324_v5  ;;  %v253_v8 = vld [vmem:[%s246_s30] sm:$0xff]  ;;  %v254_v9 = vld [vmem:[%s246_s30 + $0x8] sm:$0xff]  ;;  %v373_v15 = vsel %vm275_vm0, %v368_v7, 0 }
   0xf   : > { %520 = vmatprep.mubr.msk.bf16.mxu1 %vm549_vm1, %v548_v2  ;;  %vm259_vm3 = vcmp.lt.s32.totalorder %v258_v6, 1  ;;  %v255_v10 = vrot.slane %v253_v8, 7  ;;  %v256_v11 = vrot.slane %v254_v9, 7  ;;  %v262_v12 = vrot.slane %v253_v8, 1  ;;  %v501_v31 = vld [vmem:[%s640_s4] ss:$0 sm:$0xff] }
  0x10   : > { %v263_v13 = vrot.slane %v254_v9, 1  ;;  %v269_v14 = vpack.c.bf16 %v254_v9, %v253_v8  ;;  %vm264_vm4 = vcmp.lt.s32.totalorder %v258_v6, 7  ;;  %v427_v34 = vld [vmem:[%s641_s5] sm:$0xff] }
  0x11   : > { %v260_v16 = vsel %vm259_vm3, %v255_v10, %v256_v11  ;;  %v261_v17 = vsel %vm259_vm3, %v256_v11, %v255_v10 }
  0x12   : > { %515 = vmatmul.mubr.msk.bf16.vlgmr.msra.gmra.mxu0 %vm271_vm2, %v269_v14  ;;  %v267_v18 = vpack.c.bf16 %v260_v16, %v261_v17  ;;  %v265_v19 = vsel %vm264_vm4, %v262_v12, %v263_v13  ;;  %v266_v20 = vsel %vm264_vm4, %v263_v13, %v262_v12 }
  0x13   : > { %525 = vmatpush3.bf16.msra.mxu0 %v373_v15  ;;  %526 = vmatprep.mubr.msk.bf16.mxu0 %vm549_vm1, %v548_v2  ;;  %v367_v21 = vpack.c.bf16 %v266_v20, %v265_v19 }
  0x14   : > { %521 = vmatmul.mubr.msk.bf16.vlgmr.msra.gmra.mxu1 %vm271_vm2, %v267_v18 }
  0x1a   : > { %527 = vmatmul.mubr.msk.bf16.vlgmr.msra.gmra.mxu0 %vm271_vm2, %v367_v21 }
  0xd2   : > { %v313_v22 = vpop.f32.mrf.mxu0 }
  0xd4   : > { %v516_v23 = vpop.f32.mrf.mxu0  ;;  %v360_v24 = vpop.f32.mrf.mxu1 }
  0xd5   : > { %v361_v29 = vadd.f32 %v360_v24, %v313_v22 }
  0xd6   : > { %v316_v25 = vpop.f32.mrf.mxu0  ;;  %v522_v26 = vpop.f32.mrf.mxu1 }
  0xd8   : > { %v517_v27 = vpop.f32.mrf.mxu0  ;;  %v363_v28 = vpop.f32.mrf.mxu1 }
  0xd9   : > { %v364_v36 = vadd.f32 %v363_v28, %v316_v25 }
  0xda   : > { %v409_v30 = vpop.f32.mrf.mxu0  ;;  %v523_v32 = vpop.f32.mrf.mxu1 }
  0xdb   : > { %v416_v33 = vadd.f32 %v409_v30, %v361_v29 }
  0xdc   : > { %v528_v35 = vpop.f32.mrf.mxu0 }
  0xdd   : > { %v425_v37 = vadd.f32 %v501_v31, %v416_v33 }
  0xde   : > { %v412_v38 = vpop.f32.mrf.mxu0 }
  0xdf   : > { %v429_v39 = vadd.f32 %v427_v34, %v425_v37  ;;  %v417_v40 = vadd.f32 %v412_v38, %v364_v36 }
  0xe0   : > { %v529_v42 = vpop.f32.mrf.mxu0 }
  0xe1   : > { %432 = vst.msk [vmem:[%s251_s15] sm:$0xff] %vm431_vm5, %v429_v39  ;;  %v426_v43 = vadd.f32 %v501_v31, %v417_v40 }
  0xe3   : > { %v430_v44 = vadd.f32 %v428_v41, %v426_v43 }
  0xe5   : > { %433 = vst.msk [vmem:[%s251_s15 + $0x8] sm:$0xff] %vm431_vm5, %v430_v44 }
  0xe6 PF: > { %s16_s21 = sadd.s32 1, %s546_s21  }
  0xe7   : > { %p13_p4 = scmp.ge.s32.totalorder %s16_s21, 4  }
  0xe9   :  { %15 = sbr.rel (!%p13_p4) target bundleno = 1 (0x1), region = 74 }

// kernel: myformer_forward.13
= control target key start
LH: loop header
LB: loop body
LE: loop exit
PB: predicated region body
PF: predicated region fallthrough
CT: control target
= control target key end

     0   :  { %vm44_vm0 = vcmask 261120   ;;  %vm100_vm1 = vcmask 785408   ;;  %s181_s1 = inlined_call_operand.vmem [shape: bf16[32,96], index: 1, kind: input, shape index: {}]   ;;  %s182_s0 = inlined_call_operand.vmem [shape: f32[32,32], index: 0, kind: input, shape index: {}]   ;;  %s183_s2 = inlined_call_operand.vmem [shape: f32[1,96], index: 2, kind: input, shape index: {}]   ;;  %s184_s3 = inlined_call_operand.vmem [shape: f32[32,96], index: 3, kind: output, shape index: {}]  }
   0x1   :  { %v126_v0 = vld [vmem:[%s181_s1 + $0x8] sm:$0xff]   ;;  %v127_v1 = vld [vmem:[%s181_s1] sm:$0xff]   ;;  %v17_v5 = vld [vmem:[%s182_s0 + $0x10] sm:$0xff] }
   0x2   :  { %118 = vmatprep.subr.bf16.mxu0 %v126_v0  ;;  %v15_v2 = vld [vmem:[%s182_s0] sm:$0xff]  ;;  %v16_v3 = vld [vmem:[%s182_s0 + $0x8] sm:$0xff]  ;;  %v18_v6 = vld [vmem:[%s182_s0 + $0x18] sm:$0xff] }
   0x3   :  { %119 = vmatpush3.bf16.msra.mxu0 %v126_v0  ;;  %v19_v4 = vpack.c.bf16 %v16_v3, %v15_v2  ;;  %v20_v7 = vpack.c.bf16 %v18_v6, %v17_v5  ;;  %v109_v8 = vld [vmem:[%s183_s2] ss:$0 sm:$0xff] }
   0x4   :  { %120 = vmatprep.subr.bf16.mxu0 %v127_v1 }
   0x5   :  { %122 = vmatprep.mubr.msk.bf16.mxu0 %vm44_vm0, %v19_v4 }
   0x7   :  { %121 = vmatpush3.bf16.msra.mxu0 %v127_v1 }
   0xa   :  { %123 = vmatmul.mubr.msk.bf16.vlgmr.msra.gmra.mxu0 %vm44_vm0, %v20_v7 }
  0xca   :  { %v124_v9 = vpop.f32.mrf.mxu0 }
  0xcb   :  { %v94_v10 = vadd.f32 %v124_v9, %v109_v8 }
  0xcc   :  { %v85_v11 = vpop.f32.mrf.mxu0 }
  0xcd   :  { %103 = vst.msk [vmem:[%s184_s3 + $0x10] sm:$0xff] %vm100_vm1, %v94_v10  ;;  %v86_v12 = vadd.f32 %v109_v8, %v85_v11 }
  0xce   :  { %v125_v13 = vpop.f32.mrf.mxu0 }
  0xcf   :  { %101 = vst.msk [vmem:[%s184_s3] sm:$0xff] %vm100_vm1, %v86_v12  ;;  %v97_v14 = vadd.f32 %v125_v13, %v109_v8 }
  0xd0   :  { %v88_v15 = vpop.f32.mrf.mxu0 }
  0xd1   :  { %104 = vst.msk [vmem:[%s184_s3 + $0x18] sm:$0xff] %vm100_vm1, %v97_v14  ;;  %v89_v16 = vadd.f32 %v109_v8, %v88_v15 }
  0xd3   :  { %102 = vst.msk [vmem:[%s184_s3 + $0x8] sm:$0xff] %vm100_vm1, %v89_v16 }

// kernel: myformer_forward.14
= control target key start
LH: loop header
LB: loop body
LE: loop exit
PB: predicated region body
PF: predicated region fallthrough
CT: control target
= control target key end

     0   :  { %v1249_v0 = vmov 0.0   ;;  %vm87_vm0 = vcmask 64512   ;;  %vm1250_vm1 = vmmov 0   ;;  %vm480_vm2 = vcmask 130048   ;;  %s1711_s1 = inlined_call_operand.vmem [shape: f32[8,16,8], index: 1, kind: input, shape index: {}]   ;;  %s1712_s0 = inlined_call_operand.vmem [shape: f32[8,15,8], index: 0, kind: input, shape index: {}]   ;;  %s1713_s2 = inlined_call_operand.vmem [shape: f32[8,16,8], index: 2, kind: input, shape index: {}]   ;;  %s1714_s3 = inlined_call_operand.vmem [shape: f32[8,15,8], index: 3, kind: output, shape index: {}]  }
   0x1   :  { %1087 = vmatprep.subr.bf16.mxu0 %v1249_v0  ;;  %1093 = vmatprep.subr.bf16.mxu1 %v1249_v0  ;;  %v39_v1 = vld [vmem:[%s1711_s1] sm:$0xff]  ;;  %v40_v2 = vld [vmem:[%s1711_s1 + $0x8] sm:$0xff]  ;;  %v41_v3 = vld [vmem:[%s1711_s1 + $0x10] sm:$0xff]  ;;  %vm484_vm3 = vcmask 129024   ;;  %vm1019_vm4 = vcmask 63488  }
   0x2   :  { %v55_v4 = vpack.c.bf16 %v40_v2, %v39_v1  ;;  %v42_v5 = vld [vmem:[%s1711_s1 + $0x18] sm:$0xff]  ;;  %1089 = vmatprep.mubr.msk.bf16.mxu0 %vm1250_vm1, %v1249_v0  ;;  %1095 = vmatprep.mubr.msk.bf16.mxu1 %vm1250_vm1, %v1249_v0  ;;  %v43_v7 = vld [vmem:[%s1711_s1 + $0x20] sm:$0xff]  ;;  %v44_v9 = vld [vmem:[%s1711_s1 + $0x28] sm:$0xff] }
   0x3   :  { %v56_v6 = vpack.c.bf16 %v42_v5, %v41_v3  ;;  %v45_v10 = vld [vmem:[%s1711_s1 + $0x30] sm:$0xff]  ;;  %v46_v11 = vld [vmem:[%s1711_s1 + $0x38] sm:$0xff]  ;;  %v15_v13 = vld [vmem:[%s1712_s0] sm:$0xff]  ;;  %v57_v17 = vpack.c.bf16 %v44_v9, %v43_v7 }
   0x4   :  { %v92_v8 = vsel %vm87_vm0, %v55_v4, 0  ;;  %v16_v14 = vld [vmem:[%s1712_s0 + $0x8] sm:$0x7f]  ;;  %v17_v15 = vld [vmem:[%s1712_s0 + $0x10] sm:$0xff]  ;;  %v18_v16 = vld [vmem:[%s1712_s0 + $0x18] sm:$0x7f]  ;;  %v58_v18 = vpack.c.bf16 %v46_v11, %v45_v10 }
   0x5   :  { %1088 = vmatpush3.bf16.xpose.msra.mxu0 %v92_v8  ;;  %v139_v12 = vsel %vm87_vm0, %v56_v6, 0  ;;  %v31_v19 = vpack.c.bf16 %v16_v14, %v15_v13  ;;  %v32_v20 = vpack.c.bf16 %v18_v16, %v17_v15  ;;  %v186_v21 = vsel %vm87_vm0, %v57_v17, 0  ;;  %v47_v23 = vld [vmem:[%s1711_s1 + $0x40] sm:$0xff]  ;;  %v48_v24 = vld [vmem:[%s1711_s1 + $0x48] sm:$0xff]  ;;  %v49_v25 = vld [vmem:[%s1711_s1 + $0x50] sm:$0xff] }
   0x6   :  { %1094 = vmatpush3.bf16.xpose.msra.mxu1 %v139_v12  ;;  %1099 = vmatprep.subr.bf16.mxu0 %v1249_v0  ;;  %v233_v22 = vsel %vm87_vm0, %v58_v18, 0  ;;  %v50_v26 = vld [vmem:[%s1711_s1 + $0x58] sm:$0xff]  ;;  %v19_v27 = vld [vmem:[%s1712_s0 + $0x20] sm:$0xff]  ;;  %v20_v28 = vld [vmem:[%s1712_s0 + $0x28] sm:$0x7f]  ;;  %v59_v31 = vpack.c.bf16 %v48_v24, %v47_v23 }
   0x7   :  { %1105 = vmatprep.subr.bf16.mxu1 %v1249_v0  ;;  %v21_v29 = vld [vmem:[%s1712_s0 + $0x30] sm:$0xff]  ;;  %v22_v30 = vld [vmem:[%s1712_s0 + $0x38] sm:$0x7f]  ;;  %v60_v32 = vpack.c.bf16 %v50_v26, %v49_v25  ;;  %v33_v33 = vpack.c.bf16 %v20_v28, %v19_v27  ;;  %v51_v37 = vld [vmem:[%s1711_s1 + $0x60] sm:$0xff] }
   0x8   :  { %v34_v34 = vpack.c.bf16 %v22_v30, %v21_v29  ;;  %v280_v35 = vsel %vm87_vm0, %v59_v31, 0  ;;  %v52_v38 = vld [vmem:[%s1711_s1 + $0x68] sm:$0xff]  ;;  %v53_v39 = vld [vmem:[%s1711_s1 + $0x70] sm:$0xff]  ;;  %v54_v40 = vld [vmem:[%s1711_s1 + $0x78] sm:$0xff] }
   0x9   :  { %v327_v36 = vsel %vm87_vm0, %v60_v32, 0  ;;  %v23_v41 = vld [vmem:[%s1712_s0 + $0x40] sm:$0xff]  ;;  %v24_v42 = vld [vmem:[%s1712_s0 + $0x48] sm:$0x7f]  ;;  %v25_v43 = vld [vmem:[%s1712_s0 + $0x50] sm:$0xff]  ;;  %v61_v45 = vpack.c.bf16 %v52_v38, %v51_v37  ;;  %v62_v46 = vpack.c.bf16 %v54_v40, %v53_v39 }
   0xa   :  { %v26_v44 = vld [vmem:[%s1712_s0 + $0x58] sm:$0x7f]  ;;  %v35_v47 = vpack.c.bf16 %v24_v42, %v23_v41  ;;  %v27_v51 = vld [vmem:[%s1712_s0 + $0x60] sm:$0xff]  ;;  %v28_v52 = vld [vmem:[%s1712_s0 + $0x68] sm:$0x7f] }
   0xb   :  { %v36_v48 = vpack.c.bf16 %v26_v44, %v25_v43  ;;  %v374_v49 = vsel %vm87_vm0, %v61_v45, 0  ;;  %v421_v50 = vsel %vm87_vm0, %v62_v46, 0  ;;  %v29_v53 = vld [vmem:[%s1712_s0 + $0x70] sm:$0xff]  ;;  %v30_v54 = vld [vmem:[%s1712_s0 + $0x78] sm:$0x7f]  ;;  %v37_v55 = vpack.c.bf16 %v28_v52, %v27_v51 }
   0xc   :  { %1090 = vmatmul.mubr.msk.bf16.vlgmr.msra.gmra.mxu0 %vm87_vm0, %v31_v19  ;;  %v38_v56 = vpack.c.bf16 %v30_v54, %v29_v53 }
   0xd   :  { %1096 = vmatmul.mubr.msk.bf16.vlgmr.msra.gmra.mxu1 %vm87_vm0, %v32_v20  ;;  %1100 = vmatpush3.bf16.xpose.msra.mxu0 %v186_v21 }
   0xe   :  { %1106 = vmatpush3.bf16.xpose.msra.mxu1 %v233_v22  ;;  %1101 = vmatprep.mubr.msk.bf16.mxu0 %vm1250_vm1, %v1249_v0 }
   0xf   :  { %1107 = vmatprep.mubr.msk.bf16.mxu1 %vm1250_vm1, %v1249_v0  ;;  %1111 = vmatprep.subr.bf16.mxu0 %v1249_v0 }
  0x10   :  { %1117 = vmatprep.subr.bf16.mxu1 %v1249_v0 }
  0x14   :  { %1102 = vmatmul.mubr.msk.bf16.vlgmr.msra.gmra.mxu0 %vm87_vm0, %v33_v33 }
  0x15   :  { %1108 = vmatmul.mubr.msk.bf16.vlgmr.msra.gmra.mxu1 %vm87_vm0, %v34_v34  ;;  %1112 = vmatpush3.bf16.xpose.msra.mxu0 %v280_v35 }
  0x16   :  { %1118 = vmatpush3.bf16.xpose.msra.mxu1 %v327_v36  ;;  %1113 = vmatprep.mubr.msk.bf16.mxu0 %vm1250_vm1, %v1249_v0 }
  0x17   :  { %1119 = vmatprep.mubr.msk.bf16.mxu1 %vm1250_vm1, %v1249_v0  ;;  %1123 = vmatprep.subr.bf16.mxu0 %v1249_v0 }
  0x18   :  { %1129 = vmatprep.subr.bf16.mxu1 %v1249_v0 }
  0x1c   :  { %1114 = vmatmul.mubr.msk.bf16.vlgmr.msra.gmra.mxu0 %vm87_vm0, %v35_v47 }
  0x1d   :  { %1120 = vmatmul.mubr.msk.bf16.vlgmr.msra.gmra.mxu1 %vm87_vm0, %v36_v48  ;;  %1124 = vmatpush3.bf16.xpose.msra.mxu0 %v374_v49 }
  0x1e   :  { %1130 = vmatpush3.bf16.xpose.msra.mxu1 %v421_v50  ;;  %1125 = vmatprep.mubr.msk.bf16.mxu0 %vm1250_vm1, %v1249_v0 }
  0x1f   :  { %1131 = vmatprep.mubr.msk.bf16.mxu1 %vm1250_vm1, %v1249_v0  ;;  %1135 = vmatprep.subr.bf16.mxu0 %v1249_v0 }
  0x20   :  { %1141 = vmatprep.subr.bf16.mxu1 %v1249_v0 }
  0x24   :  { %1126 = vmatmul.mubr.msk.bf16.vlgmr.msra.gmra.mxu0 %vm87_vm0, %v37_v55 }
  0x25   :  { %1132 = vmatmul.mubr.msk.bf16.vlgmr.msra.gmra.mxu1 %vm87_vm0, %v38_v56  ;;  %1137 = vmatprep.mubr.msk.bf16.mxu0 %vm1250_vm1, %v1249_v0 }
  0x26   :  { %1143 = vmatprep.mubr.msk.bf16.mxu1 %vm1250_vm1, %v1249_v0 }
  0xcc   :  { %v128_v57 = vpop.f32.mrf.mxu0 }
  0xcd   :  { %v1413_v58 = vmul.f32 0.35355338, %v128_v57  ;;  %v175_v59 = vpop.f32.mrf.mxu1 }
  0xce   :  { %v1415_v60 = vmul.f32 0.35355338, %v175_v59  ;;  %v1091_v61 = vpop.f32.mrf.mxu0 }
  0xcf   :  { %v1097_v62 = vpop.f32.mrf.mxu1  ;;  %v481_v63 = vsel %vm480_vm2, %v1413_v58, -inf }
  0xd0   :  { %v488_v1 = vsel %vm480_vm2, %v1415_v60, -inf  ;;  %482 = vmax.xlane.f32.xlu0 %v481_v63  ;;  %v131_v2 = vpop.f32.mrf.mxu0 }
  0xd1   :  { %489 = vmax.xlane.f32.xlu1 %v488_v1  ;;  %v178_v3 = vpop.f32.mrf.mxu1  ;;  %v1421_v4 = vmul.f32 0.35355338, %v131_v2 }
  0xd2   :  { %v1423_v5 = vmul.f32 0.35355338, %v178_v3  ;;  %v1092_v6 = vpop.f32.mrf.mxu0 }
  0xd3   :  { %v1098_v7 = vpop.f32.mrf.mxu1  ;;  %v485_v8 = vsel %vm484_vm3, %v1421_v4, -inf }
  0xd4   :  { %v491_v9 = vsel %vm484_vm3, %v1423_v5, -inf  ;;  %486 = vmax.xlane.f32.xlu0 %v485_v8  ;;  %v222_v10 = vpop.f32.mrf.mxu0 }
  0xd5   :  { %492 = vmax.xlane.f32.xlu1 %v491_v9  ;;  %v269_v11 = vpop.f32.mrf.mxu1  ;;  %v1429_v12 = vmul.f32 0.35355338, %v222_v10 }
  0xd6   :  { %v1431_v13 = vmul.f32 0.35355338, %v269_v11  ;;  %v1103_v14 = vpop.f32.mrf.mxu0 }
  0xd7   :  { %v1109_v15 = vpop.f32.mrf.mxu1  ;;  %v494_v16 = vsel %vm480_vm2, %v1429_v12, -inf }
  0xd8   :  { %495 = vmax.xlane.f32.xlu0 %v494_v16  ;;  %v225_v17 = vpop.f32.mrf.mxu0  ;;  %v500_v20 = vsel %vm480_vm2, %v1431_v13, -inf }
  0xd9   :  { %v272_v18 = vpop.f32.mrf.mxu1  ;;  %v1435_v19 = vmul.f32 0.35355338, %v225_v17 }
  0xda   :  { %v1104_v21 = vpop.f32.mrf.mxu0  ;;  %v1439_v22 = vmul.f32 0.35355338, %v272_v18 }
  0xdb   :  { %v1110_v23 = vpop.f32.mrf.mxu1  ;;  %v497_v24 = vsel %vm484_vm3, %v1435_v19, -inf }
  0xdc   :  { %501 = vmax.xlane.f32.xlu0 %v500_v20  ;;  %498 = vmax.xlane.f32.xlu1 %v497_v24  ;;  %v316_v25 = vpop.f32.mrf.mxu0  ;;  %v503_v31 = vsel %vm484_vm3, %v1439_v22, -inf }
  0xdd   :  { %v363_v26 = vpop.f32.mrf.mxu1  ;;  %v1443_v27 = vmul.f32 0.35355338, %v316_v25 }
  0xde   :  { %v1445_v28 = vmul.f32 0.35355338, %v363_v26  ;;  %v1115_v29 = vpop.f32.mrf.mxu0 }
  0xdf   :  { %v1121_v30 = vpop.f32.mrf.mxu1  ;;  %v506_v32 = vsel %vm480_vm2, %v1443_v27, -inf }
  0xe0   :  { %504 = vmax.xlane.f32.xlu1 %v503_v31  ;;  %507 = vmax.xlane.f32.xlu0 %v506_v32  ;;  %v319_v33 = vpop.f32.mrf.mxu0  ;;  %v512_v36 = vsel %vm480_vm2, %v1445_v28, -inf }
  0xe1   :  { %v366_v34 = vpop.f32.mrf.mxu1  ;;  %v1451_v35 = vmul.f32 0.35355338, %v319_v33 }
  0xe2   :  { %v1116_v37 = vpop.f32.mrf.mxu0  ;;  %v1455_v38 = vmul.f32 0.35355338, %v366_v34 }
  0xe3   :  { %v1122_v39 = vpop.f32.mrf.mxu1  ;;  %v509_v40 = vsel %vm484_vm3, %v1451_v35, -inf }
  0xe4   :  { %513 = vmax.xlane.f32.xlu0 %v512_v36  ;;  %510 = vmax.xlane.f32.xlu1 %v509_v40  ;;  %v410_v41 = vpop.f32.mrf.mxu0  ;;  %v515_v47 = vsel %vm484_vm3, %v1455_v38, -inf }
  0xe5   :  { %v457_v42 = vpop.f32.mrf.mxu1  ;;  %v1459_v43 = vmul.f32 0.35355338, %v410_v41 }
  0xe6   :  { %v1461_v44 = vmul.f32 0.35355338, %v457_v42  ;;  %v1127_v45 = vpop.f32.mrf.mxu0 }
  0xe7   :  { %v1133_v46 = vpop.f32.mrf.mxu1  ;;  %v518_v48 = vsel %vm480_vm2, %v1459_v43, -inf }
  0xe8   :  { %516 = vmax.xlane.f32.xlu1 %v515_v47  ;;  %519 = vmax.xlane.f32.xlu0 %v518_v48  ;;  %v413_v49 = vpop.f32.mrf.mxu0  ;;  %v524_v52 = vsel %vm480_vm2, %v1461_v44, -inf }
  0xe9   :  { %v460_v50 = vpop.f32.mrf.mxu1  ;;  %v1467_v51 = vmul.f32 0.35355338, %v413_v49 }
  0xea   :  { %v1128_v53 = vpop.f32.mrf.mxu0  ;;  %v1471_v54 = vmul.f32 0.35355338, %v460_v50 }
  0xeb   :  { %v1134_v55 = vpop.f32.mrf.mxu1  ;;  %v521_v56 = vsel %vm484_vm3, %v1467_v51, -inf }
  0xec   :  { %525 = vmax.xlane.f32.xlu0 %v524_v52  ;;  %522 = vmax.xlane.f32.xlu1 %v521_v56  ;;  %v527_v57 = vsel %vm484_vm3, %v1471_v54, -inf }
  0xf0   :  { %528 = vmax.xlane.f32.xlu1 %v527_v57 }
 0x159   :  { %v483_v59 = vpop.xlane.xlu0 %482 }
 0x15a   :  { %v490_v61 = vpop.xlane.xlu1 %489  ;;  %v530_v62 = vsub.f32 %v1413_v58, %v483_v59 }
 0x15b   :  { %v532_v63 = vsub.f32 %v1415_v60, %v490_v61 }
 0x15c   :  { %v546_v1 = vmul.f32 1.442695, %v530_v62 }
 0x15d   :  { %v550_v2 = vmul.f32 1.442695, %v532_v63  ;;  %v487_v3 = vpop.xlane.xlu0 %486 }
 0x15e   :  { %1185 = vpow2.f32 %v546_v1  ;;  %v493_v6 = vpop.xlane.xlu1 %492  ;;  %v531_v7 = vsub.f32 %v1421_v4, %v487_v3 }
 0x15f   :  { %v533_v8 = vsub.f32 %v1423_v5, %v493_v6  ;;  %1187 = vpow2.f32 %v550_v2 }
 0x160   :  { %v548_v9 = vmul.f32 1.442695, %v531_v7 }
 0x161   :  { %v552_v10 = vmul.f32 1.442695, %v533_v8  ;;  %v496_v11 = vpop.xlane.xlu0 %495 }
 0x162   :  { %1189 = vpow2.f32 %v548_v9  ;;  %v534_v14 = vsub.f32 %v1429_v12, %v496_v11 }
 0x163   :  { %1191 = vpow2.f32 %v552_v10 }
 0x164   :  { %v554_v58 = vmul.f32 1.442695, %v534_v14 }
 0x165   :  { %v502_v15 = vpop.xlane.xlu0 %501  ;;  %v499_v60 = vpop.xlane.xlu1 %498 }
 0x166   :  { %1193 = vpow2.f32 %v554_v58  ;;  %v536_v16 = vsub.f32 %v1431_v13, %v502_v15  ;;  %v535_v17 = vsub.f32 %v1435_v19, %v499_v60  ;;  %v63_v15 = vld [vmem:[%s1713_s2] sm:$0xff]  ;;  %v64_v60 = vld [vmem:[%s1713_s2 + $0x8] sm:$0xff] }
 0x168   :  { %v558_v18 = vmul.f32 1.442695, %v536_v16  ;;  %v556_v4 = vmul.f32 1.442695, %v535_v17  ;;  %v65_v16 = vld [vmem:[%s1713_s2 + $0x10] sm:$0xff]  ;;  %v79_v17 = vpack.c.bf16 %v64_v60, %v63_v15 }
 0x169   :  { %v505_v20 = vpop.xlane.xlu1 %504  ;;  %v508_v5 = vpop.xlane.xlu0 %507 }
 0x16a   :  { %1195 = vpow2.f32 %v558_v18  ;;  %v537_v21 = vsub.f32 %v1439_v22, %v505_v20  ;;  %v538_v23 = vsub.f32 %v1443_v27, %v508_v5  ;;  %v66_v18 = vld [vmem:[%s1713_s2 + $0x18] sm:$0xff]  ;;  %1136 = vmatpush3.bf16.msra.mxu0 %v79_v17  ;;  %v75_v17 = vld [vmem:[%s1713_s2 + $0x60] sm:$0xff] }
 0x16b   :  { %v1486_v24 = vpop.eup %1185  ;;  %1197 = vpow2.f32 %v556_v4  ;;  %v80_v20 = vpack.c.bf16 %v66_v18, %v65_v16  ;;  %1147 = vmatprep.subr.bf16.mxu0 %v1249_v0 }
 0x16c   :  { %v560_v12 = vmul.f32 1.442695, %v537_v21  ;;  %v562_v25 = vmul.f32 1.442695, %v538_v23  ;;  %v578_v26 = vsel %vm480_vm2, %v1486_v24, 0.0  ;;  %v1490_v13 = vpop.eup %1187 }
 0x16d   :  { %v514_v19 = vpop.xlane.xlu0 %513  ;;  %v511_v29 = vpop.xlane.xlu1 %510  ;;  %579 = vadd.xlane.f32.xlu0 %v578_v26  ;;  %v584_v33 = vsel %vm480_vm2, %v1490_v13, 0.0  ;;  %1142 = vmatpush3.bf16.msra.mxu1 %v80_v20 }
 0x16e   :  { %1199 = vpow2.f32 %v560_v12  ;;  %v540_v30 = vsub.f32 %v1445_v28, %v514_v19  ;;  %v539_v22 = vsub.f32 %v1451_v35, %v511_v29  ;;  %1153 = vmatprep.subr.bf16.mxu1 %v1249_v0 }
 0x16f   :  { %v1494_v31 = vpop.eup %1189  ;;  %1201 = vpow2.f32 %v562_v25 }
 0x170   :  { %v566_v27 = vmul.f32 1.442695, %v540_v30  ;;  %v564_v32 = vmul.f32 1.442695, %v539_v22  ;;  %v581_v34 = vsel %vm484_vm3, %v1494_v31, 0.0  ;;  %v1500_v36 = vpop.eup %1191 }
 0x171   :  { %v517_v37 = vpop.xlane.xlu1 %516  ;;  %585 = vadd.xlane.f32.xlu0 %v584_v33  ;;  %v520_v39 = vpop.xlane.xlu0 %519  ;;  %582 = vadd.xlane.f32.xlu1 %v581_v34  ;;  %v587_v46 = vsel %vm484_vm3, %v1500_v36, 0.0  ;;  %v68_v33 = vld [vmem:[%s1713_s2 + $0x28] sm:$0xff] }
 0x172   :  { %1203 = vpow2.f32 %v566_v27  ;;  %v541_v28 = vsub.f32 %v1455_v38, %v517_v37  ;;  %v542_v35 = vsub.f32 %v1459_v43, %v520_v39 }
 0x173   :  { %v1504_v40 = vpop.eup %1193  ;;  %1205 = vpow2.f32 %v564_v32  ;;  %v67_v32 = vld [vmem:[%s1713_s2 + $0x20] sm:$0xff] }
 0x174   :  { %v568_v41 = vmul.f32 1.442695, %v541_v28  ;;  %v570_v42 = vmul.f32 1.442695, %v542_v35  ;;  %v590_v45 = vsel %vm480_vm2, %v1504_v40, 0.0 }
 0x175   :  { %591 = vadd.xlane.f32.xlu0 %v590_v45  ;;  %v526_v47 = vpop.xlane.xlu0 %525  ;;  %588 = vadd.xlane.f32.xlu1 %v587_v46  ;;  %v523_v48 = vpop.xlane.xlu1 %522  ;;  %v69_v46 = vld [vmem:[%s1713_s2 + $0x30] sm:$0xff] }
 0x176   :  { %1207 = vpow2.f32 %v568_v41  ;;  %v544_v38 = vsub.f32 %v1461_v44, %v526_v47  ;;  %v543_v43 = vsub.f32 %v1467_v51, %v523_v48  ;;  %v70_v47 = vld [vmem:[%s1713_s2 + $0x38] sm:$0xff] }
 0x177   :  { %v1512_v49 = vpop.eup %1195  ;;  %1209 = vpow2.f32 %v570_v42  ;;  %v81_v42 = vpack.c.bf16 %v68_v33, %v67_v32 }
 0x178   :  { %v1514_v50 = vpop.eup %1197  ;;  %v574_v52 = vmul.f32 1.442695, %v544_v38  ;;  %v572_v53 = vmul.f32 1.442695, %v543_v43  ;;  %v596_v55 = vsel %vm480_vm2, %v1512_v49, 0.0 }
 0x179   :  { %597 = vadd.xlane.f32.xlu0 %v596_v55  ;;  %v593_v56 = vsel %vm484_vm3, %v1514_v50, 0.0  ;;  %v529_v57 = vpop.xlane.xlu1 %528 }
 0x17a   :  { %1211 = vpow2.f32 %v574_v52  ;;  %594 = vadd.xlane.f32.xlu1 %v593_v56  ;;  %v545_v44 = vsub.f32 %v1471_v54, %v529_v57  ;;  %v71_v56 = vld [vmem:[%s1713_s2 + $0x40] sm:$0xff] }
 0x17b   :  { %v1521_v51 = vpop.eup %1199  ;;  %1213 = vpow2.f32 %v572_v53  ;;  %v82_v53 = vpack.c.bf16 %v70_v47, %v69_v46 }
 0x17c   :  { %v1523_v59 = vpop.eup %1201  ;;  %v576_v61 = vmul.f32 1.442695, %v545_v44  ;;  %v599_v62 = vsel %vm484_vm3, %v1521_v51, 0.0 }
 0x17d   :  { %v602_v63 = vsel %vm480_vm2, %v1523_v59, 0.0 }
 0x17e   :  { %1215 = vpow2.f32 %v576_v61  ;;  %603 = vadd.xlane.f32.xlu0 %v602_v63  ;;  %600 = vadd.xlane.f32.xlu1 %v599_v62 }
 0x17f   :  { %v1529_v1 = vpop.eup %1203 }
 0x180   :  { %v1531_v2 = vpop.eup %1205  ;;  %v608_v54 = vsel %vm480_vm2, %v1529_v1, 0.0 }
 0x181   :  { %v605_v3 = vsel %vm484_vm3, %v1531_v2, 0.0 }
 0x182   :  { %609 = vadd.xlane.f32.xlu0 %v608_v54  ;;  %606 = vadd.xlane.f32.xlu1 %v605_v3 }
 0x183   :  { %v1537_v6 = vpop.eup %1207 }
 0x184   :  { %v1539_v7 = vpop.eup %1209  ;;  %v611_v8 = vsel %vm484_vm3, %v1537_v6, 0.0 }
 0x185   :  { %v614_v9 = vsel %vm480_vm2, %v1539_v7, 0.0 }
 0x186   :  { %615 = vadd.xlane.f32.xlu0 %v614_v9  ;;  %612 = vadd.xlane.f32.xlu1 %v611_v8  ;;  %v73_v8 = vld [vmem:[%s1713_s2 + $0x50] sm:$0xff] }
 0x187   :  { %v1545_v10 = vpop.eup %1211 }
 0x188   :  { %v1547_v11 = vpop.eup %1213  ;;  %v620_v14 = vsel %vm480_vm2, %v1545_v10, 0.0 }
 0x189   :  { %v617_v58 = vsel %vm484_vm3, %v1547_v11, 0.0 }
 0x18a   :  { %621 = vadd.xlane.f32.xlu0 %v620_v14  ;;  %618 = vadd.xlane.f32.xlu1 %v617_v58 }
 0x18b   :  { %v1565_v4 = vpop.eup %1215 }
 0x18c   :  { %v623_v5 = vsel %vm484_vm3, %v1565_v4, 0.0 }
 0x18e   :  { %624 = vadd.xlane.f32.xlu1 %v623_v5 }
 0x1f6   :  { %v580_v21 = vpop.xlane.xlu0 %579 }
 0x1f7   :  { %1217 = vrcp.f32 %v580_v21 }
 0x1fa   :  { %v586_v23 = vpop.xlane.xlu0 %585  ;;  %v583_v12 = vpop.xlane.xlu1 %582 }
 0x1fb   :  { %1219 = vrcp.f32 %v583_v12  ;;  %v77_v12 = vld [vmem:[%s1713_s2 + $0x70] sm:$0xff] }
 0x1fc   :  { %1221 = vrcp.f32 %v586_v23 }
 0x1fe   :  { %v592_v25 = vpop.xlane.xlu0 %591  ;;  %v589_v26 = vpop.xlane.xlu1 %588 }
 0x1ff   :  { %1223 = vrcp.f32 %v589_v26 }
 0x200   :  { %1225 = vrcp.f32 %v592_v25  ;;  %v78_v25 = vld [vmem:[%s1713_s2 + $0x78] sm:$0xff] }
 0x202   :  { %v598_v19 = vpop.xlane.xlu0 %597 }
 0x203   :  { %v595_v29 = vpop.xlane.xlu1 %594 }
 0x204   :  { %1227 = vrcp.f32 %v595_v29  ;;  %v1218_v30 = vpop.eup %1217  ;;  %v86_v29 = vpack.c.bf16 %v78_v25, %v77_v12 }
 0x205   :  { %1229 = vrcp.f32 %v598_v19  ;;  %v642_v37 = vmul.f32 %v1218_v30, %v1486_v24 }
 0x207   :  { %v604_v22 = vpop.xlane.xlu0 %603  ;;  %v601_v27 = vpop.xlane.xlu1 %600 }
 0x208   :  { %v1220_v34 = vpop.eup %1219  ;;  %1231 = vrcp.f32 %v601_v27 }
 0x209   :  { %v643_v39 = vmul.f32 %v1220_v34, %v1494_v31  ;;  %v1222_v28 = vpop.eup %1221  ;;  %1233 = vrcp.f32 %v604_v22 }
 0x20a   :  { %v644_v24 = vmul.f32 %v1222_v28, %v1490_v13  ;;  %v72_v13 = vld [vmem:[%s1713_s2 + $0x48] sm:$0xff] }
 0x20b   :  { %v610_v35 = vpop.xlane.xlu0 %609  ;;  %v607_v41 = vpop.xlane.xlu1 %606  ;;  %v658_v45 = vpack.c.bf16 %v643_v39, %v642_v37  ;;  %v83_v63 = vpack.c.bf16 %v72_v13, %v71_v56 }
 0x20c   :  { %v1224_v48 = vpop.eup %1223  ;;  %1235 = vrcp.f32 %v607_v41 }
 0x20d   :  { %1138 = vmatmul.mubr.msk.bf16.vlgmr.msra.gmra.mxu0 %vm480_vm2, %v658_v45  ;;  %v645_v31 = vmul.f32 %v1224_v48, %v1500_v36  ;;  %v1226_v38 = vpop.eup %1225  ;;  %1237 = vrcp.f32 %v610_v35 }
 0x20e   :  { %1148 = vmatpush3.bf16.msra.mxu0 %v81_v42  ;;  %1149 = vmatprep.mubr.msk.bf16.mxu0 %vm1250_vm1, %v1249_v0  ;;  %v646_v57 = vmul.f32 %v1226_v38, %v1504_v40  ;;  %v74_v40 = vld [vmem:[%s1713_s2 + $0x58] sm:$0xff] }
 0x20f   :  { %v616_v43 = vpop.xlane.xlu0 %615  ;;  %v613_v52 = vpop.xlane.xlu1 %612  ;;  %v659_v55 = vpack.c.bf16 %v645_v31, %v644_v24  ;;  %1159 = vmatprep.subr.bf16.mxu0 %v1249_v0  ;;  %v84_v60 = vpack.c.bf16 %v74_v40, %v73_v8 }
 0x210   :  { %1239 = vrcp.f32 %v613_v52 }
 0x211   :  { %v1228_v36 = vpop.eup %1227  ;;  %1144 = vmatmul.mubr.msk.bf16.vlgmr.msra.gmra.mxu1 %vm480_vm2, %v659_v55  ;;  %1241 = vrcp.f32 %v616_v43 }
 0x212   :  { %v647_v44 = vmul.f32 %v1228_v36, %v1514_v50  ;;  %1154 = vmatpush3.bf16.msra.mxu1 %v82_v53  ;;  %1155 = vmatprep.mubr.msk.bf16.mxu1 %vm1250_vm1, %v1249_v0  ;;  %v1230_v54 = vpop.eup %1229 }
 0x213   :  { %v622_v61 = vpop.xlane.xlu0 %621  ;;  %v619_v62 = vpop.xlane.xlu1 %618  ;;  %1165 = vmatprep.subr.bf16.mxu1 %v1249_v0  ;;  %v648_v14 = vmul.f32 %v1230_v54, %v1512_v49  ;;  %v76_v49 = vld [vmem:[%s1713_s2 + $0x68] sm:$0xff] }
 0x214   :  { %v660_v3 = vpack.c.bf16 %v647_v44, %v646_v57  ;;  %1243 = vrcp.f32 %v619_v62  ;;  %v85_v21 = vpack.c.bf16 %v76_v49, %v75_v17 }
 0x215   :  { %v1232_v50 = vpop.eup %1231  ;;  %1245 = vrcp.f32 %v622_v61 }
 0x216   :  { %1150 = vmatmul.mubr.msk.bf16.vlgmr.msra.gmra.mxu0 %vm480_vm2, %v660_v3  ;;  %v649_v58 = vmul.f32 %v1232_v50, %v1521_v51  ;;  %v1234_v15 = vpop.eup %1233 }
 0x217   :  { %v625_v9 = vpop.xlane.xlu1 %624  ;;  %1160 = vmatpush3.bf16.msra.mxu0 %v83_v63  ;;  %1161 = vmatprep.mubr.msk.bf16.mxu0 %vm1250_vm1, %v1249_v0  ;;  %v650_v51 = vmul.f32 %v1234_v15, %v1523_v59 }
 0x218   :  { %1247 = vrcp.f32 %v625_v9  ;;  %1171 = vmatprep.subr.bf16.mxu0 %v1249_v0  ;;  %v661_v16 = vpack.c.bf16 %v649_v58, %v648_v14 }
 0x219   :  { %v1236_v18 = vpop.eup %1235 }
 0x21a   :  { %1156 = vmatmul.mubr.msk.bf16.vlgmr.msra.gmra.mxu1 %vm480_vm2, %v661_v16  ;;  %v651_v20 = vmul.f32 %v1236_v18, %v1531_v2  ;;  %v1238_v5 = vpop.eup %1237 }
 0x21b   :  { %1166 = vmatpush3.bf16.msra.mxu1 %v84_v60  ;;  %1167 = vmatprep.mubr.msk.bf16.mxu1 %vm1250_vm1, %v1249_v0  ;;  %v652_v2 = vmul.f32 %v1238_v5, %v1529_v1 }
 0x21c   :  { %v662_v23 = vpack.c.bf16 %v651_v20, %v650_v51  ;;  %1177 = vmatprep.subr.bf16.mxu1 %v1249_v0 }
 0x21d   :  { %v1240_v59 = vpop.eup %1239 }
 0x21e   :  { %1162 = vmatmul.mubr.msk.bf16.vlgmr.msra.gmra.mxu0 %vm480_vm2, %v662_v23  ;;  %v653_v26 = vmul.f32 %v1240_v59, %v1537_v6  ;;  %v1242_v19 = vpop.eup %1241 }
 0x21f   :  { %1172 = vmatpush3.bf16.msra.mxu0 %v85_v21  ;;  %1173 = vmatprep.mubr.msk.bf16.mxu0 %vm1250_vm1, %v1249_v0  ;;  %v654_v32 = vmul.f32 %v1242_v19, %v1539_v7 }
 0x220   :  { %v663_v30 = vpack.c.bf16 %v653_v26, %v652_v2 }
 0x221   :  { %v1244_v22 = vpop.eup %1243 }
 0x222   :  { %v1246_v27 = vpop.eup %1245  ;;  %1168 = vmatmul.mubr.msk.bf16.vlgmr.msra.gmra.mxu1 %vm480_vm2, %v663_v30  ;;  %v655_v33 = vmul.f32 %v1244_v22, %v1547_v11 }
 0x223   :  { %1178 = vmatpush3.bf16.msra.mxu1 %v86_v29  ;;  %1179 = vmatprep.mubr.msk.bf16.mxu1 %vm1250_vm1, %v1249_v0  ;;  %v656_v34 = vmul.f32 %v1246_v27, %v1545_v10 }
 0x224   :  { %v664_v6 = vpack.c.bf16 %v655_v33, %v654_v32 }
 0x225   :  { %v1248_v1 = vpop.eup %1247 }
 0x226   :  { %v657_v37 = vmul.f32 %v1248_v1, %v1565_v4  ;;  %1174 = vmatmul.mubr.msk.bf16.vlgmr.msra.gmra.mxu0 %vm480_vm2, %v664_v6 }
 0x228   :  { %v665_v39 = vpack.c.bf16 %v657_v37, %v656_v34 }
 0x22a   :  { %1180 = vmatmul.mubr.msk.bf16.vlgmr.msra.gmra.mxu1 %vm480_vm2, %v665_v39 }
 0x2cd   :  { %v703_v28 = vpop.f32.mrf.mxu0 }
 0x2ce   :  { %1018 = vst.msk [vmem:[%s1714_s3] sm:$0xff] %vm87_vm0, %v703_v28 }
 0x2cf   :  { %v1139_v7 = vpop.f32.mrf.mxu0 }
 0x2d1   :  { %v706_v0 = vpop.f32.mrf.mxu0  ;;  %v747_v11 = vpop.f32.mrf.mxu1 }
 0x2d2   :  { %1020 = vst.msk [vmem:[%s1714_s3 + $0x8] sm:$0x7f] %vm1019_vm4, %v706_v0 }
 0x2d3   :  { %1021 = vst.msk [vmem:[%s1714_s3 + $0x10] sm:$0xff] %vm87_vm0, %v747_v11  ;;  %v1140_v10 = vpop.f32.mrf.mxu0  ;;  %v1145_v4 = vpop.f32.mrf.mxu1 }
 0x2d5   :  { %v750_v35 = vpop.f32.mrf.mxu1 }
 0x2d6   :  { %v791_v41 = vpop.f32.mrf.mxu0  ;;  %1022 = vst.msk [vmem:[%s1714_s3 + $0x18] sm:$0x7f] %vm1019_vm4, %v750_v35 }
 0x2d7   :  { %1023 = vst.msk [vmem:[%s1714_s3 + $0x20] sm:$0xff] %vm87_vm0, %v791_v41  ;;  %v1146_v42 = vpop.f32.mrf.mxu1 }
 0x2d8   :  { %v1151_v45 = vpop.f32.mrf.mxu0 }
 0x2da   :  { %v794_v46 = vpop.f32.mrf.mxu0  ;;  %v835_v47 = vpop.f32.mrf.mxu1 }
 0x2db   :  { %1024 = vst.msk [vmem:[%s1714_s3 + $0x28] sm:$0x7f] %vm1019_vm4, %v794_v46 }
 0x2dc   :  { %1025 = vst.msk [vmem:[%s1714_s3 + $0x30] sm:$0xff] %vm87_vm0, %v835_v47  ;;  %v1152_v48 = vpop.f32.mrf.mxu0  ;;  %v1157_v24 = vpop.f32.mrf.mxu1 }
 0x2de   :  { %v838_v31 = vpop.f32.mrf.mxu1  ;;  %v879_v38 = vpop.f32.mrf.mxu0 }
 0x2df   :  { %1026 = vst.msk [vmem:[%s1714_s3 + $0x38] sm:$0x7f] %vm1019_vm4, %v838_v31 }
 0x2e0   :  { %1027 = vst.msk [vmem:[%s1714_s3 + $0x40] sm:$0xff] %vm87_vm0, %v879_v38  ;;  %v1158_v43 = vpop.f32.mrf.mxu1  ;;  %v1163_v52 = vpop.f32.mrf.mxu0 }
 0x2e2   :  { %v882_v53 = vpop.f32.mrf.mxu0  ;;  %v923_v55 = vpop.f32.mrf.mxu1 }
 0x2e3   :  { %1028 = vst.msk [vmem:[%s1714_s3 + $0x48] sm:$0x7f] %vm1019_vm4, %v882_v53 }
 0x2e4   :  { %1029 = vst.msk [vmem:[%s1714_s3 + $0x50] sm:$0xff] %vm87_vm0, %v923_v55  ;;  %v1164_v56 = vpop.f32.mrf.mxu0  ;;  %v1169_v13 = vpop.f32.mrf.mxu1 }
 0x2e6   :  { %v926_v36 = vpop.f32.mrf.mxu1  ;;  %v967_v57 = vpop.f32.mrf.mxu0 }
 0x2e7   :  { %1030 = vst.msk [vmem:[%s1714_s3 + $0x58] sm:$0x7f] %vm1019_vm4, %v926_v36 }
 0x2e8   :  { %1031 = vst.msk [vmem:[%s1714_s3 + $0x60] sm:$0xff] %vm87_vm0, %v967_v57  ;;  %v1170_v44 = vpop.f32.mrf.mxu1  ;;  %v1175_v61 = vpop.f32.mrf.mxu0 }
 0x2ea   :  { %v970_v62 = vpop.f32.mrf.mxu0  ;;  %v1011_v63 = vpop.f32.mrf.mxu1 }
 0x2eb   :  { %1032 = vst.msk [vmem:[%s1714_s3 + $0x68] sm:$0x7f] %vm1019_vm4, %v970_v62 }
 0x2ec   :  { %1033 = vst.msk [vmem:[%s1714_s3 + $0x70] sm:$0xff] %vm87_vm0, %v1011_v63  ;;  %v1176_v54 = vpop.f32.mrf.mxu0  ;;  %v1181_v3 = vpop.f32.mrf.mxu1 }
 0x2ee   :  { %v1014_v8 = vpop.f32.mrf.mxu1 }
 0x2ef   :  { %1034 = vst.msk [vmem:[%s1714_s3 + $0x78] sm:$0x7f] %vm1019_vm4, %v1014_v8 }
 0x2f0   :  { %v1182_v40 = vpop.f32.mrf.mxu1 }

// kernel: myformer_forward.15
= control target key start
LH: loop header
LB: loop body
LE: loop exit
PB: predicated region body
PF: predicated region fallthrough
CT: control target
= control target key end

     0   :  { %vm81_vm0 = vcmask 261120   ;;  %vm373_vm1 = vcmask 523264   ;;  %s806_s2 = inlined_call_operand.vmem [shape: bf16[32,32], index: 2, kind: input, shape index: {}]   ;;  %s807_s12 = inlined_call_operand.vmem [shape: f32[1,32], index: 12, kind: input, shape index: {}]   ;;  %s808_s13 = inlined_call_operand.vmem [shape: f32[1,32], index: 13, kind: input, shape index: {}]   ;;  %s809_s1 = inlined_call_operand.vmem [shape: f32[32,32], index: 1, kind: input, shape index: {}]   ;;  %s810_s3 = inlined_call_operand.vmem [shape: f32[1,32], index: 3, kind: input, shape index: {}]   ;;  %s811_s0 = inlined_call_operand.vmem [shape: f32[32,32], index: 0, kind: input, shape index: {}]   ;;  %s812_s4 = inlined_call_operand.vmem [shape: bf16[32,64], index: 4, kind: input, shape index: {}]   ;;  %s813_s8 = inlined_call_operand.vmem [shape: f32[1,32], index: 8, kind: input, shape index: {}]   ;;  %s814_s9 = inlined_call_operand.vmem [shape: f32[1,32], index: 9, kind: input, shape index: {}]   ;;  %s815_s6 = inlined_call_operand.vmem [shape: bf16[64,32], index: 6, kind: input, shape index: {}]   ;;  %s816_s5 = inlined_call_operand.vmem [shape: f32[1,64], index: 5, kind: input, shape index: {}]   ;;  %s817_s7 = inlined_call_operand.vmem [shape: f32[1,32], index: 7, kind: input, shape index: {}]   ;;  %s818_s10 = inlined_call_operand.vmem [shape: f32[1,32], index: 10, kind: input, shape index: {}]   ;;  %s819_s11 = inlined_call_operand.vmem [shape: f32[1,32], index: 11, kind: input, shape index: {}]   ;;  %s820_s14 = inlined_call_operand.vmem [shape: f32[32,32], index: 14, kind: output, shape index: {}]  }
   0x1   :  { %v578_v0 = vld [vmem:[%s806_s2 + $0x8] sm:$0xff]   ;;  %v579_v1 = vld [vmem:[%s806_s2] sm:$0xff]   ;;  %v54_v5 = vld [vmem:[%s809_s1 + $0x10] sm:$0xff] }
   0x2   :  { %550 = vmatprep.subr.bf16.mxu1 %v578_v0  ;;  %v52_v2 = vld [vmem:[%s809_s1] sm:$0xff]  ;;  %v53_v3 = vld [vmem:[%s809_s1 + $0x8] sm:$0xff]  ;;  %v55_v6 = vld [vmem:[%s809_s1 + $0x18] sm:$0xff] }
   0x3   :  { %551 = vmatpush3.bf16.msra.mxu1 %v578_v0  ;;  %v56_v4 = vpack.c.bf16 %v53_v3, %v52_v2  ;;  %v57_v7 = vpack.c.bf16 %v55_v6, %v54_v5  ;;  %v515_v8 = vld [vmem:[%s810_s3] ss:$0 sm:$0xff]  ;;  %v50_v10 = vld [vmem:[%s811_s0 + $0x10] sm:$0xff]  ;;  %v51_v17 = vld [vmem:[%s811_s0 + $0x18] sm:$0xff] }
   0x4   :  { %552 = vmatprep.subr.bf16.mxu1 %v579_v1  ;;  %v48_v13 = vld [vmem:[%s811_s0] sm:$0xff]  ;;  %v49_v22 = vld [vmem:[%s811_s0 + $0x8] sm:$0xff] }
   0x5   :  { %554 = vmatprep.mubr.msk.bf16.mxu1 %vm81_vm0, %v56_v4  ;;  %v580_v49 = vld [vmem:[%s812_s4 + $0x8] sm:$0xff]   ;;  %v581_v50 = vld [vmem:[%s812_s4] sm:$0xff]  }
   0x7   :  { %553 = vmatpush3.bf16.msra.mxu1 %v579_v1  ;;  %v520_v1 = vld [vmem:[%s813_s8] ss:$0 sm:$0xff] }
   0x8   :  { %558 = vmatprep.subr.bf16.mxu1 %v580_v49 }
   0xa   :  { %555 = vmatmul.mubr.msk.bf16.vlgmr.msra.gmra.mxu1 %vm81_vm0, %v57_v7  ;;  %v521_v7 = vld [vmem:[%s814_s9] ss:$0 sm:$0xff] }
   0xb   :  { %559 = vmatpush3.bf16.msra.mxu1 %v580_v49 }
   0xc   :  { %560 = vmatprep.subr.bf16.mxu1 %v581_v50 }
   0xf   :  { %561 = vmatpush3.bf16.msra.mxu1 %v581_v50 }
  0xca   :  { %v556_v9 = vpop.f32.mrf.mxu1 }
  0xcb   :  { %v131_v11 = vadd.f32 %v556_v9, %v515_v8 }
  0xcc   :  { %v122_v12 = vpop.f32.mrf.mxu1 }
  0xcd   :  { %v123_v14 = vadd.f32 %v515_v8, %v122_v12  ;;  %v139_v15 = vadd.f32 %v131_v11, %v50_v10 }
  0xce   :  { %v557_v16 = vpop.f32.mrf.mxu1 }
  0xcf   :  { %v134_v18 = vadd.f32 %v557_v16, %v515_v8  ;;  %v149_v19 = vsel %vm81_vm0, %v139_v15, 0.0  ;;  %v137_v20 = vadd.f32 %v123_v14, %v48_v13 }
  0xd0   :  { %v125_v21 = vpop.f32.mrf.mxu1  ;;  %150 = vadd.xlane.f32.xlu1 %v149_v19  ;;  %v582_v19 = vld [vmem:[%s815_s6 + $0x18] sm:$0xff]  }
  0xd1   :  { %v126_v23 = vadd.f32 %v515_v8, %v125_v21  ;;  %v143_v24 = vsel %vm81_vm0, %v137_v20, 0.0  ;;  %v140_v25 = vadd.f32 %v134_v18, %v51_v17  ;;  %566 = vmatprep.subr.bf16.mxu0 %v582_v19  ;;  %v584_v21 = vld [vmem:[%s815_s6 + $0x8] sm:$0xff]  }
  0xd2   :  { %144 = vadd.xlane.f32.xlu0 %v143_v24  ;;  %567 = vmatpush3.bf16.msra.mxu0 %v582_v19 }
  0xd3   :  { %v152_v26 = vsel %vm81_vm0, %v140_v25, 0.0  ;;  %v138_v27 = vadd.f32 %v126_v23, %v49_v22  ;;  %v585_v22 = vld [vmem:[%s815_s6] sm:$0xff]  }
  0xd4   :  { %153 = vadd.xlane.f32.xlu1 %v152_v26  ;;  %v522_v23 = vld [vmem:[%s816_s5] ss:$0 sm:$0xff] }
  0xd5   :  { %v146_v28 = vsel %vm81_vm0, %v138_v27, 0.0 }
  0xd6   :  { %147 = vadd.xlane.f32.xlu0 %v146_v28 }
 0x159   :  { %v151_v29 = vpop.xlane.xlu1 %150 }
 0x15a   :  { %v158_v30 = vmul.f32 0.03125, %v151_v29 }
 0x15b   :  { %v145_v31 = vpop.xlane.xlu0 %144 }
 0x15c   :  { %v156_v32 = vmul.f32 0.03125, %v145_v31  ;;  %v162_v34 = vsub.f32 %v139_v15, %v158_v30 }
 0x15d   :  { %v154_v33 = vpop.xlane.xlu1 %153 }
 0x15e   :  { %v160_v35 = vsub.f32 %v137_v20, %v156_v32  ;;  %v159_v36 = vmul.f32 0.03125, %v154_v33  ;;  %v166_v43 = vmul.f32 %v162_v34, %v162_v34  ;;  %v583_v20 = vld [vmem:[%s815_s6 + $0x10] sm:$0xff]  }
 0x15f   :  { %v148_v37 = vpop.xlane.xlu0 %147  ;;  %568 = vmatprep.subr.bf16.mxu0 %v583_v20 }
 0x160   :  { %v157_v38 = vmul.f32 0.03125, %v148_v37  ;;  %v164_v39 = vmul.f32 %v160_v35, %v160_v35  ;;  %v163_v40 = vsub.f32 %v140_v25, %v159_v36  ;;  %v174_v45 = vsel %vm81_vm0, %v166_v43, 0.0  ;;  %569 = vmatpush3.bf16.msra.mxu0 %v583_v20 }
 0x161   :  { %570 = vmatprep.subr.bf16.mxu0 %v584_v21 }
 0x162   :  { %v161_v41 = vsub.f32 %v138_v27, %v157_v38  ;;  %v168_v42 = vsel %vm81_vm0, %v164_v39, 0.0  ;;  %v167_v47 = vmul.f32 %v163_v40, %v163_v40 }
 0x163   :  { %169 = vadd.xlane.f32.xlu0 %v168_v42 }
 0x164   :  { %v165_v44 = vmul.f32 %v161_v41, %v161_v41  ;;  %v177_v48 = vsel %vm81_vm0, %v167_v47, 0.0  ;;  %571 = vmatpush3.bf16.msra.mxu0 %v584_v21 }
 0x165   :  { %572 = vmatprep.subr.bf16.mxu0 %v585_v22 }
 0x166   :  { %v171_v46 = vsel %vm81_vm0, %v165_v44, 0.0 }
 0x167   :  { %175 = vadd.xlane.f32.xlu0 %v174_v45  ;;  %172 = vadd.xlane.f32.xlu1 %v171_v46 }
 0x168   :  { %573 = vmatpush3.bf16.msra.mxu0 %v585_v22 }
 0x16b   :  { %178 = vadd.xlane.f32.xlu1 %v177_v48 }
 0x1ec   :  { %v170_v51 = vpop.xlane.xlu0 %169 }
 0x1ed   :  { %v180_v52 = vmul.f32 0.03125, %v170_v51 }
 0x1ef   :  { %v184_v53 = vadd.f32 1e-05, %v180_v52 }
 0x1f0   :  { %v173_v54 = vpop.xlane.xlu1 %172  ;;  %v176_v55 = vpop.xlane.xlu0 %175 }
 0x1f1   :  { %586 = vrsqrt.f32 %v184_v53  ;;  %v181_v56 = vmul.f32 0.03125, %v173_v54  ;;  %v182_v57 = vmul.f32 0.03125, %v176_v55 }
 0x1f3   :  { %v185_v58 = vadd.f32 1e-05, %v181_v56  ;;  %v186_v59 = vadd.f32 1e-05, %v182_v57 }
 0x1f4   :  { %v179_v60 = vpop.xlane.xlu1 %178 }
 0x1f5   :  { %588 = vrsqrt.f32 %v185_v58  ;;  %v183_v61 = vmul.f32 0.03125, %v179_v60 }
 0x1f6   :  { %590 = vrsqrt.f32 %v186_v59 }
 0x1f7   :  { %v187_v62 = vadd.f32 1e-05, %v183_v61 }
 0x1f9   :  { %592 = vrsqrt.f32 %v187_v62 }
 0x1fe   :  { %v587_v63 = vpop.eup %586 }
 0x1ff   :  { %v192_v0 = vmul.f32 %v587_v63, %v160_v35 }
 0x201   :  { %v202_v5 = vmul.f32 %v520_v1, %v192_v0 }
 0x202   :  { %v589_v2 = vpop.eup %588 }
 0x203   :  { %v591_v3 = vpop.eup %590  ;;  %v193_v4 = vmul.f32 %v589_v2, %v161_v41  ;;  %v740_v11 = vadd.f32 %v521_v7, %v202_v5 }
 0x204   :  { %v194_v6 = vmul.f32 %v591_v3, %v162_v34 }
 0x205   :  { %v203_v8 = vmul.f32 %v520_v1, %v193_v4 }
 0x206   :  { %v593_v9 = vpop.eup %592  ;;  %v204_v13 = vmul.f32 %v520_v1, %v194_v6 }
 0x207   :  { %v195_v10 = vmul.f32 %v593_v9, %v163_v40  ;;  %v742_v12 = vadd.f32 %v521_v7, %v203_v8 }
 0x208   :  { %v747_v16 = vadd.f32 %v521_v7, %v204_v13 }
 0x209   :  { %v216_v14 = vpack.c.bf16 %v742_v12, %v740_v11  ;;  %v205_v15 = vmul.f32 %v520_v1, %v195_v10 }
 0x20b   :  { %562 = vmatprep.mubr.msk.bf16.mxu1 %vm81_vm0, %v216_v14  ;;  %v749_v17 = vadd.f32 %v521_v7, %v205_v15  ;;  %v527_v7 = vld [vmem:[%s817_s7] ss:$0 sm:$0xff] }
 0x20d   :  { %v217_v18 = vpack.c.bf16 %v749_v17, %v747_v16 }
 0x20f   :  { %563 = vmatmul.mubr.msk.bf16.vlgmr.msra.gmra.mxu1 %vm81_vm0, %v217_v18 }
 0x2cf   :  { %v564_v24 = vpop.f32.mrf.mxu1 }
 0x2d0   :  { %v290_v25 = vadd.f32 %v564_v24, %v522_v23 }
 0x2d1   :  { %v281_v26 = vpop.f32.mrf.mxu1 }
 0x2d2   :  { %v302_v27 = vmul.f32 0.044715, %v290_v25  ;;  %v282_v28 = vadd.f32 %v522_v23, %v281_v26  ;;  %v298_v63 = vmul.f32 0.5, %v290_v25 }
 0x2d3   :  { %v565_v29 = vpop.f32.mrf.mxu1 }
 0x2d4   :  { %v306_v30 = vmul.f32 %v302_v27, %v290_v25  ;;  %v300_v31 = vmul.f32 0.044715, %v282_v28  ;;  %v293_v32 = vadd.f32 %v565_v29, %v522_v23  ;;  %v296_v60 = vmul.f32 0.5, %v282_v28 }
 0x2d5   :  { %v284_v33 = vpop.f32.mrf.mxu1 }
 0x2d6   :  { %v310_v34 = vmul.f32 %v306_v30, %v290_v25  ;;  %v304_v35 = vmul.f32 %v300_v31, %v282_v28  ;;  %v303_v36 = vmul.f32 0.044715, %v293_v32  ;;  %v285_v37 = vadd.f32 %v522_v23, %v284_v33 }
 0x2d7   :  { %v299_v58 = vmul.f32 0.5, %v293_v32 }
 0x2d8   :  { %v314_v38 = vadd.f32 %v310_v34, %v290_v25  ;;  %v307_v39 = vmul.f32 %v303_v36, %v293_v32  ;;  %v301_v40 = vmul.f32 0.044715, %v285_v37  ;;  %v308_v41 = vmul.f32 %v304_v35, %v282_v28 }
 0x2d9   :  { %v297_v61 = vmul.f32 0.5, %v285_v37 }
 0x2da   :  { %v318_v42 = vmul.f32 0.7978846, %v314_v38  ;;  %v311_v43 = vmul.f32 %v307_v39, %v293_v32  ;;  %v305_v44 = vmul.f32 %v301_v40, %v285_v37  ;;  %v312_v45 = vadd.f32 %v308_v41, %v282_v28 }
 0x2dc   :  { %v315_v46 = vadd.f32 %v311_v43, %v293_v32  ;;  %v309_v47 = vmul.f32 %v305_v44, %v285_v37  ;;  %v316_v48 = vmul.f32 0.7978846, %v312_v45  ;;  %594 = vtanh.f32 %v318_v42 }
 0x2de   :  { %v319_v49 = vmul.f32 0.7978846, %v315_v46  ;;  %v313_v50 = vadd.f32 %v309_v47, %v285_v37  ;;  %596 = vtanh.f32 %v316_v48 }
 0x2e0   :  { %598 = vtanh.f32 %v319_v49  ;;  %v317_v51 = vmul.f32 0.7978846, %v313_v50 }
 0x2e2   :  { %600 = vtanh.f32 %v317_v51 }
 0x2e9   :  { %v595_v52 = vpop.eup %594 }
 0x2ea   :  { %v326_v59 = vadd.f32 1.0, %v595_v52 }
 0x2eb   :  { %v597_v53 = vpop.eup %596 }
 0x2ec   :  { %v324_v55 = vadd.f32 1.0, %v597_v53  ;;  %v330_v3 = vmul.f32 %v326_v59, %v298_v63 }
 0x2ed   :  { %v599_v54 = vpop.eup %598 }
 0x2ee   :  { %v327_v56 = vadd.f32 1.0, %v599_v54  ;;  %v328_v1 = vmul.f32 %v324_v55, %v296_v60 }
 0x2ef   :  { %v601_v57 = vpop.eup %600 }
 0x2f0   :  { %v325_v62 = vadd.f32 1.0, %v601_v57  ;;  %v331_v0 = vmul.f32 %v327_v56, %v299_v58  ;;  %v534_v56 = vld [vmem:[%s818_s10] ss:$0 sm:$0xff] }
 0x2f1   :  { %v535_v58 = vld [vmem:[%s819_s11] ss:$0 sm:$0xff] }
 0x2f2   :  { %v329_v2 = vmul.f32 %v325_v62, %v297_v61  ;;  %v333_v5 = vpack.c.bf16 %v331_v0, %v330_v3 }
 0x2f4   :  { %v332_v4 = vpack.c.bf16 %v329_v2, %v328_v1 }
 0x2f6   :  { %574 = vmatprep.mubr.msk.bf16.mxu0 %vm373_vm1, %v332_v4 }
 0x2f7   :  { %575 = vmatmul.mubr.msk.bf16.vlgmr.msra.gmra.mxu0 %vm373_vm1, %v333_v5 }
 0x3b7   :  { %v576_v6 = vpop.f32.mrf.mxu0 }
 0x3b8   :  { %v423_v9 = vadd.f32 %v576_v6, %v527_v7 }
 0x3b9   :  { %v414_v8 = vpop.f32.mrf.mxu0 }
 0x3ba   :  { %v415_v10 = vadd.f32 %v527_v7, %v414_v8  ;;  %v431_v21 = vadd.f32 %v423_v9, %v747_v16 }
 0x3bb   :  { %v577_v13 = vpop.f32.mrf.mxu0 }
 0x3bc   :  { %v429_v14 = vadd.f32 %v415_v10, %v740_v11  ;;  %v426_v18 = vadd.f32 %v577_v13, %v527_v7  ;;  %v441_v24 = vsel %vm81_vm0, %v431_v21, 0.0 }
 0x3bd   :  { %v417_v15 = vpop.f32.mrf.mxu0 }
 0x3be   :  { %v418_v19 = vadd.f32 %v527_v7, %v417_v15  ;;  %v435_v20 = vsel %vm81_vm0, %v429_v14, 0.0  ;;  %v432_v25 = vadd.f32 %v426_v18, %v749_v17 }
 0x3bf   :  { %436 = vadd.xlane.f32.xlu0 %v435_v20 }
 0x3c0   :  { %v430_v22 = vadd.f32 %v418_v19, %v742_v12  ;;  %v444_v11 = vsel %vm81_vm0, %v432_v25, 0.0 }
 0x3c2   :  { %v438_v23 = vsel %vm81_vm0, %v430_v22, 0.0 }
 0x3c3   :  { %439 = vadd.xlane.f32.xlu1 %v438_v23  ;;  %442 = vadd.xlane.f32.xlu0 %v441_v24 }
 0x3c7   :  { %445 = vadd.xlane.f32.xlu1 %v444_v11 }
 0x448   :  { %v437_v26 = vpop.xlane.xlu0 %436 }
 0x449   :  { %v447_v27 = vmul.f32 0.03125, %v437_v26 }
 0x44b   :  { %v451_v28 = vsub.f32 %v429_v14, %v447_v27 }
 0x44c   :  { %v440_v29 = vpop.xlane.xlu1 %439  ;;  %v443_v30 = vpop.xlane.xlu0 %442 }
 0x44d   :  { %v448_v16 = vmul.f32 0.03125, %v440_v29  ;;  %v449_v31 = vmul.f32 0.03125, %v443_v30  ;;  %v455_v32 = vmul.f32 %v451_v28, %v451_v28 }
 0x44f   :  { %v452_v12 = vsub.f32 %v430_v22, %v448_v16  ;;  %v453_v33 = vsub.f32 %v431_v21, %v449_v31  ;;  %v459_v34 = vsel %vm81_vm0, %v455_v32, 0.0 }
 0x450   :  { %v446_v35 = vpop.xlane.xlu1 %445  ;;  %460 = vadd.xlane.f32.xlu0 %v459_v34 }
 0x451   :  { %v450_v17 = vmul.f32 0.03125, %v446_v35  ;;  %v456_v36 = vmul.f32 %v452_v12, %v452_v12  ;;  %v457_v37 = vmul.f32 %v453_v33, %v453_v33 }
 0x453   :  { %v454_v38 = vsub.f32 %v432_v25, %v450_v17  ;;  %v462_v39 = vsel %vm81_vm0, %v456_v36, 0.0  ;;  %v465_v40 = vsel %vm81_vm0, %v457_v37, 0.0 }
 0x454   :  { %463 = vadd.xlane.f32.xlu1 %v462_v39  ;;  %466 = vadd.xlane.f32.xlu0 %v465_v40 }
 0x455   :  { %v458_v41 = vmul.f32 %v454_v38, %v454_v38 }
 0x457   :  { %v468_v42 = vsel %vm81_vm0, %v458_v41, 0.0 }
 0x458   :  { %469 = vadd.xlane.f32.xlu1 %v468_v42 }
 0x4d9   :  { %v461_v43 = vpop.xlane.xlu0 %460 }
 0x4da   :  { %v471_v44 = vmul.f32 0.03125, %v461_v43 }
 0x4dc   :  { %v475_v45 = vadd.f32 1e-05, %v471_v44 }
 0x4dd   :  { %v464_v46 = vpop.xlane.xlu1 %463  ;;  %v467_v47 = vpop.xlane.xlu0 %466 }
 0x4de   :  { %602 = vrsqrt.f32 %v475_v45  ;;  %v472_v48 = vmul.f32 0.03125, %v464_v46  ;;  %v473_v49 = vmul.f32 0.03125, %v467_v47 }
 0x4e0   :  { %v476_v50 = vadd.f32 1e-05, %v472_v48  ;;  %v477_v51 = vadd.f32 1e-05, %v473_v49 }
 0x4e1   :  { %v470_v52 = vpop.xlane.xlu1 %469 }
 0x4e2   :  { %604 = vrsqrt.f32 %v476_v50  ;;  %v474_v53 = vmul.f32 0.03125, %v470_v52 }
 0x4e3   :  { %606 = vrsqrt.f32 %v477_v51 }
 0x4e4   :  { %v478_v54 = vadd.f32 1e-05, %v474_v53 }
 0x4e6   :  { %608 = vrsqrt.f32 %v478_v54 }
 0x4eb   :  { %v603_v55 = vpop.eup %602 }
 0x4ec   :  { %v483_v57 = vmul.f32 %v603_v55, %v451_v28 }
 0x4ee   :  { %v493_v59 = vmul.f32 %v534_v56, %v483_v57 }
 0x4ef   :  { %v605_v60 = vpop.eup %604 }
 0x4f0   :  { %v607_v61 = vpop.eup %606  ;;  %v503_v62 = vadd.f32 %v535_v58, %v493_v59  ;;  %v484_v63 = vmul.f32 %v605_v60, %v452_v12 }
 0x4f1   :  { %v485_v0 = vmul.f32 %v607_v61, %v453_v33 }
 0x4f2   :  { %507 = vst.msk [vmem:[%s820_s14] sm:$0xff] %vm81_vm0, %v503_v62  ;;  %v494_v1 = vmul.f32 %v534_v56, %v484_v63 }
 0x4f3   :  { %v609_v2 = vpop.eup %608  ;;  %v495_v3 = vmul.f32 %v534_v56, %v485_v0 }
 0x4f4   :  { %v504_v4 = vadd.f32 %v535_v58, %v494_v1  ;;  %v486_v5 = vmul.f32 %v609_v2, %v454_v38 }
 0x4f5   :  { %v505_v6 = vadd.f32 %v535_v58, %v495_v3 }
 0x4f6   :  { %508 = vst.msk [vmem:[%s820_s14 + $0x8] sm:$0xff] %vm81_vm0, %v504_v4  ;;  %v496_v7 = vmul.f32 %v534_v56, %v486_v5 }
 0x4f7   :  { %509 = vst.msk [vmem:[%s820_s14 + $0x10] sm:$0xff] %vm81_vm0, %v505_v6 }
 0x4f8   :  { %v506_v8 = vadd.f32 %v535_v58, %v496_v7 }
 0x4fa   :  { %510 = vst.msk [vmem:[%s820_s14 + $0x18] sm:$0xff] %vm81_vm0, %v506_v8 }

// kernel: myformer_forward.16
= control target key start
LH: loop header
LB: loop body
LE: loop exit
PB: predicated region body
PF: predicated region fallthrough
CT: control target
= control target key end

     0   :  { %s816_s30 = smov 0   ;;  %s902_s0 = inlined_call_operand.vmem [shape: f32[2,16,32], index: 0, kind: input, shape index: {}]   ;;  %s903_s1 = inlined_call_operand.vmem [shape: bf16[32,32], index: 1, kind: input, shape index: {}]   ;;  %s904_s2 = inlined_call_operand.vmem [shape: bf16[32,32], index: 2, kind: input, shape index: {}]   ;;  %s905_s3 = inlined_call_operand.vmem [shape: bf16[32,32], index: 3, kind: input, shape index: {}]   ;;  %s906_s4 = inlined_call_operand.vmem [shape: f32[1,32], index: 4, kind: input, shape index: {}]   ;;  %s907_s5 = inlined_call_operand.vmem [shape: f32[1,32], index: 5, kind: input, shape index: {}]   ;;  %s908_s6 = inlined_call_operand.vmem [shape: f32[1,32], index: 6, kind: input, shape index: {}]   ;;  %s909_s7 = inlined_call_operand.vmem [shape: f32[1,32], index: 7, kind: input, shape index: {}]   ;;  %s910_s8 = inlined_call_operand.vmem [shape: f32[1,32], index: 8, kind: input, shape index: {}]   ;;  %s911_s9 = inlined_call_operand.vmem [shape: f32[2,8,32], index: 9, kind: output, shape index: {}]  }
   0x1 LB: > { %s675_s10 = sadd.s32 4294967295, %s762_s30   ;;  %p679_p0 = scmp.ge.s32.totalorder %s762_s30, 1  ;;  %s762_s30 = sphi %s816_s30, %s19_s30  }
   0x2   : > { %p287_p1 = scmp.lt.s32.totalorder %s762_s30, 3 }
   0x4   : > { %p288_p2 = pnand %p679_p0, %p287_p1 }
   0x5   : > { %p322_p3 = scmp.lt.s32.totalorder (!%p288_p2), %s675_s10, 1 }
   0x6   : > { %291 = sbr.rel (%p288_p2) target bundleno = 273 (0x111), region = 56 }
   0xb   : > { %v744_v0 = vld [vmem:[%s904_s2 + $0x8] sm:$0xff]   ;;  %v764_v1 = vmov 0.0   ;;  %v336_v3 = vlaneseq  ;;  %v746_v4 = vld [vmem:[%s904_s2] sm:$0xff]   ;;  %vm765_vm0 = vmmov 0   ;;  %s913_s10 = smov (!%p322_p3, %s675_s10), 1  ;;  %vm368_vm1 = vcmask 261120  }
   0xc   : > { %710 = vmatprep.subr.bf16.mxu0 %v764_v1  ;;  %718 = vmatprep.subr.bf16.mxu1 %v764_v1  ;;  %v745_v2 = vld [vmem:[%s903_s1 + $0x8] sm:$0xff]   ;;  %v747_v5 = vld [vmem:[%s903_s1] sm:$0xff]   ;;  %s700_s19 = sshll.u32 %s913_s10, 4  ;;  %s682_s18 = sshll.u32 %s913_s10, 3 }
   0xd   : > { %711 = vmatpush3.bf16.msra.mxu0 %v744_v0  ;;  %714 = vmatprep.mubr.msk.bf16.mxu0 %vm765_vm0, %v764_v1  ;;  %v840_v6 = vshrl.u32 %v336_v3, 7  ;;  %s326_s22 = scalar_lea.vmem %s902_s0, %s700_s19  ;;  %v748_v13 = vld [vmem:[%s905_s3 + $0x8] sm:$0xff]   ;;  %v749_v18 = vld [vmem:[%s905_s3] sm:$0xff]   ;;  %s330_s21 = scalar_lea.vmem %s911_s9, %s682_s18 }
   0xe   : > { %719 = vmatpush3.bf16.msra.mxu1 %v745_v2  ;;  %712 = vmatprep.subr.bf16.mxu0 %v764_v1  ;;  %v332_v7 = vld [vmem:[%s326_s22] sm:$0xff]  ;;  %v333_v8 = vld [vmem:[%s326_s22 + $0x8] sm:$0xff] }
   0xf   : > { %720 = vmatprep.subr.bf16.mxu1 %v764_v1  ;;  %722 = vmatprep.mubr.msk.bf16.mxu1 %vm765_vm0, %v764_v1  ;;  %vm338_vm2 = vcmp.lt.s32.totalorder %v840_v6, 1  ;;  %v334_v9 = vrot.slane %v332_v7, 7  ;;  %v335_v10 = vrot.slane %v333_v8, 7  ;;  %v341_v11 = vrot.slane %v332_v7, 1  ;;  %v550_v22 = vld [vmem:[%s910_s8] sm:$0x1] }
  0x10   : > { %v342_v12 = vrot.slane %v333_v8, 1  ;;  %v351_v14 = vpack.c.bf16 %v333_v8, %v332_v7  ;;  %vm343_vm3 = vcmp.lt.s32.totalorder %v840_v6, 7  ;;  %v551_v23 = vadd.f32 1e-05, %v550_v22  ;;  %v692_v36 = vld [vmem:[%s906_s4] ss:$0 sm:$0xff] }
  0x11   : > { %713 = vmatpush3.bf16.msra.mxu0 %v746_v4  ;;  %v339_v15 = vsel %vm338_vm2, %v334_v9, %v335_v10  ;;  %v340_v16 = vsel %vm338_vm2, %v335_v10, %v334_v9  ;;  %v556_v32 = vsub.s32 0, %v840_v6  ;;  %v693_v38 = vld [vmem:[%s909_s7] ss:$0 sm:$0xff]  ;;  %v589_v61 = vadd.s32 8, %v840_v6 }
  0x12   : > { %721 = vmatpush3.bf16.msra.mxu1 %v747_v5  ;;  %726 = vmatprep.subr.bf16.mxu0 %v764_v1  ;;  %v346_v17 = vpack.c.bf16 %v339_v15, %v340_v16  ;;  %v344_v19 = vsel %vm343_vm3, %v341_v11, %v342_v12  ;;  %v345_v20 = vsel %vm343_vm3, %v342_v12, %v341_v11  ;;  %750 = vrsqrt.f32 %v551_v23  ;;  %v694_v46 = vld [vmem:[%s907_s5] ss:$0 sm:$0xff] }
  0x13   : > { %v469_v21 = vpack.c.bf16 %v345_v20, %v344_v19  ;;  %v695_v50 = vld [vmem:[%s908_s6] ss:$0 sm:$0xff]  ;;  %vm590_vm6 = vcmp.eq.s32.totalorder %v840_v6, 0  ;;  %vm603_vm7 = vcmp.eq.s32.totalorder %v589_v61, 15 }
  0x14   : > { %715 = vmatmul.mubr.msk.bf16.vlgmr.msra.gmra.mxu0 %vm368_vm1, %v351_v14 }
  0x15   : > { %727 = vmatpush3.bf16.msra.mxu0 %v748_v13  ;;  %730 = vmatprep.mubr.msk.bf16.mxu0 %vm765_vm0, %v764_v1 }
  0x16   : > { %723 = vmatmul.mubr.msk.bf16.vlgmr.msra.gmra.mxu1 %vm368_vm1, %v346_v17  ;;  %728 = vmatprep.subr.bf16.mxu0 %v764_v1 }
  0x19   : > { %729 = vmatpush3.bf16.msra.mxu0 %v749_v18 }
  0x1c   : > { %731 = vmatmul.mubr.msk.bf16.vlgmr.msra.gmra.mxu0 %vm368_vm1, %v469_v21 }
  0x1f   : > { %v751_v33 = vpop.eup %750 }
  0x20   : > { %v557_v42 = vrot.slane %v751_v33, %v556_v32 }
  0xd4   : > { %v406_v24 = vpop.f32.mrf.mxu0 }
  0xd6   : > { %v716_v25 = vpop.f32.mrf.mxu0  ;;  %v462_v26 = vpop.f32.mrf.mxu1 }
  0xd7   : > { %v463_v31 = vadd.f32 %v462_v26, %v406_v24 }
  0xd8   : > { %v409_v27 = vpop.f32.mrf.mxu0  ;;  %v724_v28 = vpop.f32.mrf.mxu1 }
  0xda   : > { %v717_v29 = vpop.f32.mrf.mxu0  ;;  %v465_v30 = vpop.f32.mrf.mxu1 }
  0xdb   : > { %v466_v40 = vadd.f32 %v465_v30, %v409_v27 }
  0xdc   : > { %v725_v34 = vpop.f32.mrf.mxu1  ;;  %v523_v35 = vpop.f32.mrf.mxu0 }
  0xdd   : > { %v530_v37 = vadd.f32 %v523_v35, %v463_v31 }
  0xde   : > { %v732_v39 = vpop.f32.mrf.mxu0 }
  0xdf   : > { %v539_v41 = vadd.f32 %v692_v36, %v530_v37 }
  0xe0   : > { %v526_v43 = vpop.f32.mrf.mxu0 }
  0xe1   : > { %v548_v44 = vsub.f32 %v539_v41, %v693_v38  ;;  %v531_v45 = vadd.f32 %v526_v43, %v466_v40 }
  0xe2   : > { %v733_v47 = vpop.f32.mrf.mxu0 }
  0xe3   : > { %v559_v48 = vmul.f32 %v557_v42, %v548_v44  ;;  %v540_v49 = vadd.f32 %v692_v36, %v531_v45 }
  0xe5   : > { %v568_v51 = vmul.f32 %v694_v46, %v559_v48  ;;  %v549_v52 = vsub.f32 %v540_v49, %v693_v38 }
  0xe7   : > { %v577_v53 = vadd.f32 %v695_v50, %v568_v51  ;;  %v560_v54 = vmul.f32 %v557_v42, %v549_v52 }
  0xe9   : > { %v581_v55 = vmul.f32 1.442695, %v577_v53  ;;  %v569_v56 = vmul.f32 %v694_v46, %v560_v54  ;;  %vm579_vm4 = vcmp.gt.f32.partialorder %v577_v53, 0.0 }
  0xeb   : > { %752 = vpow2.f32 %v581_v55  ;;  %v578_v57 = vadd.f32 %v695_v50, %v569_v56 }
  0xed   : > { %v583_v58 = vmul.f32 1.442695, %v578_v57  ;;  %vm580_vm5 = vcmp.gt.f32.partialorder %v578_v57, 0.0 }
  0xef   : > { %754 = vpow2.f32 %v583_v58 }
  0xf8   : > { %v753_v59 = vpop.eup %752 }
  0xf9   : > { %v696_v60 = vadd.f32 -1.0, %v753_v59 }
  0xfb   : > { %v587_v63 = vsel %vm579_vm4, %v577_v53, %v696_v60 }
  0xfc   : > { %v755_v62 = vpop.eup %754  ;;  %v592_v2 = vrot.slane %v587_v63, 7  ;;  %v604_v3 = vrot.slane %v587_v63, 1 }
  0xfd   : > { %v697_v0 = vadd.f32 -1.0, %v755_v62 }
  0xff   : > { %v588_v1 = vsel %vm580_vm5, %v578_v57, %v697_v0 }
 0x100   : > { %v593_v4 = vrot.slane %v588_v1, 7  ;;  %v605_v5 = vrot.slane %v588_v1, 1 }
 0x102   : > { %v594_v7 = vsel %vm338_vm2, %v592_v2, %v593_v4  ;;  %v595_v8 = vsel %vm338_vm2, %v593_v4, %v592_v2  ;;  %v607_v9 = vsel %vm343_vm3, %v605_v5, %v604_v3  ;;  %v606_v14 = vsel %vm343_vm3, %v604_v3, %v605_v5 }
 0x103   : > { %v600_v10 = vsel %vm590_vm6, -1e+30, %v595_v8  ;;  %v613_v11 = vsel %vm603_vm7, -1e+30, %v607_v9  ;;  %v615_v12 = vmax.f32 %v594_v7, %v588_v1 }
 0x104   : > { %v614_v13 = vmax.f32 %v600_v10, %v587_v63 }
 0x105   : > { %v617_v15 = vmax.f32 %v615_v12, %v613_v11 }
 0x106   : > { %v616_v16 = vmax.f32 %v614_v13, %v606_v14 }
 0x107   : > { %619 = vst.msk [vmem:[#allocation2 + $0x8] sm:$0xff] %vm368_vm1, %v617_v15 }
 0x108   : > { %618 = vst.msk [vmem:[#allocation2] sm:$0xff] %vm368_vm1, %v616_v16 }
 0x10f   : > { %v620_v17 = vld [vmem:[#allocation2] ss:$2 sm:$0xff] }
 0x110   : > { %621 = vst.msk [vmem:[%s330_s21] sm:$0xff] %vm368_vm1, %v620_v17 }
 0x111 PF: > { %s19_s30 = sadd.s32 1, %s762_s30  }
 0x112   : > { %p16_p4 = scmp.ge.s32.totalorder %s19_s30, 4  }
 0x114   :  { %18 = sbr.rel (!%p16_p4) target bundleno = 1 (0x1), region = 86 }

// kernel: myformer_forward.17
= control target key start
LH: loop header
LB: loop body
LE: loop exit
PB: predicated region body
PF: predicated region fallthrough
CT: control target
= control target key end

     0   :  { %v112_v0 = vmov 0.0   ;;  %vm113_vm0 = vmmov 0   ;;  %vm41_vm1 = vcmask 261120   ;;  %vm86_vm2 = vcmask 785408   ;;  %s155_s1 = inlined_call_operand.vmem [shape: bf16[32,96], index: 1, kind: input, shape index: {}]   ;;  %s156_s0 = inlined_call_operand.vmem [shape: f32[16,32], index: 0, kind: input, shape index: {}]   ;;  %s157_s2 = inlined_call_operand.vmem [shape: f32[1,96], index: 2, kind: input, shape index: {}]   ;;  %s158_s3 = inlined_call_operand.vmem [shape: f32[16,96], index: 3, kind: output, shape index: {}]  }
   0x1   :  { %100 = vmatprep.subr.bf16.mxu0 %v112_v0  ;;  %v110_v1 = vld [vmem:[%s155_s1 + $0x8] sm:$0xff]   ;;  %104 = vmatprep.mubr.msk.bf16.mxu0 %vm113_vm0, %v112_v0  ;;  %v111_v2 = vld [vmem:[%s155_s1] sm:$0xff]  }
   0x2   :  { %101 = vmatpush3.bf16.msra.mxu0 %v110_v1  ;;  %v15_v3 = vld [vmem:[%s156_s0] sm:$0xff]  ;;  %v16_v4 = vld [vmem:[%s156_s0 + $0x8] sm:$0xff] }
   0x3   :  { %102 = vmatprep.subr.bf16.mxu0 %v112_v0  ;;  %v17_v5 = vpack.c.bf16 %v16_v4, %v15_v3  ;;  %v93_v6 = vld [vmem:[%s157_s2] ss:$0 sm:$0xff] }
   0x6   :  { %103 = vmatpush3.bf16.msra.mxu0 %v111_v2 }
   0x9   :  { %105 = vmatmul.mubr.msk.bf16.vlgmr.msra.gmra.mxu0 %vm41_vm1, %v17_v5 }
  0xc9   :  { %v79_v7 = vpop.f32.mrf.mxu0 }
  0xca   :  { %v80_v8 = vadd.f32 %v93_v6, %v79_v7 }
  0xcb   :  { %v106_v9 = vpop.f32.mrf.mxu0 }
  0xcc   :  { %87 = vst.msk [vmem:[%s158_s3] sm:$0xff] %vm86_vm2, %v80_v8 }
  0xcd   :  { %v82_v10 = vpop.f32.mrf.mxu0 }
  0xce   :  { %v83_v11 = vadd.f32 %v93_v6, %v82_v10 }
  0xcf   :  { %v107_v12 = vpop.f32.mrf.mxu0 }
  0xd0   :  { %88 = vst.msk [vmem:[%s158_s3 + $0x8] sm:$0xff] %vm86_vm2, %v83_v11 }

// kernel: myformer_forward.20
= control target key start
LH: loop header
LB: loop body
LE: loop exit
PB: predicated region body
PF: predicated region fallthrough
CT: control target
= control target key end

     0   :  { %s768_s30 = smov 0   ;;  %s829_s0 = inlined_call_operand.vmem [shape: f32[2,8,32], index: 0, kind: input, shape index: {}]   ;;  %s830_s1 = inlined_call_operand.vmem [shape: bf16[32,32], index: 1, kind: input, shape index: {}]   ;;  %s831_s2 = inlined_call_operand.vmem [shape: bf16[32,32], index: 2, kind: input, shape index: {}]   ;;  %s832_s3 = inlined_call_operand.vmem [shape: bf16[32,32], index: 3, kind: input, shape index: {}]   ;;  %s833_s4 = inlined_call_operand.vmem [shape: f32[1,32], index: 4, kind: input, shape index: {}]   ;;  %s834_s5 = inlined_call_operand.vmem [shape: f32[1,32], index: 5, kind: input, shape index: {}]   ;;  %s835_s6 = inlined_call_operand.vmem [shape: f32[1,32], index: 6, kind: input, shape index: {}]   ;;  %s836_s7 = inlined_call_operand.vmem [shape: f32[1,32], index: 7, kind: input, shape index: {}]   ;;  %s837_s8 = inlined_call_operand.vmem [shape: f32[1,32], index: 8, kind: input, shape index: {}]   ;;  %s838_s9 = inlined_call_operand.vmem [shape: f32[2,4,32], index: 9, kind: output, shape index: {}]  }
   0x1 LB: > { %s632_s10 = sadd.s32 4294967295, %s714_s30   ;;  %p636_p0 = scmp.ge.s32.totalorder %s714_s30, 1  ;;  %s714_s30 = sphi %s768_s30, %s19_s30  }
   0x2   : > { %p286_p1 = scmp.lt.s32.totalorder %s714_s30, 3 }
   0x4   : > { %p287_p2 = pnand %p636_p0, %p286_p1 }
   0x5   : > { %p320_p3 = scmp.lt.s32.totalorder (!%p287_p2), %s632_s10, 1 }
   0x6   : > { %290 = sbr.rel (%p287_p2) target bundleno = 268 (0x10c), region = 56 }
   0xb   : > { %v698_v0 = vld [vmem:[%s831_s2 + $0x8] sm:$0xff]   ;;  %v716_v1 = vmov 0.0   ;;  %v700_v3 = vld [vmem:[%s831_s2] sm:$0xff]   ;;  %vm717_vm0 = vmmov 0   ;;  %s840_s10 = smov (!%p320_p3, %s632_s10), 1  ;;  %vm354_vm1 = vcmask 261120   ;;  %v534_v15 = vlaneseq }
   0xc   : > { %664 = vmatprep.subr.bf16.mxu0 %v716_v1  ;;  %672 = vmatprep.subr.bf16.mxu1 %v716_v1  ;;  %v699_v2 = vld [vmem:[%s830_s1 + $0x8] sm:$0xff]   ;;  %v701_v4 = vld [vmem:[%s830_s1] sm:$0xff]   ;;  %s637_s19 = sshll.u32 %s840_s10, 3  ;;  %s638_s18 = sshll.u32 %s840_s10, 2  ;;  %vm577_vm5 = vcmask 257024  }
   0xd   : > { %665 = vmatpush3.bf16.msra.mxu0 %v698_v0  ;;  %668 = vmatprep.mubr.msk.bf16.mxu0 %vm717_vm0, %v716_v1  ;;  %s323_s22 = scalar_lea.vmem %s829_s0, %s637_s19  ;;  %v702_v6 = vld [vmem:[%s832_s3 + $0x8] sm:$0xff]   ;;  %v703_v11 = vld [vmem:[%s832_s3] sm:$0xff]   ;;  %v535_v19 = vshrl.u32 %v534_v15, 7  ;;  %s327_s21 = scalar_lea.vmem %s838_s9, %s638_s18 }
   0xe   : > { %673 = vmatpush3.bf16.msra.mxu1 %v699_v2  ;;  %666 = vmatprep.subr.bf16.mxu0 %v716_v1  ;;  %v329_v5 = vld [vmem:[%s323_s22] sm:$0xff] }
   0xf   : > { %674 = vmatprep.subr.bf16.mxu1 %v716_v1  ;;  %676 = vmatprep.mubr.msk.bf16.mxu1 %vm717_vm0, %v716_v1  ;;  %v337_v7 = vpack.c.bf16 %v329_v5, %v329_v5  ;;  %v330_v8 = vrot.slane %v329_v5, 7  ;;  %v331_v9 = vrot.slane %v329_v5, 1  ;;  %v530_v13 = vld [vmem:[%s837_s8] sm:$0x1]  ;;  %v536_v25 = vsub.s32 0, %v535_v19 }
  0x10   : > { %v531_v14 = vadd.f32 1e-05, %v530_v13  ;;  %v648_v29 = vld [vmem:[%s833_s4] ss:$0 sm:$0xff]  ;;  %vm563_vm3 = vcmp.eq.s32.totalorder %v535_v19, 0  ;;  %vm568_vm4 = vcmp.eq.s32.totalorder %v535_v19, 7 }
  0x11   : > { %667 = vmatpush3.bf16.msra.mxu0 %v700_v3  ;;  %v332_v10 = vpack.c.bf16 %v330_v8, %v330_v8  ;;  %v453_v12 = vpack.c.bf16 %v331_v9, %v331_v9  ;;  %v649_v31 = vld [vmem:[%s836_s7] ss:$0 sm:$0xff] }
  0x12   : > { %675 = vmatpush3.bf16.msra.mxu1 %v701_v4  ;;  %680 = vmatprep.subr.bf16.mxu0 %v716_v1  ;;  %704 = vrsqrt.f32 %v531_v14  ;;  %v650_v37 = vld [vmem:[%s834_s5] ss:$0 sm:$0xff] }
  0x13   : > { %v651_v40 = vld [vmem:[%s835_s6] ss:$0 sm:$0xff] }
  0x14   : > { %669 = vmatmul.mubr.msk.bf16.vlgmr.msra.gmra.mxu0 %vm354_vm1, %v337_v7 }
  0x15   : > { %681 = vmatpush3.bf16.msra.mxu0 %v702_v6  ;;  %684 = vmatprep.mubr.msk.bf16.mxu0 %vm717_vm0, %v716_v1 }
  0x16   : > { %677 = vmatmul.mubr.msk.bf16.vlgmr.msra.gmra.mxu1 %vm354_vm1, %v332_v10  ;;  %682 = vmatprep.subr.bf16.mxu0 %v716_v1 }
  0x19   : > { %683 = vmatpush3.bf16.msra.mxu0 %v703_v11 }
  0x1c   : > { %685 = vmatmul.mubr.msk.bf16.vlgmr.msra.gmra.mxu0 %vm354_vm1, %v453_v12 }
  0x1f   : > { %v705_v26 = vpop.eup %704 }
  0x20   : > { %v537_v34 = vrot.slane %v705_v26, %v536_v25 }
  0xd4   : > { %v392_v16 = vpop.f32.mrf.mxu0 }
  0xd6   : > { %v447_v17 = vpop.f32.mrf.mxu1  ;;  %v670_v18 = vpop.f32.mrf.mxu0 }
  0xd7   : > { %v448_v24 = vadd.f32 %v447_v17, %v392_v16 }
  0xd8   : > { %v678_v20 = vpop.f32.mrf.mxu1  ;;  %v395_v21 = vpop.f32.mrf.mxu0 }
  0xda   : > { %v450_v22 = vpop.f32.mrf.mxu1  ;;  %v671_v23 = vpop.f32.mrf.mxu0 }
  0xdc   : > { %v679_v27 = vpop.f32.mrf.mxu1  ;;  %v507_v28 = vpop.f32.mrf.mxu0 }
  0xdd   : > { %v513_v30 = vadd.f32 %v507_v28, %v448_v24 }
  0xde   : > { %v686_v32 = vpop.f32.mrf.mxu0 }
  0xdf   : > { %v521_v33 = vadd.f32 %v648_v29, %v513_v30 }
  0xe0   : > { %v510_v35 = vpop.f32.mrf.mxu0 }
  0xe1   : > { %v529_v36 = vsub.f32 %v521_v33, %v649_v31 }
  0xe2   : > { %v687_v38 = vpop.f32.mrf.mxu0 }
  0xe3   : > { %v539_v39 = vmul.f32 %v537_v34, %v529_v36 }
  0xe5   : > { %v547_v41 = vmul.f32 %v650_v37, %v539_v39 }
  0xe7   : > { %v555_v42 = vadd.f32 %v651_v40, %v547_v41 }
  0xe9   : > { %v557_v43 = vmul.f32 1.442695, %v555_v42  ;;  %vm556_vm2 = vcmp.gt.f32.partialorder %v555_v42, 0.0 }
  0xeb   : > { %706 = vpow2.f32 %v557_v43 }
  0xf8   : > { %v707_v44 = vpop.eup %706 }
  0xf9   : > { %v652_v45 = vadd.f32 -1.0, %v707_v44 }
  0xfb   : > { %v560_v46 = vsel %vm556_vm2, %v555_v42, %v652_v45 }
  0xfc   : > { %v564_v47 = vrot.slane %v560_v46, 7  ;;  %v569_v48 = vrot.slane %v560_v46, 1 }
  0xfe   : > { %v567_v49 = vsel %vm563_vm3, -1e+30, %v564_v47  ;;  %v572_v51 = vsel %vm568_vm4, -1e+30, %v569_v48 }
  0xff   : > { %v573_v50 = vmax.f32 %v567_v49, %v560_v46 }
 0x101   : > { %v574_v52 = vmax.f32 %v573_v50, %v572_v51 }
 0x103   : > { %575 = vst.msk [vmem:[#allocation2] sm:$0xff] %vm354_vm1, %v574_v52 }
 0x10a   : > { %v576_v53 = vld [vmem:[#allocation2] ss:$2 sm:$0xf] }
 0x10b   : > { %578 = vst.msk [vmem:[%s327_s21] sm:$0xf] %vm577_vm5, %v576_v53 }
 0x10c PF: > { %s19_s30 = sadd.s32 1, %s714_s30  }
 0x10d   : > { %p16_p4 = scmp.ge.s32.totalorder %s19_s30, 4  }
 0x10f   :  { %18 = sbr.rel (!%p16_p4) target bundleno = 1 (0x1), region = 86 }

// kernel: myformer_forward.18
= control target key start
LH: loop header
LB: loop body
LE: loop exit
PB: predicated region body
PF: predicated region fallthrough
CT: control target
= control target key end

     0   :  { %v1095_v0 = vmov 0.0   ;;  %vm63_vm0 = vcmask 64512   ;;  %vm1096_vm1 = vmmov 0   ;;  %vm539_vm2 = vcmask 1043456   ;;  %s1349_s1 = inlined_call_operand.vmem [shape: f32[8,8,8], index: 1, kind: input, shape index: {}]   ;;  %s1350_s0 = inlined_call_operand.vmem [shape: f32[8,8,8], index: 0, kind: input, shape index: {}]   ;;  %s1351_s2 = inlined_call_operand.vmem [shape: f32[8,8,8], index: 2, kind: input, shape index: {}]   ;;  %s1352_s3 = inlined_call_operand.vmem [shape: f32[8,8,8], index: 3, kind: output, shape index: {}]  }
   0x1   :  { %965 = vmatprep.subr.bf16.mxu0 %v1095_v0  ;;  %971 = vmatprep.subr.bf16.mxu1 %v1095_v0  ;;  %v31_v1 = vld [vmem:[%s1349_s1] sm:$0xff]  ;;  %v32_v2 = vld [vmem:[%s1349_s1 + $0x8] sm:$0xff]  ;;  %v33_v5 = vld [vmem:[%s1349_s1 + $0x10] sm:$0xff] }
   0x2   :  { %v39_v3 = vpack.c.bf16 %v31_v1, %v31_v1  ;;  %v40_v4 = vpack.c.bf16 %v32_v2, %v32_v2  ;;  %967 = vmatprep.mubr.msk.bf16.mxu0 %vm1096_vm1, %v1095_v0  ;;  %973 = vmatprep.mubr.msk.bf16.mxu1 %vm1096_vm1, %v1095_v0  ;;  %v34_v6 = vld [vmem:[%s1349_s1 + $0x18] sm:$0xff]  ;;  %v15_v9 = vld [vmem:[%s1350_s0] sm:$0xff]  ;;  %v16_v10 = vld [vmem:[%s1350_s0 + $0x8] sm:$0xff]  ;;  %v41_v11 = vpack.c.bf16 %v33_v5, %v33_v5 }
   0x3   :  { %v42_v12 = vpack.c.bf16 %v34_v6, %v34_v6  ;;  %v23_v13 = vpack.c.bf16 %v15_v9, %v15_v9  ;;  %v24_v14 = vpack.c.bf16 %v16_v10, %v16_v10  ;;  %v35_v17 = vld [vmem:[%s1349_s1 + $0x20] sm:$0xff]  ;;  %v36_v18 = vld [vmem:[%s1349_s1 + $0x28] sm:$0xff]  ;;  %v17_v19 = vld [vmem:[%s1350_s0 + $0x10] sm:$0xff] }
   0x4   :  { %v68_v7 = vsel %vm63_vm0, %v39_v3, 0  ;;  %v114_v8 = vsel %vm63_vm0, %v40_v4, 0  ;;  %v160_v15 = vsel %vm63_vm0, %v41_v11, 0  ;;  %v18_v20 = vld [vmem:[%s1350_s0 + $0x18] sm:$0xff]  ;;  %v43_v21 = vpack.c.bf16 %v35_v17, %v35_v17  ;;  %v37_v27 = vld [vmem:[%s1349_s1 + $0x30] sm:$0xff]  ;;  %v19_v29 = vld [vmem:[%s1350_s0 + $0x20] sm:$0xff] }
   0x5   :  { %966 = vmatpush3.bf16.xpose.msra.mxu0 %v68_v7  ;;  %972 = vmatpush3.bf16.xpose.msra.mxu1 %v114_v8  ;;  %v206_v16 = vsel %vm63_vm0, %v42_v12, 0  ;;  %v44_v22 = vpack.c.bf16 %v36_v18, %v36_v18  ;;  %v25_v23 = vpack.c.bf16 %v17_v19, %v17_v19  ;;  %v26_v24 = vpack.c.bf16 %v18_v20, %v18_v20  ;;  %v38_v28 = vld [vmem:[%s1349_s1 + $0x38] sm:$0xff]  ;;  %v20_v30 = vld [vmem:[%s1350_s0 + $0x28] sm:$0xff]  ;;  %v21_v37 = vld [vmem:[%s1350_s0 + $0x30] sm:$0xff] }
   0x6   :  { %977 = vmatprep.subr.bf16.mxu0 %v1095_v0  ;;  %983 = vmatprep.subr.bf16.mxu1 %v1095_v0  ;;  %v252_v25 = vsel %vm63_vm0, %v43_v21, 0  ;;  %v45_v31 = vpack.c.bf16 %v37_v27, %v37_v27  ;;  %v46_v32 = vpack.c.bf16 %v38_v28, %v38_v28  ;;  %v27_v33 = vpack.c.bf16 %v19_v29, %v19_v29  ;;  %v22_v38 = vld [vmem:[%s1350_s0 + $0x38] sm:$0xff] }
   0x7   :  { %v298_v26 = vsel %vm63_vm0, %v44_v22, 0  ;;  %v28_v34 = vpack.c.bf16 %v20_v30, %v20_v30  ;;  %v29_v39 = vpack.c.bf16 %v21_v37, %v21_v37  ;;  %v30_v40 = vpack.c.bf16 %v22_v38, %v22_v38 }
   0x8   :  { %v344_v35 = vsel %vm63_vm0, %v45_v31, 0  ;;  %v390_v36 = vsel %vm63_vm0, %v46_v32, 0 }
   0xc   :  { %968 = vmatmul.mubr.msk.bf16.vlgmr.msra.gmra.mxu0 %vm63_vm0, %v23_v13  ;;  %974 = vmatmul.mubr.msk.bf16.vlgmr.msra.gmra.mxu1 %vm63_vm0, %v24_v14 }
   0xd   :  { %978 = vmatpush3.bf16.xpose.msra.mxu0 %v160_v15  ;;  %984 = vmatpush3.bf16.xpose.msra.mxu1 %v206_v16 }
   0xe   :  { %979 = vmatprep.mubr.msk.bf16.mxu0 %vm1096_vm1, %v1095_v0  ;;  %985 = vmatprep.mubr.msk.bf16.mxu1 %vm1096_vm1, %v1095_v0 }
   0xf   :  { %989 = vmatprep.subr.bf16.mxu0 %v1095_v0  ;;  %995 = vmatprep.subr.bf16.mxu1 %v1095_v0 }
  0x14   :  { %980 = vmatmul.mubr.msk.bf16.vlgmr.msra.gmra.mxu0 %vm63_vm0, %v25_v23  ;;  %986 = vmatmul.mubr.msk.bf16.vlgmr.msra.gmra.mxu1 %vm63_vm0, %v26_v24 }
  0x15   :  { %990 = vmatpush3.bf16.xpose.msra.mxu0 %v252_v25  ;;  %996 = vmatpush3.bf16.xpose.msra.mxu1 %v298_v26 }
  0x16   :  { %991 = vmatprep.mubr.msk.bf16.mxu0 %vm1096_vm1, %v1095_v0  ;;  %997 = vmatprep.mubr.msk.bf16.mxu1 %vm1096_vm1, %v1095_v0 }
  0x17   :  { %1001 = vmatprep.subr.bf16.mxu0 %v1095_v0  ;;  %1007 = vmatprep.subr.bf16.mxu1 %v1095_v0 }
  0x1c   :  { %992 = vmatmul.mubr.msk.bf16.vlgmr.msra.gmra.mxu0 %vm63_vm0, %v27_v33  ;;  %998 = vmatmul.mubr.msk.bf16.vlgmr.msra.gmra.mxu1 %vm63_vm0, %v28_v34 }
  0x1d   :  { %1002 = vmatpush3.bf16.xpose.msra.mxu0 %v344_v35  ;;  %1008 = vmatpush3.bf16.xpose.msra.mxu1 %v390_v36 }
  0x1e   :  { %1003 = vmatprep.mubr.msk.bf16.mxu0 %vm1096_vm1, %v1095_v0  ;;  %1009 = vmatprep.mubr.msk.bf16.mxu1 %vm1096_vm1, %v1095_v0 }
  0x1f   :  { %1013 = vmatprep.subr.bf16.mxu0 %v1095_v0  ;;  %1019 = vmatprep.subr.bf16.mxu1 %v1095_v0 }
  0x24   :  { %1004 = vmatmul.mubr.msk.bf16.vlgmr.msra.gmra.mxu0 %vm63_vm0, %v29_v39  ;;  %1010 = vmatmul.mubr.msk.bf16.vlgmr.msra.gmra.mxu1 %vm63_vm0, %v30_v40 }
  0x25   :  { %1015 = vmatprep.mubr.msk.bf16.mxu0 %vm1096_vm1, %v1095_v0  ;;  %1021 = vmatprep.mubr.msk.bf16.mxu1 %vm1096_vm1, %v1095_v0 }
  0xcc   :  { %v104_v41 = vpop.f32.mrf.mxu0  ;;  %v150_v42 = vpop.f32.mrf.mxu1 }
  0xcd   :  { %v432_v43 = vmul.f32 0.35355338, %v104_v41  ;;  %v433_v44 = vmul.f32 0.35355338, %v150_v42 }
  0xce   :  { %v969_v45 = vpop.f32.mrf.mxu0  ;;  %v975_v46 = vpop.f32.mrf.mxu1 }
  0xcf   :  { %v440_v47 = vsel %vm63_vm0, %v432_v43, -inf  ;;  %v443_v50 = vsel %vm63_vm0, %v433_v44, -inf }
  0xd0   :  { %v153_v48 = vpop.f32.mrf.mxu1  ;;  %441 = vmax.xlane.f32.xlu0 %v440_v47  ;;  %v107_v49 = vpop.f32.mrf.mxu0 }
  0xd2   :  { %v970_v51 = vpop.f32.mrf.mxu0  ;;  %v976_v52 = vpop.f32.mrf.mxu1 }
  0xd4   :  { %v242_v53 = vpop.f32.mrf.mxu1  ;;  %444 = vmax.xlane.f32.xlu0 %v443_v50  ;;  %v196_v54 = vpop.f32.mrf.mxu0 }
  0xd5   :  { %v435_v55 = vmul.f32 0.35355338, %v242_v53  ;;  %v434_v56 = vmul.f32 0.35355338, %v196_v54 }
  0xd6   :  { %v981_v57 = vpop.f32.mrf.mxu0  ;;  %v987_v58 = vpop.f32.mrf.mxu1 }
  0xd7   :  { %v446_v59 = vsel %vm63_vm0, %v434_v56, -inf  ;;  %v449_v62 = vsel %vm63_vm0, %v435_v55, -inf }
  0xd8   :  { %v245_v60 = vpop.f32.mrf.mxu1  ;;  %447 = vmax.xlane.f32.xlu1 %v446_v59  ;;  %v199_v61 = vpop.f32.mrf.mxu0 }
  0xda   :  { %v982_v63 = vpop.f32.mrf.mxu0  ;;  %v988_v1 = vpop.f32.mrf.mxu1 }
  0xdb   :  { %v47_v63 = vld [vmem:[%s1351_s2] sm:$0xff]  ;;  %v48_v1 = vld [vmem:[%s1351_s2 + $0x8] sm:$0xff] }
  0xdc   :  { %v334_v2 = vpop.f32.mrf.mxu1  ;;  %450 = vmax.xlane.f32.xlu1 %v449_v62  ;;  %v288_v3 = vpop.f32.mrf.mxu0 }
  0xdd   :  { %v437_v4 = vmul.f32 0.35355338, %v334_v2  ;;  %v436_v5 = vmul.f32 0.35355338, %v288_v3 }
  0xde   :  { %v993_v6 = vpop.f32.mrf.mxu0  ;;  %v999_v7 = vpop.f32.mrf.mxu1 }
  0xdf   :  { %v455_v8 = vsel %vm63_vm0, %v437_v4, -inf  ;;  %v452_v9 = vsel %vm63_vm0, %v436_v5, -inf }
  0xe0   :  { %v337_v10 = vpop.f32.mrf.mxu1  ;;  %456 = vmax.xlane.f32.xlu1 %v455_v8  ;;  %453 = vmax.xlane.f32.xlu0 %v452_v9  ;;  %v291_v11 = vpop.f32.mrf.mxu0  ;;  %v49_v9 = vld [vmem:[%s1351_s2 + $0x10] sm:$0xff] }
  0xe1   :  { %v57_v10 = vpack.c.bf16 %v49_v9, %v49_v9  ;;  %v50_v11 = vld [vmem:[%s1351_s2 + $0x18] sm:$0xff] }
  0xe2   :  { %v994_v12 = vpop.f32.mrf.mxu0  ;;  %v1000_v13 = vpop.f32.mrf.mxu1 }
  0xe3   :  { %v58_v12 = vpack.c.bf16 %v50_v11, %v50_v11  ;;  %v633_v13 = vsel %vm539_vm2, %v57_v10, 0 }
  0xe4   :  { %v380_v14 = vpop.f32.mrf.mxu0  ;;  %v426_v15 = vpop.f32.mrf.mxu1 }
  0xe5   :  { %v438_v16 = vmul.f32 0.35355338, %v380_v14  ;;  %v439_v17 = vmul.f32 0.35355338, %v426_v15  ;;  %v679_v14 = vsel %vm539_vm2, %v58_v12, 0  ;;  %v51_v15 = vld [vmem:[%s1351_s2 + $0x20] sm:$0xff] }
  0xe6   :  { %v1005_v18 = vpop.f32.mrf.mxu0  ;;  %v1011_v19 = vpop.f32.mrf.mxu1 }
  0xe7   :  { %v461_v20 = vsel %vm63_vm0, %v439_v17, -inf  ;;  %v458_v21 = vsel %vm63_vm0, %v438_v16, -inf }
  0xe8   :  { %v429_v22 = vpop.f32.mrf.mxu1  ;;  %462 = vmax.xlane.f32.xlu1 %v461_v20  ;;  %459 = vmax.xlane.f32.xlu0 %v458_v21  ;;  %v383_v23 = vpop.f32.mrf.mxu0  ;;  %v53_v21 = vld [vmem:[%s1351_s2 + $0x30] sm:$0xff] }
  0xe9   :  { %v61_v22 = vpack.c.bf16 %v53_v21, %v53_v21  ;;  %v54_v23 = vld [vmem:[%s1351_s2 + $0x38] sm:$0xff] }
  0xea   :  { %v1006_v24 = vpop.f32.mrf.mxu0  ;;  %v1012_v25 = vpop.f32.mrf.mxu1 }
  0xeb   :  { %v817_v24 = vsel %vm539_vm2, %v61_v22, 0  ;;  %v62_v25 = vpack.c.bf16 %v54_v23, %v54_v23 }
 0x159   :  { %v442_v26 = vpop.xlane.xlu0 %441 }
 0x15a   :  { %v464_v27 = vsub.f32 %v432_v43, %v442_v26  ;;  %v863_v26 = vsel %vm539_vm2, %v62_v25, 0 }
 0x15c   :  { %v472_v28 = vmul.f32 1.442695, %v464_v27 }
 0x15d   :  { %v445_v29 = vpop.xlane.xlu0 %444 }
 0x15e   :  { %1063 = vpow2.f32 %v472_v28  ;;  %v465_v30 = vsub.f32 %v433_v44, %v445_v29 }
 0x160   :  { %v474_v31 = vmul.f32 1.442695, %v465_v30 }
 0x161   :  { %v448_v32 = vpop.xlane.xlu1 %447 }
 0x162   :  { %1065 = vpow2.f32 %v474_v31  ;;  %v466_v33 = vsub.f32 %v434_v56, %v448_v32 }
 0x164   :  { %v476_v34 = vmul.f32 1.442695, %v466_v33 }
 0x165   :  { %v451_v35 = vpop.xlane.xlu1 %450 }
 0x166   :  { %1067 = vpow2.f32 %v476_v34  ;;  %v467_v36 = vsub.f32 %v435_v55, %v451_v35 }
 0x168   :  { %v478_v37 = vmul.f32 1.442695, %v467_v36 }
 0x169   :  { %v457_v38 = vpop.xlane.xlu1 %456  ;;  %v454_v39 = vpop.xlane.xlu0 %453 }
 0x16a   :  { %1069 = vpow2.f32 %v478_v37  ;;  %v469_v40 = vsub.f32 %v437_v4, %v457_v38  ;;  %v468_v41 = vsub.f32 %v436_v5, %v454_v39  ;;  %v55_v4 = vpack.c.bf16 %v47_v63, %v47_v63 }
 0x16b   :  { %v1219_v42 = vpop.eup %1063  ;;  %v56_v5 = vpack.c.bf16 %v48_v1, %v48_v1 }
 0x16c   :  { %v482_v43 = vmul.f32 1.442695, %v469_v40  ;;  %v480_v45 = vmul.f32 1.442695, %v468_v41  ;;  %v488_v44 = vsel %vm63_vm0, %v1219_v42, 0.0  ;;  %v541_v7 = vsel %vm539_vm2, %v55_v4, 0 }
 0x16d   :  { %489 = vadd.xlane.f32.xlu0 %v488_v44  ;;  %v587_v8 = vsel %vm539_vm2, %v56_v5, 0  ;;  %1014 = vmatpush3.bf16.msra.mxu0 %v541_v7 }
 0x16e   :  { %1071 = vpow2.f32 %v482_v43  ;;  %1020 = vmatpush3.bf16.msra.mxu1 %v587_v8  ;;  %1025 = vmatprep.subr.bf16.mxu0 %v1095_v0 }
 0x16f   :  { %v1223_v46 = vpop.eup %1065  ;;  %1073 = vpow2.f32 %v480_v45  ;;  %1031 = vmatprep.subr.bf16.mxu1 %v1095_v0 }
 0x170   :  { %v491_v47 = vsel %vm63_vm0, %v1223_v46, 0.0 }
 0x171   :  { %492 = vadd.xlane.f32.xlu1 %v491_v47  ;;  %v463_v48 = vpop.xlane.xlu1 %462  ;;  %v460_v49 = vpop.xlane.xlu0 %459 }
 0x172   :  { %v471_v50 = vsub.f32 %v439_v17, %v463_v48  ;;  %v470_v51 = vsub.f32 %v438_v16, %v460_v49  ;;  %v59_v16 = vpack.c.bf16 %v51_v15, %v51_v15  ;;  %v52_v17 = vld [vmem:[%s1351_s2 + $0x28] sm:$0xff] }
 0x173   :  { %v1227_v52 = vpop.eup %1067  ;;  %v60_v19 = vpack.c.bf16 %v52_v17, %v52_v17 }
 0x174   :  { %v486_v53 = vmul.f32 1.442695, %v471_v50  ;;  %v484_v54 = vmul.f32 1.442695, %v470_v51  ;;  %v494_v55 = vsel %vm63_vm0, %v1227_v52, 0.0  ;;  %v725_v18 = vsel %vm539_vm2, %v59_v16, 0 }
 0x175   :  { %495 = vadd.xlane.f32.xlu0 %v494_v55  ;;  %v771_v20 = vsel %vm539_vm2, %v60_v19, 0 }
 0x176   :  { %1075 = vpow2.f32 %v486_v53 }
 0x177   :  { %v1231_v56 = vpop.eup %1069  ;;  %1077 = vpow2.f32 %v484_v54 }
 0x178   :  { %v497_v57 = vsel %vm63_vm0, %v1231_v56, 0.0 }
 0x179   :  { %498 = vadd.xlane.f32.xlu1 %v497_v57 }
 0x17b   :  { %v1235_v58 = vpop.eup %1071 }
 0x17c   :  { %v1237_v59 = vpop.eup %1073  ;;  %v503_v60 = vsel %vm63_vm0, %v1235_v58, 0.0 }
 0x17d   :  { %504 = vadd.xlane.f32.xlu1 %v503_v60  ;;  %v500_v61 = vsel %vm63_vm0, %v1237_v59, 0.0 }
 0x17e   :  { %501 = vadd.xlane.f32.xlu0 %v500_v61 }
 0x183   :  { %v1243_v62 = vpop.eup %1075 }
 0x184   :  { %v1251_v2 = vpop.eup %1077  ;;  %v509_v3 = vsel %vm63_vm0, %v1243_v62, 0.0 }
 0x185   :  { %510 = vadd.xlane.f32.xlu1 %v509_v3  ;;  %v506_v6 = vsel %vm63_vm0, %v1251_v2, 0.0 }
 0x186   :  { %507 = vadd.xlane.f32.xlu0 %v506_v6 }
 0x1f6   :  { %v490_v27 = vpop.xlane.xlu0 %489 }
 0x1f7   :  { %1079 = vrcp.f32 %v490_v27 }
 0x1fa   :  { %v493_v28 = vpop.xlane.xlu1 %492 }
 0x1fb   :  { %1081 = vrcp.f32 %v493_v28 }
 0x1fe   :  { %v496_v29 = vpop.xlane.xlu0 %495 }
 0x1ff   :  { %1083 = vrcp.f32 %v496_v29 }
 0x202   :  { %v499_v30 = vpop.xlane.xlu1 %498 }
 0x203   :  { %1085 = vrcp.f32 %v499_v30 }
 0x204   :  { %v1080_v31 = vpop.eup %1079 }
 0x205   :  { %v520_v32 = vmul.f32 %v1080_v31, %v1219_v42 }
 0x206   :  { %v505_v33 = vpop.xlane.xlu1 %504 }
 0x207   :  { %1087 = vrcp.f32 %v505_v33  ;;  %v502_v34 = vpop.xlane.xlu0 %501  ;;  %v528_v35 = vpack.c.bf16 %v520_v32, %v520_v32 }
 0x208   :  { %v1082_v36 = vpop.eup %1081  ;;  %1089 = vrcp.f32 %v502_v34 }
 0x209   :  { %1016 = vmatmul.mubr.msk.bf16.vlgmr.msra.gmra.mxu0 %vm63_vm0, %v528_v35  ;;  %v521_v37 = vmul.f32 %v1082_v36, %v1223_v46 }
 0x20a   :  { %1026 = vmatpush3.bf16.msra.mxu0 %v633_v13  ;;  %1027 = vmatprep.mubr.msk.bf16.mxu0 %vm1096_vm1, %v1095_v0 }
 0x20b   :  { %v529_v38 = vpack.c.bf16 %v521_v37, %v521_v37  ;;  %1037 = vmatprep.subr.bf16.mxu0 %v1095_v0 }
 0x20c   :  { %v1084_v39 = vpop.eup %1083 }
 0x20d   :  { %1022 = vmatmul.mubr.msk.bf16.vlgmr.msra.gmra.mxu1 %vm63_vm0, %v529_v38  ;;  %v522_v40 = vmul.f32 %v1084_v39, %v1227_v52 }
 0x20e   :  { %1032 = vmatpush3.bf16.msra.mxu1 %v679_v14  ;;  %v511_v41 = vpop.xlane.xlu1 %510  ;;  %1033 = vmatprep.mubr.msk.bf16.mxu1 %vm1096_vm1, %v1095_v0 }
 0x20f   :  { %1091 = vrcp.f32 %v511_v41  ;;  %v508_v42 = vpop.xlane.xlu0 %507  ;;  %v530_v43 = vpack.c.bf16 %v522_v40, %v522_v40  ;;  %1043 = vmatprep.subr.bf16.mxu1 %v1095_v0 }
 0x210   :  { %v1086_v45 = vpop.eup %1085  ;;  %1093 = vrcp.f32 %v508_v42 }
 0x211   :  { %1028 = vmatmul.mubr.msk.bf16.vlgmr.msra.gmra.mxu0 %vm63_vm0, %v530_v43  ;;  %v523_v44 = vmul.f32 %v1086_v45, %v1231_v56 }
 0x212   :  { %1038 = vmatpush3.bf16.msra.mxu0 %v725_v18  ;;  %1039 = vmatprep.mubr.msk.bf16.mxu0 %vm1096_vm1, %v1095_v0 }
 0x213   :  { %v531_v46 = vpack.c.bf16 %v523_v44, %v523_v44  ;;  %1049 = vmatprep.subr.bf16.mxu0 %v1095_v0 }
 0x214   :  { %v1088_v47 = vpop.eup %1087 }
 0x215   :  { %v1090_v48 = vpop.eup %1089  ;;  %1034 = vmatmul.mubr.msk.bf16.vlgmr.msra.gmra.mxu1 %vm63_vm0, %v531_v46  ;;  %v525_v50 = vmul.f32 %v1088_v47, %v1235_v58 }
 0x216   :  { %1044 = vmatpush3.bf16.msra.mxu1 %v771_v20  ;;  %v524_v49 = vmul.f32 %v1090_v48, %v1237_v59  ;;  %1045 = vmatprep.mubr.msk.bf16.mxu1 %vm1096_vm1, %v1095_v0 }
 0x217   :  { %1055 = vmatprep.subr.bf16.mxu1 %v1095_v0  ;;  %v533_v52 = vpack.c.bf16 %v525_v50, %v525_v50 }
 0x218   :  { %v532_v51 = vpack.c.bf16 %v524_v49, %v524_v49 }
 0x21a   :  { %1040 = vmatmul.mubr.msk.bf16.vlgmr.msra.gmra.mxu0 %vm63_vm0, %v532_v51 }
 0x21b   :  { %1050 = vmatpush3.bf16.msra.mxu0 %v817_v24  ;;  %1051 = vmatprep.mubr.msk.bf16.mxu0 %vm1096_vm1, %v1095_v0 }
 0x21c   :  { %v1092_v53 = vpop.eup %1091 }
 0x21d   :  { %v1094_v54 = vpop.eup %1093  ;;  %1046 = vmatmul.mubr.msk.bf16.vlgmr.msra.gmra.mxu1 %vm63_vm0, %v533_v52  ;;  %v527_v56 = vmul.f32 %v1092_v53, %v1243_v62 }
 0x21e   :  { %1056 = vmatpush3.bf16.msra.mxu1 %v863_v26  ;;  %v526_v55 = vmul.f32 %v1094_v54, %v1251_v2  ;;  %1057 = vmatprep.mubr.msk.bf16.mxu1 %vm1096_vm1, %v1095_v0 }
 0x21f   :  { %v535_v58 = vpack.c.bf16 %v527_v56, %v527_v56 }
 0x220   :  { %v534_v57 = vpack.c.bf16 %v526_v55, %v526_v55 }
 0x222   :  { %1052 = vmatmul.mubr.msk.bf16.vlgmr.msra.gmra.mxu0 %vm63_vm0, %v534_v57 }
 0x225   :  { %1058 = vmatmul.mubr.msk.bf16.vlgmr.msra.gmra.mxu1 %vm63_vm0, %v535_v58 }
 0x2c9   :  { %v577_v59 = vpop.f32.mrf.mxu0 }
 0x2ca   :  { %905 = vst.msk [vmem:[%s1352_s3] sm:$0xff] %vm63_vm0, %v577_v59 }
 0x2cb   :  { %v1017_v60 = vpop.f32.mrf.mxu0 }
 0x2cd   :  { %v580_v61 = vpop.f32.mrf.mxu0  ;;  %v623_v63 = vpop.f32.mrf.mxu1 }
 0x2ce   :  { %906 = vst.msk [vmem:[%s1352_s3 + $0x8] sm:$0xff] %vm63_vm0, %v623_v63 }
 0x2cf   :  { %v1018_v0 = vpop.f32.mrf.mxu0  ;;  %v1023_v62 = vpop.f32.mrf.mxu1 }
 0x2d1   :  { %v626_v1 = vpop.f32.mrf.mxu1  ;;  %v669_v2 = vpop.f32.mrf.mxu0 }
 0x2d2   :  { %907 = vst.msk [vmem:[%s1352_s3 + $0x10] sm:$0xff] %vm63_vm0, %v669_v2 }
 0x2d3   :  { %v1024_v3 = vpop.f32.mrf.mxu1  ;;  %v1029_v4 = vpop.f32.mrf.mxu0 }
 0x2d5   :  { %v672_v5 = vpop.f32.mrf.mxu0  ;;  %v715_v6 = vpop.f32.mrf.mxu1 }
 0x2d6   :  { %908 = vst.msk [vmem:[%s1352_s3 + $0x18] sm:$0xff] %vm63_vm0, %v715_v6 }
 0x2d7   :  { %v1030_v7 = vpop.f32.mrf.mxu0  ;;  %v1035_v8 = vpop.f32.mrf.mxu1 }
 0x2d9   :  { %v718_v9 = vpop.f32.mrf.mxu1 }
 0x2da   :  { %v761_v10 = vpop.f32.mrf.mxu0 }
 0x2db   :  { %909 = vst.msk [vmem:[%s1352_s3 + $0x20] sm:$0xff] %vm63_vm0, %v761_v10  ;;  %v1036_v11 = vpop.f32.mrf.mxu1 }
 0x2dc   :  { %v1041_v12 = vpop.f32.mrf.mxu0 }
 0x2dd   :  { %v807_v13 = vpop.f32.mrf.mxu1 }
 0x2de   :  { %v764_v14 = vpop.f32.mrf.mxu0  ;;  %910 = vst.msk [vmem:[%s1352_s3 + $0x28] sm:$0xff] %vm63_vm0, %v807_v13 }
 0x2df   :  { %v1047_v15 = vpop.f32.mrf.mxu1 }
 0x2e0   :  { %v1042_v16 = vpop.f32.mrf.mxu0 }
 0x2e1   :  { %v810_v17 = vpop.f32.mrf.mxu1 }
 0x2e2   :  { %v853_v18 = vpop.f32.mrf.mxu0 }
 0x2e3   :  { %911 = vst.msk [vmem:[%s1352_s3 + $0x30] sm:$0xff] %vm63_vm0, %v853_v18  ;;  %v1048_v19 = vpop.f32.mrf.mxu1 }
 0x2e4   :  { %v1053_v20 = vpop.f32.mrf.mxu0 }
 0x2e5   :  { %v899_v21 = vpop.f32.mrf.mxu1 }
 0x2e6   :  { %v856_v22 = vpop.f32.mrf.mxu0  ;;  %912 = vst.msk [vmem:[%s1352_s3 + $0x38] sm:$0xff] %vm63_vm0, %v899_v21 }
 0x2e7   :  { %v1059_v23 = vpop.f32.mrf.mxu1 }
 0x2e8   :  { %v1054_v24 = vpop.f32.mrf.mxu0 }
 0x2e9   :  { %v902_v25 = vpop.f32.mrf.mxu1 }
 0x2eb   :  { %v1060_v26 = vpop.f32.mrf.mxu1 }

// kernel: myformer_forward.19
= control target key start
LH: loop header
LB: loop body
LE: loop exit
PB: predicated region body
PF: predicated region fallthrough
CT: control target
= control target key end

     0   :  { %v470_v0 = vmov 0.0   ;;  %vm471_vm0 = vmmov 0   ;;  %vm76_vm1 = vcmask 261120   ;;  %vm294_vm2 = vcmask 523264   ;;  %s633_s12 = inlined_call_operand.vmem [shape: f32[1,32], index: 12, kind: input, shape index: {}]   ;;  %s634_s13 = inlined_call_operand.vmem [shape: f32[1,32], index: 13, kind: input, shape index: {}]   ;;  %s635_s2 = inlined_call_operand.vmem [shape: bf16[32,32], index: 2, kind: input, shape index: {}]   ;;  %s636_s1 = inlined_call_operand.vmem [shape: f32[16,32], index: 1, kind: input, shape index: {}]   ;;  %s637_s3 = inlined_call_operand.vmem [shape: f32[1,32], index: 3, kind: input, shape index: {}]   ;;  %s638_s0 = inlined_call_operand.vmem [shape: f32[16,32], index: 0, kind: input, shape index: {}]   ;;  %s639_s4 = inlined_call_operand.vmem [shape: bf16[32,64], index: 4, kind: input, shape index: {}]   ;;  %s640_s8 = inlined_call_operand.vmem [shape: f32[1,32], index: 8, kind: input, shape index: {}]   ;;  %s641_s9 = inlined_call_operand.vmem [shape: f32[1,32], index: 9, kind: input, shape index: {}]   ;;  %s642_s6 = inlined_call_operand.vmem [shape: bf16[64,32], index: 6, kind: input, shape index: {}]   ;;  %s643_s5 = inlined_call_operand.vmem [shape: f32[1,64], index: 5, kind: input, shape index: {}]   ;;  %s644_s7 = inlined_call_operand.vmem [shape: f32[1,32], index: 7, kind: input, shape index: {}]   ;;  %s645_s10 = inlined_call_operand.vmem [shape: f32[1,32], index: 10, kind: input, shape index: {}]   ;;  %s646_s11 = inlined_call_operand.vmem [shape: f32[1,32], index: 11, kind: input, shape index: {}]   ;;  %s647_s14 = inlined_call_operand.vmem [shape: f32[16,32], index: 14, kind: output, shape index: {}]  }
   0x1   :  { %420 = vmatprep.subr.bf16.mxu1 %v470_v0  ;;  %v450_v1 = vld [vmem:[%s635_s2 + $0x8] sm:$0xff]   ;;  %424 = vmatprep.mubr.msk.bf16.mxu1 %vm471_vm0, %v470_v0  ;;  %v451_v2 = vld [vmem:[%s635_s2] sm:$0xff]   ;;  %v454_v48 = vld [vmem:[%s642_s6 + $0x18] sm:$0xff]  }
   0x2   :  { %436 = vmatprep.subr.bf16.mxu0 %v470_v0  ;;  %444 = vmatprep.mubr.msk.bf16.mxu0 %vm471_vm0, %v470_v0  ;;  %v50_v3 = vld [vmem:[%s636_s1] sm:$0xff]  ;;  %v51_v4 = vld [vmem:[%s636_s1 + $0x8] sm:$0xff]  ;;  %v455_v49 = vld [vmem:[%s642_s6 + $0x10] sm:$0xff]  }
   0x3   :  { %421 = vmatpush3.bf16.msra.mxu1 %v450_v1  ;;  %v52_v5 = vpack.c.bf16 %v51_v4, %v50_v3  ;;  %v391_v6 = vld [vmem:[%s637_s3] ss:$0 sm:$0xff]  ;;  %v49_v13 = vld [vmem:[%s638_s0 + $0x8] sm:$0xff]  ;;  %437 = vmatpush3.bf16.msra.mxu0 %v454_v48 }
   0x4   :  { %422 = vmatprep.subr.bf16.mxu1 %v470_v0  ;;  %v48_v8 = vld [vmem:[%s638_s0] sm:$0xff]  ;;  %v452_v29 = vld [vmem:[%s639_s4 + $0x8] sm:$0xff]   ;;  %438 = vmatprep.subr.bf16.mxu0 %v470_v0 }
   0x5   :  { %v453_v30 = vld [vmem:[%s639_s4] sm:$0xff]   ;;  %v456_v50 = vld [vmem:[%s642_s6 + $0x8] sm:$0xff]  }
   0x6   :  { %v395_v39 = vld [vmem:[%s640_s8] ss:$0 sm:$0xff] }
   0x7   :  { %423 = vmatpush3.bf16.msra.mxu1 %v451_v2  ;;  %v396_v43 = vld [vmem:[%s641_s9] ss:$0 sm:$0xff]  ;;  %439 = vmatpush3.bf16.msra.mxu0 %v455_v49 }
   0x8   :  { %428 = vmatprep.subr.bf16.mxu1 %v470_v0  ;;  %440 = vmatprep.subr.bf16.mxu0 %v470_v0  ;;  %v457_v51 = vld [vmem:[%s642_s6] sm:$0xff]  }
   0x9   :  { %v397_v52 = vld [vmem:[%s643_s5] ss:$0 sm:$0xff] }
   0xa   :  { %425 = vmatmul.mubr.msk.bf16.vlgmr.msra.gmra.mxu1 %vm76_vm1, %v52_v5 }
   0xb   :  { %432 = vmatprep.mubr.msk.bf16.mxu1 %vm471_vm0, %v470_v0  ;;  %429 = vmatpush3.bf16.msra.mxu1 %v452_v29 }
   0xc   :  { %430 = vmatprep.subr.bf16.mxu1 %v470_v0  ;;  %441 = vmatpush3.bf16.msra.mxu0 %v456_v50 }
   0xd   :  { %442 = vmatprep.subr.bf16.mxu0 %v470_v0 }
   0xf   :  { %431 = vmatpush3.bf16.msra.mxu1 %v453_v30 }
  0x10   :  { %443 = vmatpush3.bf16.msra.mxu0 %v457_v51 }
  0xca   :  { %v114_v7 = vpop.f32.mrf.mxu1 }
  0xcb   :  { %v115_v9 = vadd.f32 %v391_v6, %v114_v7 }
  0xcc   :  { %v426_v10 = vpop.f32.mrf.mxu1 }
  0xcd   :  { %v121_v11 = vadd.f32 %v115_v9, %v48_v8 }
  0xce   :  { %v117_v12 = vpop.f32.mrf.mxu1 }
  0xcf   :  { %v118_v14 = vadd.f32 %v391_v6, %v117_v12  ;;  %v125_v15 = vsel %vm76_vm1, %v121_v11, 0.0 }
  0xd0   :  { %v427_v16 = vpop.f32.mrf.mxu1  ;;  %126 = vadd.xlane.f32.xlu0 %v125_v15 }
  0xd1   :  { %v122_v17 = vadd.f32 %v118_v14, %v49_v13  ;;  %v401_v14 = vld [vmem:[%s644_s7] ss:$0 sm:$0xff] }
  0xd3   :  { %v128_v18 = vsel %vm76_vm1, %v122_v17, 0.0 }
  0xd4   :  { %129 = vadd.xlane.f32.xlu0 %v128_v18 }
 0x159   :  { %v127_v19 = vpop.xlane.xlu0 %126 }
 0x15a   :  { %v132_v20 = vmul.f32 0.03125, %v127_v19 }
 0x15c   :  { %v134_v21 = vsub.f32 %v121_v11, %v132_v20 }
 0x15d   :  { %v130_v22 = vpop.xlane.xlu0 %129 }
 0x15e   :  { %v133_v23 = vmul.f32 0.03125, %v130_v22  ;;  %v136_v24 = vmul.f32 %v134_v21, %v134_v21 }
 0x160   :  { %v135_v25 = vsub.f32 %v122_v17, %v133_v23  ;;  %v138_v26 = vsel %vm76_vm1, %v136_v24, 0.0 }
 0x161   :  { %139 = vadd.xlane.f32.xlu1 %v138_v26 }
 0x162   :  { %v137_v27 = vmul.f32 %v135_v25, %v135_v25 }
 0x164   :  { %v141_v28 = vsel %vm76_vm1, %v137_v27, 0.0 }
 0x165   :  { %142 = vadd.xlane.f32.xlu1 %v141_v28 }
 0x1ea   :  { %v140_v31 = vpop.xlane.xlu1 %139 }
 0x1eb   :  { %v144_v32 = vmul.f32 0.03125, %v140_v31 }
 0x1ed   :  { %v146_v33 = vadd.f32 1e-05, %v144_v32 }
 0x1ee   :  { %v143_v34 = vpop.xlane.xlu1 %142 }
 0x1ef   :  { %458 = vrsqrt.f32 %v146_v33  ;;  %v145_v35 = vmul.f32 0.03125, %v143_v34 }
 0x1f1   :  { %v147_v36 = vadd.f32 1e-05, %v145_v35 }
 0x1f3   :  { %460 = vrsqrt.f32 %v147_v36 }
 0x1fc   :  { %v459_v37 = vpop.eup %458 }
 0x1fd   :  { %v150_v38 = vmul.f32 %v459_v37, %v134_v21 }
 0x1ff   :  { %v158_v42 = vmul.f32 %v395_v39, %v150_v38 }
 0x200   :  { %v461_v40 = vpop.eup %460 }
 0x201   :  { %v151_v41 = vmul.f32 %v461_v40, %v135_v25  ;;  %v166_v45 = vadd.f32 %v396_v43, %v158_v42  ;;  %v407_v42 = vld [vmem:[%s645_s10] ss:$0 sm:$0xff] }
 0x203   :  { %v159_v44 = vmul.f32 %v395_v39, %v151_v41 }
 0x205   :  { %v167_v46 = vadd.f32 %v396_v43, %v159_v44  ;;  %v408_v44 = vld [vmem:[%s646_s11] ss:$0 sm:$0xff] }
 0x207   :  { %v168_v47 = vpack.c.bf16 %v167_v46, %v166_v45 }
 0x209   :  { %433 = vmatmul.mubr.msk.bf16.vlgmr.msra.gmra.mxu1 %vm76_vm1, %v168_v47 }
 0x2c9   :  { %v229_v53 = vpop.f32.mrf.mxu1 }
 0x2ca   :  { %v230_v54 = vadd.f32 %v397_v52, %v229_v53 }
 0x2cb   :  { %v434_v55 = vpop.f32.mrf.mxu1 }
 0x2cc   :  { %v238_v56 = vmul.f32 0.044715, %v230_v54  ;;  %v236_v8 = vmul.f32 0.5, %v230_v54 }
 0x2cd   :  { %v232_v57 = vpop.f32.mrf.mxu1 }
 0x2ce   :  { %v240_v58 = vmul.f32 %v238_v56, %v230_v54  ;;  %v233_v59 = vadd.f32 %v397_v52, %v232_v57 }
 0x2cf   :  { %v435_v60 = vpop.f32.mrf.mxu1 }
 0x2d0   :  { %v242_v61 = vmul.f32 %v240_v58, %v230_v54  ;;  %v239_v62 = vmul.f32 0.044715, %v233_v59  ;;  %v237_v9 = vmul.f32 0.5, %v233_v59 }
 0x2d2   :  { %v244_v63 = vadd.f32 %v242_v61, %v230_v54  ;;  %v241_v1 = vmul.f32 %v239_v62, %v233_v59 }
 0x2d4   :  { %v246_v2 = vmul.f32 0.7978846, %v244_v63  ;;  %v243_v3 = vmul.f32 %v241_v1, %v233_v59 }
 0x2d6   :  { %462 = vtanh.f32 %v246_v2  ;;  %v245_v0 = vadd.f32 %v243_v3, %v233_v59 }
 0x2d8   :  { %v247_v4 = vmul.f32 0.7978846, %v245_v0 }
 0x2da   :  { %464 = vtanh.f32 %v247_v4 }
 0x2e3   :  { %v463_v5 = vpop.eup %462 }
 0x2e4   :  { %v250_v6 = vadd.f32 1.0, %v463_v5 }
 0x2e6   :  { %v252_v11 = vmul.f32 %v250_v6, %v236_v8 }
 0x2e7   :  { %v465_v7 = vpop.eup %464 }
 0x2e8   :  { %v251_v10 = vadd.f32 1.0, %v465_v7 }
 0x2ea   :  { %v253_v12 = vmul.f32 %v251_v10, %v237_v9 }
 0x2ec   :  { %v254_v13 = vpack.c.bf16 %v253_v12, %v252_v11 }
 0x2ee   :  { %445 = vmatmul.mubr.msk.bf16.vlgmr.msra.gmra.mxu0 %vm294_vm2, %v254_v13 }
 0x3ae   :  { %v332_v15 = vpop.f32.mrf.mxu0 }
 0x3af   :  { %v333_v16 = vadd.f32 %v401_v14, %v332_v15 }
 0x3b0   :  { %v446_v17 = vpop.f32.mrf.mxu0 }
 0x3b1   :  { %v339_v18 = vadd.f32 %v333_v16, %v166_v45 }
 0x3b2   :  { %v335_v19 = vpop.f32.mrf.mxu0 }
 0x3b3   :  { %v336_v20 = vadd.f32 %v401_v14, %v335_v19  ;;  %v343_v21 = vsel %vm76_vm1, %v339_v18, 0.0 }
 0x3b4   :  { %344 = vadd.xlane.f32.xlu0 %v343_v21  ;;  %v447_v22 = vpop.f32.mrf.mxu0 }
 0x3b5   :  { %v340_v23 = vadd.f32 %v336_v20, %v167_v46 }
 0x3b7   :  { %v346_v24 = vsel %vm76_vm1, %v340_v23, 0.0 }
 0x3b8   :  { %347 = vadd.xlane.f32.xlu1 %v346_v24 }
 0x43d   :  { %v345_v25 = vpop.xlane.xlu0 %344 }
 0x43e   :  { %v349_v26 = vmul.f32 0.03125, %v345_v25 }
 0x440   :  { %v351_v27 = vsub.f32 %v339_v18, %v349_v26 }
 0x441   :  { %v348_v28 = vpop.xlane.xlu1 %347 }
 0x442   :  { %v350_v29 = vmul.f32 0.03125, %v348_v28  ;;  %v353_v30 = vmul.f32 %v351_v27, %v351_v27 }
 0x444   :  { %v352_v31 = vsub.f32 %v340_v23, %v350_v29  ;;  %v355_v32 = vsel %vm76_vm1, %v353_v30, 0.0 }
 0x445   :  { %356 = vadd.xlane.f32.xlu0 %v355_v32 }
 0x446   :  { %v354_v33 = vmul.f32 %v352_v31, %v352_v31 }
 0x448   :  { %v358_v34 = vsel %vm76_vm1, %v354_v33, 0.0 }
 0x449   :  { %359 = vadd.xlane.f32.xlu1 %v358_v34 }
 0x4ce   :  { %v357_v35 = vpop.xlane.xlu0 %356 }
 0x4cf   :  { %v361_v36 = vmul.f32 0.03125, %v357_v35 }
 0x4d1   :  { %v363_v37 = vadd.f32 1e-05, %v361_v36 }
 0x4d2   :  { %v360_v38 = vpop.xlane.xlu1 %359 }
 0x4d3   :  { %466 = vrsqrt.f32 %v363_v37  ;;  %v362_v39 = vmul.f32 0.03125, %v360_v38 }
 0x4d5   :  { %v364_v40 = vadd.f32 1e-05, %v362_v39 }
 0x4d7   :  { %468 = vrsqrt.f32 %v364_v40 }
 0x4e0   :  { %v467_v41 = vpop.eup %466 }
 0x4e1   :  { %v367_v43 = vmul.f32 %v467_v41, %v351_v27 }
 0x4e3   :  { %v375_v45 = vmul.f32 %v407_v42, %v367_v43 }
 0x4e4   :  { %v469_v46 = vpop.eup %468 }
 0x4e5   :  { %v383_v47 = vadd.f32 %v408_v44, %v375_v45  ;;  %v368_v48 = vmul.f32 %v469_v46, %v352_v31 }
 0x4e7   :  { %385 = vst.msk [vmem:[%s647_s14] sm:$0xff] %vm76_vm1, %v383_v47  ;;  %v376_v49 = vmul.f32 %v407_v42, %v368_v48 }
 0x4e9   :  { %v384_v50 = vadd.f32 %v408_v44, %v376_v49 }
 0x4eb   :  { %386 = vst.msk [vmem:[%s647_s14 + $0x8] sm:$0xff] %vm76_vm1, %v384_v50 }

// kernel: myformer_forward.21
= control target key start
LH: loop header
LB: loop body
LE: loop exit
PB: predicated region body
PF: predicated region fallthrough
CT: control target
= control target key end

     0   :  { %v109_v0 = vmov 0.0   ;;  %vm110_vm0 = vmmov 0   ;;  %vm40_vm1 = vcmask 261120   ;;  %vm84_vm2 = vcmask 785408   ;;  %s146_s1 = inlined_call_operand.vmem [shape: bf16[32,96], index: 1, kind: input, shape index: {}]   ;;  %s147_s0 = inlined_call_operand.vmem [shape: f32[8,32], index: 0, kind: input, shape index: {}]   ;;  %s148_s2 = inlined_call_operand.vmem [shape: f32[1,96], index: 2, kind: input, shape index: {}]   ;;  %s149_s3 = inlined_call_operand.vmem [shape: f32[8,96], index: 3, kind: output, shape index: {}]  }
   0x1   :  { %97 = vmatprep.subr.bf16.mxu0 %v109_v0  ;;  %v107_v1 = vld [vmem:[%s146_s1 + $0x8] sm:$0xff]   ;;  %101 = vmatprep.mubr.msk.bf16.mxu0 %vm110_vm0, %v109_v0  ;;  %v108_v2 = vld [vmem:[%s146_s1] sm:$0xff]  }
   0x2   :  { %98 = vmatpush3.bf16.msra.mxu0 %v107_v1  ;;  %v15_v3 = vld [vmem:[%s147_s0] sm:$0xff] }
   0x3   :  { %99 = vmatprep.subr.bf16.mxu0 %v109_v0  ;;  %v16_v4 = vpack.c.bf16 %v15_v3, %v15_v3  ;;  %v90_v5 = vld [vmem:[%s148_s2] ss:$0 sm:$0xff] }
   0x6   :  { %100 = vmatpush3.bf16.msra.mxu0 %v108_v2 }
   0x9   :  { %102 = vmatmul.mubr.msk.bf16.vlgmr.msra.gmra.mxu0 %vm40_vm1, %v16_v4 }
  0xc9   :  { %v78_v6 = vpop.f32.mrf.mxu0 }
  0xca   :  { %v79_v7 = vadd.f32 %v90_v5, %v78_v6 }
  0xcb   :  { %v103_v8 = vpop.f32.mrf.mxu0 }
  0xcc   :  { %85 = vst.msk [vmem:[%s149_s3] sm:$0xff] %vm84_vm2, %v79_v7 }
  0xcd   :  { %v81_v9 = vpop.f32.mrf.mxu0 }
  0xcf   :  { %v104_v10 = vpop.f32.mrf.mxu0 }

// kernel: myformer_forward.23
= control target key start
LH: loop header
LB: loop body
LE: loop exit
PB: predicated region body
PF: predicated region fallthrough
CT: control target
= control target key end

     0   :  { %v484_v1 = vmov 0.0   ;;  %vm485_vm0 = vmmov 0   ;;  %vm75_vm1 = vcmask 261120   ;;  %s631_s0 = inlined_call_operand.vmem [shape: f32[8,32], index: 0, kind: input, shape index: {}]   ;;  %s632_s1 = inlined_call_operand.vmem [shape: f32[8,32], index: 1, kind: input, shape index: {}]   ;;  %s633_s2 = inlined_call_operand.vmem [shape: bf16[32,32], index: 2, kind: input, shape index: {}]   ;;  %s634_s3 = inlined_call_operand.vmem [shape: f32[1,32], index: 3, kind: input, shape index: {}]   ;;  %s635_s4 = inlined_call_operand.vmem [shape: bf16[32,64], index: 4, kind: input, shape index: {}]   ;;  %s636_s5 = inlined_call_operand.vmem [shape: f32[1,64], index: 5, kind: input, shape index: {}]   ;;  %s637_s6 = inlined_call_operand.vmem [shape: bf16[64,32], index: 6, kind: input, shape index: {}]   ;;  %s638_s7 = inlined_call_operand.vmem [shape: f32[1,32], index: 7, kind: input, shape index: {}]   ;;  %s639_s8 = inlined_call_operand.vmem [shape: f32[1,32], index: 8, kind: input, shape index: {}]   ;;  %s640_s9 = inlined_call_operand.vmem [shape: f32[1,32], index: 9, kind: input, shape index: {}]   ;;  %s641_s10 = inlined_call_operand.vmem [shape: f32[1,32], index: 10, kind: input, shape index: {}]   ;;  %s642_s11 = inlined_call_operand.vmem [shape: f32[1,32], index: 11, kind: input, shape index: {}]   ;;  %s643_s12 = inlined_call_operand.vmem [shape: f32[1,32], index: 12, kind: input, shape index: {}]   ;;  %s644_s13 = inlined_call_operand.vmem [shape: f32[1,32], index: 13, kind: input, shape index: {}]   ;;  %s645_s14 = inlined_call_operand.hbm [shape: f32[8,32], index: 14, kind: output, shape index: {}]  }
   0x1   :  { %v446_v0 = vld [vmem:[%s633_s2 + $0x8] sm:$0xff]   ;;  %415 = vmatprep.subr.bf16.mxu1 %v484_v1  ;;  %431 = vmatprep.subr.bf16.mxu0 %v484_v1  ;;  %v447_v2 = vld [vmem:[%s633_s2] sm:$0xff]  }
   0x2   :  { %416 = vmatpush3.bf16.msra.mxu1 %v446_v0  ;;  %419 = vmatprep.mubr.msk.bf16.mxu1 %vm485_vm0, %v484_v1  ;;  %v50_v3 = vld [vmem:[%s632_s1] sm:$0xff] }
   0x3   :  { %417 = vmatprep.subr.bf16.mxu1 %v484_v1  ;;  %439 = vmatprep.mubr.msk.bf16.mxu0 %vm485_vm0, %v484_v1  ;;  %v51_v4 = vpack.c.bf16 %v50_v3, %v50_v3 }
   0x6   :  { %418 = vmatpush3.bf16.msra.mxu1 %v447_v2 }
   0x7   :  { %19 = vsyncpa [#allocation3], 0  ;;  %423 = vmatprep.subr.bf16.mxu1 %v484_v1  ;;  %v384_v5 = vld [vmem:[%s634_s3] ss:$0 sm:$0xff]  ;;  %v448_v19 = vld [vmem:[%s635_s4 + $0x8] sm:$0xff]   ;;  %vm266_vm2 = vcmask 523264  }
   0x8   :  { %v49_v7 = vld [vmem:[%s631_s0] sm:$0xff]  ;;  %v450_v31 = vld [vmem:[%s637_s6 + $0x18] sm:$0xff]   ;;  %v451_v32 = vld [vmem:[%s637_s6 + $0x10] sm:$0xff]   ;;  %s486_s1 = smov [#allocation2]  }
   0x9   :  { %420 = vmatmul.mubr.msk.bf16.vlgmr.msra.gmra.mxu1 %vm75_vm1, %v51_v4  ;;  %v449_v20 = vld [vmem:[%s635_s4] sm:$0xff]   ;;  %432 = vmatpush3.bf16.msra.mxu0 %v450_v31  ;;  %v452_v33 = vld [vmem:[%s637_s6 + $0x8] sm:$0xff]   ;;  %s376_s3 = sshll.u32 %s486_s1, 4  ;;  %s377_s3 = int_to_ptr.vmem [resolvable:$true] %s376_s3 }
   0xa   :  { %427 = vmatprep.mubr.msk.bf16.mxu1 %vm485_vm0, %v484_v1  ;;  %424 = vmatpush3.bf16.msra.mxu1 %v448_v19  ;;  %v388_v25 = vld [vmem:[%s639_s8] ss:$0 sm:$0xff]  ;;  %s462_s0 = scalar_lea.vmem %s377_s3, 128  ;;  %p467_p1 = scmp.lt.s32.totalorder %s377_s3, %s377_s3 }
   0xb   :  { %425 = vmatprep.subr.bf16.mxu1 %v484_v1  ;;  %v389_v27 = vld [vmem:[%s640_s9] ss:$0 sm:$0xff]  ;;  %433 = vmatprep.subr.bf16.mxu0 %v484_v1  ;;  %p463_p0 = scmp.ne.s32.totalorder %s377_s3, %s462_s0  ;;  %p468_p2 = scmp.lt.s32.totalorder %s462_s0, %s462_s0 }
   0xc   :  { %v453_v34 = vld [vmem:[%s637_s6] sm:$0xff]  }
   0xd   :  { %434 = vmatpush3.bf16.msra.mxu0 %v451_v32  ;;  %v390_v35 = vld [vmem:[%s636_s5] ss:$0 sm:$0xff]  ;;  %p469_p3 = por %p468_p2, %p467_p1 }
   0xe   :  { %426 = vmatpush3.bf16.msra.mxu1 %v449_v20  ;;  %435 = vmatprep.subr.bf16.mxu0 %v484_v1  ;;  %v394_v51 = vld [vmem:[%s638_s7] ss:$0 sm:$0xff] }
   0xf   :  { %v400_v4 = vld [vmem:[%s641_s10] ss:$0 sm:$0xff]  ;;  %p470_p4 = pnand %p469_p3, %p463_p0 }
  0x10   :  { %v402_v19 = vld [vmem:[%s643_s12] ss:$0 sm:$0xff] }
  0x11   :  { %436 = vmatpush3.bf16.msra.mxu0 %v452_v33 }
  0x12   :  { %437 = vmatprep.subr.bf16.mxu0 %v484_v1 }
  0x15   :  { %438 = vmatpush3.bf16.msra.mxu0 %v453_v34 }
  0xc9   :  { %v113_v6 = vpop.f32.mrf.mxu1 }
  0xca   :  { %v114_v8 = vadd.f32 %v384_v5, %v113_v6  ;;  %v401_v6 = vld [vmem:[%s642_s11] ss:$0 sm:$0xff] }
  0xcb   :  { %v421_v9 = vpop.f32.mrf.mxu1 }
  0xcc   :  { %v119_v10 = vadd.f32 %v114_v8, %v49_v7 }
  0xcd   :  { %v116_v11 = vpop.f32.mrf.mxu1 }
  0xce   :  { %v122_v12 = vsel %vm75_vm1, %v119_v10, 0.0 }
  0xcf   :  { %v422_v13 = vpop.f32.mrf.mxu1  ;;  %123 = vadd.xlane.f32.xlu0 %v122_v12 }
 0x158   :  { %v124_v14 = vpop.xlane.xlu0 %123 }
 0x159   :  { %v126_v15 = vmul.f32 0.03125, %v124_v14 }
 0x15b   :  { %v127_v16 = vsub.f32 %v119_v10, %v126_v15 }
 0x15d   :  { %v128_v17 = vmul.f32 %v127_v16, %v127_v16 }
 0x15f   :  { %v129_v18 = vsel %vm75_vm1, %v128_v17, 0.0 }
 0x160   :  { %130 = vadd.xlane.f32.xlu0 %v129_v18 }
 0x1e9   :  { %v131_v21 = vpop.xlane.xlu0 %130 }
 0x1ea   :  { %v132_v22 = vmul.f32 0.03125, %v131_v21  ;;  %v403_v21 = vld [vmem:[%s644_s13] ss:$0 sm:$0xff] }
 0x1ec   :  { %v133_v23 = vadd.f32 1e-05, %v132_v22 }
 0x1ee   :  { %454 = vrsqrt.f32 %v133_v23 }
 0x1fb   :  { %v455_v24 = vpop.eup %454 }
 0x1fc   :  { %v135_v26 = vmul.f32 %v455_v24, %v127_v16 }
 0x1fe   :  { %v142_v28 = vmul.f32 %v388_v25, %v135_v26 }
 0x200   :  { %v149_v29 = vadd.f32 %v389_v27, %v142_v28 }
 0x202   :  { %v150_v30 = vpack.c.bf16 %v149_v29, %v149_v29 }
 0x204   :  { %428 = vmatmul.mubr.msk.bf16.vlgmr.msra.gmra.mxu1 %vm75_vm1, %v150_v30 }
 0x2c4   :  { %v211_v36 = vpop.f32.mrf.mxu1 }
 0x2c5   :  { %v212_v37 = vadd.f32 %v390_v35, %v211_v36 }
 0x2c6   :  { %v429_v38 = vpop.f32.mrf.mxu1 }
 0x2c7   :  { %v218_v39 = vmul.f32 0.044715, %v212_v37  ;;  %v217_v47 = vmul.f32 0.5, %v212_v37 }
 0x2c8   :  { %v214_v40 = vpop.f32.mrf.mxu1 }
 0x2c9   :  { %v219_v41 = vmul.f32 %v218_v39, %v212_v37 }
 0x2ca   :  { %v430_v42 = vpop.f32.mrf.mxu1 }
 0x2cb   :  { %v220_v43 = vmul.f32 %v219_v41, %v212_v37 }
 0x2cd   :  { %v221_v44 = vadd.f32 %v220_v43, %v212_v37 }
 0x2cf   :  { %v222_v45 = vmul.f32 0.7978846, %v221_v44 }
 0x2d1   :  { %456 = vtanh.f32 %v222_v45 }
 0x2de   :  { %v457_v46 = vpop.eup %456 }
 0x2df   :  { %v224_v48 = vadd.f32 1.0, %v457_v46 }
 0x2e1   :  { %v225_v49 = vmul.f32 %v224_v48, %v217_v47 }
 0x2e3   :  { %v226_v50 = vpack.c.bf16 %v225_v49, %v225_v49 }
 0x2e5   :  { %440 = vmatmul.mubr.msk.bf16.vlgmr.msra.gmra.mxu0 %vm266_vm2, %v226_v50 }
 0x3a5   :  { %v304_v52 = vpop.f32.mrf.mxu0 }
 0x3a6   :  { %v305_v53 = vadd.f32 %v394_v51, %v304_v52 }
 0x3a7   :  { %v441_v54 = vpop.f32.mrf.mxu0 }
 0x3a8   :  { %v310_v55 = vadd.f32 %v305_v53, %v149_v29 }
 0x3a9   :  { %v307_v56 = vpop.f32.mrf.mxu0 }
 0x3aa   :  { %v313_v57 = vsel %vm75_vm1, %v310_v55, 0.0 }
 0x3ab   :  { %314 = vadd.xlane.f32.xlu1 %v313_v57  ;;  %v442_v58 = vpop.f32.mrf.mxu0 }
 0x434   :  { %v315_v59 = vpop.xlane.xlu1 %314 }
 0x435   :  { %v316_v60 = vmul.f32 0.03125, %v315_v59 }
 0x437   :  { %v317_v61 = vsub.f32 %v310_v55, %v316_v60 }
 0x439   :  { %v318_v62 = vmul.f32 %v317_v61, %v317_v61 }
 0x43b   :  { %v319_v63 = vsel %vm75_vm1, %v318_v62, 0.0 }
 0x43c   :  { %320 = vadd.xlane.f32.xlu1 %v319_v63 }
 0x4c5   :  { %v321_v0 = vpop.xlane.xlu1 %320 }
 0x4c6   :  { %v322_v1 = vmul.f32 0.03125, %v321_v0 }
 0x4c8   :  { %v323_v2 = vadd.f32 1e-05, %v322_v1 }
 0x4ca   :  { %458 = vrsqrt.f32 %v323_v2 }
 0x4d7   :  { %v459_v3 = vpop.eup %458 }
 0x4d8   :  { %v325_v5 = vmul.f32 %v459_v3, %v317_v61 }
 0x4da   :  { %v332_v7 = vmul.f32 %v400_v4, %v325_v5 }
 0x4dc   :  { %v339_v8 = vadd.f32 %v401_v6, %v332_v7 }
 0x4de   :  { %v342_v9 = vsel %vm75_vm1, %v339_v8, 0.0 }
 0x4df   :  { %343 = vadd.xlane.f32.xlu0 %v342_v9 }
 0x568   :  { %v344_v10 = vpop.xlane.xlu0 %343 }
 0x569   :  { %v345_v11 = vmul.f32 0.03125, %v344_v10 }
 0x56b   :  { %v346_v12 = vsub.f32 %v339_v8, %v345_v11 }
 0x56d   :  { %v347_v13 = vmul.f32 %v346_v12, %v346_v12 }
 0x56f   :  { %v348_v14 = vsel %vm75_vm1, %v347_v13, 0.0 }
 0x570   :  { %349 = vadd.xlane.f32.xlu1 %v348_v14 }
 0x5f9   :  { %v350_v15 = vpop.xlane.xlu1 %349 }
 0x5fa   :  { %v351_v16 = vmul.f32 0.03125, %v350_v15 }
 0x5fc   :  { %v352_v17 = vadd.f32 1e-05, %v351_v16 }
 0x5fe   :  { %460 = vrsqrt.f32 %v352_v17 }
 0x60b   :  { %v461_v18 = vpop.eup %460 }
 0x60c   :  { %v354_v20 = vmul.f32 %v461_v18, %v346_v12 }
 0x60e   :  { %v361_v22 = vmul.f32 %v402_v19, %v354_v20 }
 0x610   :  { %v368_v23 = vadd.f32 %v403_v21, %v361_v22 }
 0x612   :  { %369 = vst.msk [vmem:[#allocation2] sm:$0xff] %vm75_vm1, %v368_v23 }
 0x613   :  { %473 = shalt.err (!%p470_p4)
}
 0x614   :  { %379 = dma.vmem_to_hbm [thread:$0]  %s377_s3, 128, %s645_s14, [#allocation3]  }
 0x615   :  { %482 = dma.done.wait [#allocation3], 128  }
 0x616   :  { %483 = vsyncadd [#allocation3], 4294967168 }
 0x617   :  { %383 = vsyncpa [#allocation3], 1 }

// kernel: myformer_forward.22
= control target key start
LH: loop header
LB: loop body
LE: loop exit
PB: predicated region body
PF: predicated region fallthrough
CT: control target
= control target key end

     0   :  { %v1098_v0 = vmov 0.0   ;;  %vm63_vm0 = vcmask 64512   ;;  %vm1099_vm1 = vmmov 0   ;;  %vm440_vm2 = vcmask 27648   ;;  %s1352_s1 = inlined_call_operand.vmem [shape: f32[8,4,8], index: 1, kind: input, shape index: {}]   ;;  %s1353_s0 = inlined_call_operand.vmem [shape: f32[8,4,8], index: 0, kind: input, shape index: {}]   ;;  %s1354_s2 = inlined_call_operand.vmem [shape: f32[8,4,8], index: 2, kind: input, shape index: {}]   ;;  %s1355_s3 = inlined_call_operand.vmem [shape: f32[8,4,8], index: 3, kind: output, shape index: {}]  }
   0x1   :  { %968 = vmatprep.subr.bf16.mxu0 %v1098_v0  ;;  %974 = vmatprep.subr.bf16.mxu1 %v1098_v0  ;;  %v31_v1 = vld [vmem:[%s1352_s1] sm:$0xf]  ;;  %v32_v2 = vld [vmem:[%s1352_s1 + $0x4] sm:$0xf]  ;;  %v33_v5 = vld [vmem:[%s1352_s1 + $0x8] sm:$0xf] }
   0x2   :  { %v39_v3 = vpack.c.bf16 %v31_v1, %v31_v1  ;;  %v40_v4 = vpack.c.bf16 %v32_v2, %v32_v2  ;;  %970 = vmatprep.mubr.msk.bf16.mxu0 %vm1099_vm1, %v1098_v0  ;;  %976 = vmatprep.mubr.msk.bf16.mxu1 %vm1099_vm1, %v1098_v0  ;;  %v34_v6 = vld [vmem:[%s1352_s1 + $0xc] sm:$0xf]  ;;  %v15_v9 = vld [vmem:[%s1353_s0] sm:$0xf]  ;;  %v16_v10 = vld [vmem:[%s1353_s0 + $0x4] sm:$0xf]  ;;  %v41_v11 = vpack.c.bf16 %v33_v5, %v33_v5 }
   0x3   :  { %v42_v12 = vpack.c.bf16 %v34_v6, %v34_v6  ;;  %v23_v13 = vpack.c.bf16 %v15_v9, %v15_v9  ;;  %v24_v14 = vpack.c.bf16 %v16_v10, %v16_v10  ;;  %v35_v17 = vld [vmem:[%s1352_s1 + $0x10] sm:$0xf]  ;;  %v36_v18 = vld [vmem:[%s1352_s1 + $0x14] sm:$0xf]  ;;  %v17_v19 = vld [vmem:[%s1353_s0 + $0x8] sm:$0xf] }
   0x4   :  { %v68_v7 = vsel %vm63_vm0, %v39_v3, 0  ;;  %v114_v8 = vsel %vm63_vm0, %v40_v4, 0  ;;  %v160_v15 = vsel %vm63_vm0, %v41_v11, 0  ;;  %v18_v20 = vld [vmem:[%s1353_s0 + $0xc] sm:$0xf]  ;;  %v43_v21 = vpack.c.bf16 %v35_v17, %v35_v17 }
   0x5   :  { %969 = vmatpush3.bf16.xpose.msra.mxu0 %v68_v7  ;;  %975 = vmatpush3.bf16.xpose.msra.mxu1 %v114_v8  ;;  %v206_v16 = vsel %vm63_vm0, %v42_v12, 0  ;;  %v44_v22 = vpack.c.bf16 %v36_v18, %v36_v18  ;;  %v25_v23 = vpack.c.bf16 %v17_v19, %v17_v19  ;;  %v26_v24 = vpack.c.bf16 %v18_v20, %v18_v20  ;;  %v37_v27 = vld [vmem:[%s1352_s1 + $0x18] sm:$0xf]  ;;  %v38_v28 = vld [vmem:[%s1352_s1 + $0x1c] sm:$0xf] }
   0x6   :  { %980 = vmatprep.subr.bf16.mxu0 %v1098_v0  ;;  %986 = vmatprep.subr.bf16.mxu1 %v1098_v0  ;;  %v252_v25 = vsel %vm63_vm0, %v43_v21, 0  ;;  %v19_v29 = vld [vmem:[%s1353_s0 + $0x10] sm:$0xf]  ;;  %v20_v30 = vld [vmem:[%s1353_s0 + $0x14] sm:$0xf]  ;;  %v45_v31 = vpack.c.bf16 %v37_v27, %v37_v27  ;;  %v46_v32 = vpack.c.bf16 %v38_v28, %v38_v28  ;;  %vm541_vm3 = vcmask 1041408  }
   0x7   :  { %v298_v26 = vsel %vm63_vm0, %v44_v22, 0  ;;  %v27_v33 = vpack.c.bf16 %v19_v29, %v19_v29  ;;  %v28_v34 = vpack.c.bf16 %v20_v30, %v20_v30  ;;  %v21_v37 = vld [vmem:[%s1353_s0 + $0x18] sm:$0xf]  ;;  %v22_v38 = vld [vmem:[%s1353_s0 + $0x1c] sm:$0xf]  ;;  %vm537_vm4 = vcmask 31744  }
   0x8   :  { %v344_v35 = vsel %vm63_vm0, %v45_v31, 0  ;;  %v390_v36 = vsel %vm63_vm0, %v46_v32, 0  ;;  %v29_v39 = vpack.c.bf16 %v21_v37, %v21_v37  ;;  %v30_v40 = vpack.c.bf16 %v22_v38, %v22_v38 }
   0x9   :  { %vm907_vm5 = vcmask 60416  }
   0xc   :  { %971 = vmatmul.mubr.msk.bf16.vlgmr.msra.gmra.mxu0 %vm63_vm0, %v23_v13  ;;  %977 = vmatmul.mubr.msk.bf16.vlgmr.msra.gmra.mxu1 %vm63_vm0, %v24_v14 }
   0xd   :  { %981 = vmatpush3.bf16.xpose.msra.mxu0 %v160_v15  ;;  %987 = vmatpush3.bf16.xpose.msra.mxu1 %v206_v16 }
   0xe   :  { %982 = vmatprep.mubr.msk.bf16.mxu0 %vm1099_vm1, %v1098_v0  ;;  %988 = vmatprep.mubr.msk.bf16.mxu1 %vm1099_vm1, %v1098_v0 }
   0xf   :  { %992 = vmatprep.subr.bf16.mxu0 %v1098_v0  ;;  %998 = vmatprep.subr.bf16.mxu1 %v1098_v0 }
  0x14   :  { %983 = vmatmul.mubr.msk.bf16.vlgmr.msra.gmra.mxu0 %vm63_vm0, %v25_v23  ;;  %989 = vmatmul.mubr.msk.bf16.vlgmr.msra.gmra.mxu1 %vm63_vm0, %v26_v24 }
  0x15   :  { %993 = vmatpush3.bf16.xpose.msra.mxu0 %v252_v25  ;;  %999 = vmatpush3.bf16.xpose.msra.mxu1 %v298_v26 }
  0x16   :  { %994 = vmatprep.mubr.msk.bf16.mxu0 %vm1099_vm1, %v1098_v0  ;;  %1000 = vmatprep.mubr.msk.bf16.mxu1 %vm1099_vm1, %v1098_v0 }
  0x17   :  { %1004 = vmatprep.subr.bf16.mxu0 %v1098_v0  ;;  %1010 = vmatprep.subr.bf16.mxu1 %v1098_v0 }
  0x1c   :  { %995 = vmatmul.mubr.msk.bf16.vlgmr.msra.gmra.mxu0 %vm63_vm0, %v27_v33  ;;  %1001 = vmatmul.mubr.msk.bf16.vlgmr.msra.gmra.mxu1 %vm63_vm0, %v28_v34 }
  0x1d   :  { %1005 = vmatpush3.bf16.xpose.msra.mxu0 %v344_v35  ;;  %1011 = vmatpush3.bf16.xpose.msra.mxu1 %v390_v36 }
  0x1e   :  { %1006 = vmatprep.mubr.msk.bf16.mxu0 %vm1099_vm1, %v1098_v0  ;;  %1012 = vmatprep.mubr.msk.bf16.mxu1 %vm1099_vm1, %v1098_v0 }
  0x1f   :  { %1016 = vmatprep.subr.bf16.mxu0 %v1098_v0  ;;  %1022 = vmatprep.subr.bf16.mxu1 %v1098_v0 }
  0x24   :  { %1007 = vmatmul.mubr.msk.bf16.vlgmr.msra.gmra.mxu0 %vm63_vm0, %v29_v39  ;;  %1013 = vmatmul.mubr.msk.bf16.vlgmr.msra.gmra.mxu1 %vm63_vm0, %v30_v40 }
  0x25   :  { %1018 = vmatprep.mubr.msk.bf16.mxu0 %vm1099_vm1, %v1098_v0  ;;  %1024 = vmatprep.mubr.msk.bf16.mxu1 %vm1099_vm1, %v1098_v0 }
  0xcc   :  { %v104_v41 = vpop.f32.mrf.mxu0  ;;  %v150_v42 = vpop.f32.mrf.mxu1 }
  0xcd   :  { %v432_v43 = vmul.f32 0.35355338, %v104_v41  ;;  %v433_v44 = vmul.f32 0.35355338, %v150_v42 }
  0xce   :  { %v972_v45 = vpop.f32.mrf.mxu0  ;;  %v978_v46 = vpop.f32.mrf.mxu1 }
  0xcf   :  { %v441_v47 = vsel %vm440_vm2, %v432_v43, -inf  ;;  %v444_v50 = vsel %vm440_vm2, %v433_v44, -inf }
  0xd0   :  { %v153_v48 = vpop.f32.mrf.mxu1  ;;  %442 = vmax.xlane.f32.xlu0 %v441_v47  ;;  %v107_v49 = vpop.f32.mrf.mxu0 }
  0xd2   :  { %v973_v51 = vpop.f32.mrf.mxu0  ;;  %v979_v52 = vpop.f32.mrf.mxu1 }
  0xd4   :  { %v242_v53 = vpop.f32.mrf.mxu1  ;;  %445 = vmax.xlane.f32.xlu0 %v444_v50  ;;  %v196_v54 = vpop.f32.mrf.mxu0 }
  0xd5   :  { %v435_v55 = vmul.f32 0.35355338, %v242_v53  ;;  %v434_v56 = vmul.f32 0.35355338, %v196_v54 }
  0xd6   :  { %v984_v57 = vpop.f32.mrf.mxu0  ;;  %v990_v58 = vpop.f32.mrf.mxu1 }
  0xd7   :  { %v447_v59 = vsel %vm440_vm2, %v434_v56, -inf  ;;  %v450_v62 = vsel %vm440_vm2, %v435_v55, -inf }
  0xd8   :  { %v245_v60 = vpop.f32.mrf.mxu1  ;;  %448 = vmax.xlane.f32.xlu1 %v447_v59  ;;  %v199_v61 = vpop.f32.mrf.mxu0 }
  0xda   :  { %v985_v63 = vpop.f32.mrf.mxu0  ;;  %v991_v1 = vpop.f32.mrf.mxu1 }
  0xdb   :  { %v47_v63 = vld [vmem:[%s1354_s2] sm:$0xf]  ;;  %v48_v1 = vld [vmem:[%s1354_s2 + $0x4] sm:$0xf] }
  0xdc   :  { %v334_v2 = vpop.f32.mrf.mxu1  ;;  %451 = vmax.xlane.f32.xlu1 %v450_v62  ;;  %v288_v3 = vpop.f32.mrf.mxu0 }
  0xdd   :  { %v437_v4 = vmul.f32 0.35355338, %v334_v2  ;;  %v436_v5 = vmul.f32 0.35355338, %v288_v3 }
  0xde   :  { %v996_v6 = vpop.f32.mrf.mxu0  ;;  %v1002_v7 = vpop.f32.mrf.mxu1 }
  0xdf   :  { %v456_v8 = vsel %vm440_vm2, %v437_v4, -inf  ;;  %v453_v9 = vsel %vm440_vm2, %v436_v5, -inf }
  0xe0   :  { %v337_v10 = vpop.f32.mrf.mxu1  ;;  %457 = vmax.xlane.f32.xlu1 %v456_v8  ;;  %454 = vmax.xlane.f32.xlu0 %v453_v9  ;;  %v291_v11 = vpop.f32.mrf.mxu0  ;;  %v49_v9 = vld [vmem:[%s1354_s2 + $0x8] sm:$0xf] }
  0xe1   :  { %v57_v10 = vpack.c.bf16 %v49_v9, %v49_v9  ;;  %v50_v11 = vld [vmem:[%s1354_s2 + $0xc] sm:$0xf] }
  0xe2   :  { %v997_v12 = vpop.f32.mrf.mxu0  ;;  %v1003_v13 = vpop.f32.mrf.mxu1 }
  0xe3   :  { %v58_v12 = vpack.c.bf16 %v50_v11, %v50_v11  ;;  %v635_v13 = vsel %vm541_vm3, %v57_v10, 0 }
  0xe4   :  { %v380_v14 = vpop.f32.mrf.mxu0  ;;  %v426_v15 = vpop.f32.mrf.mxu1 }
  0xe5   :  { %v438_v16 = vmul.f32 0.35355338, %v380_v14  ;;  %v439_v17 = vmul.f32 0.35355338, %v426_v15  ;;  %v681_v14 = vsel %vm541_vm3, %v58_v12, 0 }
  0xe6   :  { %v1008_v18 = vpop.f32.mrf.mxu0  ;;  %v1014_v19 = vpop.f32.mrf.mxu1  ;;  %v51_v15 = vld [vmem:[%s1354_s2 + $0x10] sm:$0xf] }
  0xe7   :  { %v462_v20 = vsel %vm440_vm2, %v439_v17, -inf  ;;  %v459_v21 = vsel %vm440_vm2, %v438_v16, -inf }
  0xe8   :  { %v429_v22 = vpop.f32.mrf.mxu1  ;;  %463 = vmax.xlane.f32.xlu1 %v462_v20  ;;  %460 = vmax.xlane.f32.xlu0 %v459_v21  ;;  %v383_v23 = vpop.f32.mrf.mxu0  ;;  %v53_v21 = vld [vmem:[%s1354_s2 + $0x18] sm:$0xf] }
  0xe9   :  { %v61_v22 = vpack.c.bf16 %v53_v21, %v53_v21  ;;  %v54_v23 = vld [vmem:[%s1354_s2 + $0x1c] sm:$0xf] }
  0xea   :  { %v1009_v24 = vpop.f32.mrf.mxu0  ;;  %v1015_v25 = vpop.f32.mrf.mxu1 }
  0xeb   :  { %v819_v24 = vsel %vm541_vm3, %v61_v22, 0  ;;  %v62_v25 = vpack.c.bf16 %v54_v23, %v54_v23 }
 0x159   :  { %v443_v26 = vpop.xlane.xlu0 %442 }
 0x15a   :  { %v465_v27 = vsub.f32 %v432_v43, %v443_v26  ;;  %v865_v26 = vsel %vm541_vm3, %v62_v25, 0 }
 0x15c   :  { %v473_v28 = vmul.f32 1.442695, %v465_v27 }
 0x15d   :  { %v446_v29 = vpop.xlane.xlu0 %445 }
 0x15e   :  { %1066 = vpow2.f32 %v473_v28  ;;  %v466_v30 = vsub.f32 %v433_v44, %v446_v29 }
 0x160   :  { %v475_v31 = vmul.f32 1.442695, %v466_v30 }
 0x161   :  { %v449_v32 = vpop.xlane.xlu1 %448 }
 0x162   :  { %1068 = vpow2.f32 %v475_v31  ;;  %v467_v33 = vsub.f32 %v434_v56, %v449_v32 }
 0x164   :  { %v477_v34 = vmul.f32 1.442695, %v467_v33 }
 0x165   :  { %v452_v35 = vpop.xlane.xlu1 %451 }
 0x166   :  { %1070 = vpow2.f32 %v477_v34  ;;  %v468_v36 = vsub.f32 %v435_v55, %v452_v35 }
 0x168   :  { %v479_v37 = vmul.f32 1.442695, %v468_v36 }
 0x169   :  { %v458_v38 = vpop.xlane.xlu1 %457  ;;  %v455_v39 = vpop.xlane.xlu0 %454 }
 0x16a   :  { %1072 = vpow2.f32 %v479_v37  ;;  %v470_v40 = vsub.f32 %v437_v4, %v458_v38  ;;  %v469_v41 = vsub.f32 %v436_v5, %v455_v39  ;;  %v55_v4 = vpack.c.bf16 %v47_v63, %v47_v63 }
 0x16b   :  { %v1222_v42 = vpop.eup %1066  ;;  %v56_v5 = vpack.c.bf16 %v48_v1, %v48_v1 }
 0x16c   :  { %v483_v43 = vmul.f32 1.442695, %v470_v40  ;;  %v481_v45 = vmul.f32 1.442695, %v469_v41  ;;  %v489_v44 = vsel %vm440_vm2, %v1222_v42, 0.0  ;;  %v543_v7 = vsel %vm541_vm3, %v55_v4, 0 }
 0x16d   :  { %490 = vadd.xlane.f32.xlu0 %v489_v44  ;;  %v589_v8 = vsel %vm541_vm3, %v56_v5, 0  ;;  %1017 = vmatpush3.bf16.msra.mxu0 %v543_v7 }
 0x16e   :  { %1074 = vpow2.f32 %v483_v43  ;;  %1023 = vmatpush3.bf16.msra.mxu1 %v589_v8  ;;  %1028 = vmatprep.subr.bf16.mxu0 %v1098_v0 }
 0x16f   :  { %v1226_v46 = vpop.eup %1068  ;;  %1076 = vpow2.f32 %v481_v45  ;;  %1034 = vmatprep.subr.bf16.mxu1 %v1098_v0 }
 0x170   :  { %v492_v47 = vsel %vm440_vm2, %v1226_v46, 0.0 }
 0x171   :  { %493 = vadd.xlane.f32.xlu1 %v492_v47  ;;  %v464_v48 = vpop.xlane.xlu1 %463  ;;  %v461_v49 = vpop.xlane.xlu0 %460 }
 0x172   :  { %v472_v50 = vsub.f32 %v439_v17, %v464_v48  ;;  %v471_v51 = vsub.f32 %v438_v16, %v461_v49  ;;  %v59_v16 = vpack.c.bf16 %v51_v15, %v51_v15  ;;  %v52_v17 = vld [vmem:[%s1354_s2 + $0x14] sm:$0xf] }
 0x173   :  { %v1230_v52 = vpop.eup %1070  ;;  %v60_v19 = vpack.c.bf16 %v52_v17, %v52_v17 }
 0x174   :  { %v487_v53 = vmul.f32 1.442695, %v472_v50  ;;  %v485_v54 = vmul.f32 1.442695, %v471_v51  ;;  %v495_v55 = vsel %vm440_vm2, %v1230_v52, 0.0  ;;  %v727_v18 = vsel %vm541_vm3, %v59_v16, 0 }
 0x175   :  { %496 = vadd.xlane.f32.xlu0 %v495_v55  ;;  %v773_v20 = vsel %vm541_vm3, %v60_v19, 0 }
 0x176   :  { %1078 = vpow2.f32 %v487_v53 }
 0x177   :  { %v1234_v56 = vpop.eup %1072  ;;  %1080 = vpow2.f32 %v485_v54 }
 0x178   :  { %v498_v57 = vsel %vm440_vm2, %v1234_v56, 0.0 }
 0x179   :  { %499 = vadd.xlane.f32.xlu1 %v498_v57 }
 0x17b   :  { %v1238_v58 = vpop.eup %1074 }
 0x17c   :  { %v1240_v59 = vpop.eup %1076  ;;  %v504_v60 = vsel %vm440_vm2, %v1238_v58, 0.0 }
 0x17d   :  { %505 = vadd.xlane.f32.xlu1 %v504_v60  ;;  %v501_v61 = vsel %vm440_vm2, %v1240_v59, 0.0 }
 0x17e   :  { %502 = vadd.xlane.f32.xlu0 %v501_v61 }
 0x183   :  { %v1246_v62 = vpop.eup %1078 }
 0x184   :  { %v1254_v2 = vpop.eup %1080  ;;  %v510_v3 = vsel %vm440_vm2, %v1246_v62, 0.0 }
 0x185   :  { %511 = vadd.xlane.f32.xlu1 %v510_v3  ;;  %v507_v6 = vsel %vm440_vm2, %v1254_v2, 0.0 }
 0x186   :  { %508 = vadd.xlane.f32.xlu0 %v507_v6 }
 0x1f6   :  { %v491_v27 = vpop.xlane.xlu0 %490 }
 0x1f7   :  { %1082 = vrcp.f32 %v491_v27 }
 0x1fa   :  { %v494_v28 = vpop.xlane.xlu1 %493 }
 0x1fb   :  { %1084 = vrcp.f32 %v494_v28 }
 0x1fe   :  { %v497_v29 = vpop.xlane.xlu0 %496 }
 0x1ff   :  { %1086 = vrcp.f32 %v497_v29 }
 0x202   :  { %v500_v30 = vpop.xlane.xlu1 %499 }
 0x203   :  { %1088 = vrcp.f32 %v500_v30 }
 0x204   :  { %v1083_v31 = vpop.eup %1082 }
 0x205   :  { %v521_v32 = vmul.f32 %v1083_v31, %v1222_v42 }
 0x206   :  { %v506_v33 = vpop.xlane.xlu1 %505 }
 0x207   :  { %1090 = vrcp.f32 %v506_v33  ;;  %v503_v34 = vpop.xlane.xlu0 %502  ;;  %v529_v35 = vpack.c.bf16 %v521_v32, %v521_v32 }
 0x208   :  { %v1085_v36 = vpop.eup %1084  ;;  %1092 = vrcp.f32 %v503_v34 }
 0x209   :  { %1019 = vmatmul.mubr.msk.bf16.vlgmr.msra.gmra.mxu0 %vm537_vm4, %v529_v35  ;;  %v522_v37 = vmul.f32 %v1085_v36, %v1226_v46 }
 0x20a   :  { %1029 = vmatpush3.bf16.msra.mxu0 %v635_v13  ;;  %1030 = vmatprep.mubr.msk.bf16.mxu0 %vm1099_vm1, %v1098_v0 }
 0x20b   :  { %v530_v38 = vpack.c.bf16 %v522_v37, %v522_v37  ;;  %1040 = vmatprep.subr.bf16.mxu0 %v1098_v0 }
 0x20c   :  { %v1087_v39 = vpop.eup %1086 }
 0x20d   :  { %1025 = vmatmul.mubr.msk.bf16.vlgmr.msra.gmra.mxu1 %vm537_vm4, %v530_v38  ;;  %v523_v40 = vmul.f32 %v1087_v39, %v1230_v52 }
 0x20e   :  { %1035 = vmatpush3.bf16.msra.mxu1 %v681_v14  ;;  %v512_v41 = vpop.xlane.xlu1 %511  ;;  %1036 = vmatprep.mubr.msk.bf16.mxu1 %vm1099_vm1, %v1098_v0 }
 0x20f   :  { %1094 = vrcp.f32 %v512_v41  ;;  %v509_v42 = vpop.xlane.xlu0 %508  ;;  %v531_v43 = vpack.c.bf16 %v523_v40, %v523_v40  ;;  %1046 = vmatprep.subr.bf16.mxu1 %v1098_v0 }
 0x210   :  { %v1089_v45 = vpop.eup %1088  ;;  %1096 = vrcp.f32 %v509_v42 }
 0x211   :  { %1031 = vmatmul.mubr.msk.bf16.vlgmr.msra.gmra.mxu0 %vm537_vm4, %v531_v43  ;;  %v524_v44 = vmul.f32 %v1089_v45, %v1234_v56 }
 0x212   :  { %1041 = vmatpush3.bf16.msra.mxu0 %v727_v18  ;;  %1042 = vmatprep.mubr.msk.bf16.mxu0 %vm1099_vm1, %v1098_v0 }
 0x213   :  { %v532_v46 = vpack.c.bf16 %v524_v44, %v524_v44  ;;  %1052 = vmatprep.subr.bf16.mxu0 %v1098_v0 }
 0x214   :  { %v1091_v47 = vpop.eup %1090 }
 0x215   :  { %v1093_v48 = vpop.eup %1092  ;;  %1037 = vmatmul.mubr.msk.bf16.vlgmr.msra.gmra.mxu1 %vm537_vm4, %v532_v46  ;;  %v526_v50 = vmul.f32 %v1091_v47, %v1238_v58 }
 0x216   :  { %1047 = vmatpush3.bf16.msra.mxu1 %v773_v20  ;;  %v525_v49 = vmul.f32 %v1093_v48, %v1240_v59  ;;  %1048 = vmatprep.mubr.msk.bf16.mxu1 %vm1099_vm1, %v1098_v0 }
 0x217   :  { %1058 = vmatprep.subr.bf16.mxu1 %v1098_v0  ;;  %v534_v52 = vpack.c.bf16 %v526_v50, %v526_v50 }
 0x218   :  { %v533_v51 = vpack.c.bf16 %v525_v49, %v525_v49 }
 0x21a   :  { %1043 = vmatmul.mubr.msk.bf16.vlgmr.msra.gmra.mxu0 %vm537_vm4, %v533_v51 }
 0x21b   :  { %1053 = vmatpush3.bf16.msra.mxu0 %v819_v24  ;;  %1054 = vmatprep.mubr.msk.bf16.mxu0 %vm1099_vm1, %v1098_v0 }
 0x21c   :  { %v1095_v53 = vpop.eup %1094 }
 0x21d   :  { %v1097_v54 = vpop.eup %1096  ;;  %1049 = vmatmul.mubr.msk.bf16.vlgmr.msra.gmra.mxu1 %vm537_vm4, %v534_v52  ;;  %v528_v56 = vmul.f32 %v1095_v53, %v1246_v62 }
 0x21e   :  { %1059 = vmatpush3.bf16.msra.mxu1 %v865_v26  ;;  %v527_v55 = vmul.f32 %v1097_v54, %v1254_v2  ;;  %1060 = vmatprep.mubr.msk.bf16.mxu1 %vm1099_vm1, %v1098_v0 }
 0x21f   :  { %v536_v58 = vpack.c.bf16 %v528_v56, %v528_v56 }
 0x220   :  { %v535_v57 = vpack.c.bf16 %v527_v55, %v527_v55 }
 0x222   :  { %1055 = vmatmul.mubr.msk.bf16.vlgmr.msra.gmra.mxu0 %vm537_vm4, %v535_v57 }
 0x225   :  { %1061 = vmatmul.mubr.msk.bf16.vlgmr.msra.gmra.mxu1 %vm537_vm4, %v536_v58 }
 0x2c9   :  { %v579_v59 = vpop.f32.mrf.mxu0 }
 0x2ca   :  { %908 = vst.msk [vmem:[%s1355_s3] sm:$0xf] %vm907_vm5, %v579_v59 }
 0x2cb   :  { %v1020_v60 = vpop.f32.mrf.mxu0 }
 0x2cd   :  { %v582_v61 = vpop.f32.mrf.mxu0  ;;  %v625_v63 = vpop.f32.mrf.mxu1 }
 0x2ce   :  { %909 = vst.msk [vmem:[%s1355_s3 + $0x4] sm:$0xf] %vm907_vm5, %v625_v63 }
 0x2cf   :  { %v1021_v0 = vpop.f32.mrf.mxu0  ;;  %v1026_v62 = vpop.f32.mrf.mxu1 }
 0x2d1   :  { %v628_v1 = vpop.f32.mrf.mxu1  ;;  %v671_v2 = vpop.f32.mrf.mxu0 }
 0x2d2   :  { %910 = vst.msk [vmem:[%s1355_s3 + $0x8] sm:$0xf] %vm907_vm5, %v671_v2 }
 0x2d3   :  { %v1027_v3 = vpop.f32.mrf.mxu1  ;;  %v1032_v4 = vpop.f32.mrf.mxu0 }
 0x2d5   :  { %v674_v5 = vpop.f32.mrf.mxu0  ;;  %v717_v6 = vpop.f32.mrf.mxu1 }
 0x2d6   :  { %911 = vst.msk [vmem:[%s1355_s3 + $0xc] sm:$0xf] %vm907_vm5, %v717_v6 }
 0x2d7   :  { %v1033_v7 = vpop.f32.mrf.mxu0  ;;  %v1038_v8 = vpop.f32.mrf.mxu1 }
 0x2d9   :  { %v720_v9 = vpop.f32.mrf.mxu1 }
 0x2da   :  { %v763_v10 = vpop.f32.mrf.mxu0 }
 0x2db   :  { %912 = vst.msk [vmem:[%s1355_s3 + $0x10] sm:$0xf] %vm907_vm5, %v763_v10  ;;  %v1039_v11 = vpop.f32.mrf.mxu1 }
 0x2dc   :  { %v1044_v12 = vpop.f32.mrf.mxu0 }
 0x2dd   :  { %v809_v13 = vpop.f32.mrf.mxu1 }
 0x2de   :  { %v766_v14 = vpop.f32.mrf.mxu0  ;;  %913 = vst.msk [vmem:[%s1355_s3 + $0x14] sm:$0xf] %vm907_vm5, %v809_v13 }
 0x2df   :  { %v1050_v15 = vpop.f32.mrf.mxu1 }
 0x2e0   :  { %v1045_v16 = vpop.f32.mrf.mxu0 }
 0x2e1   :  { %v812_v17 = vpop.f32.mrf.mxu1 }
 0x2e2   :  { %v855_v18 = vpop.f32.mrf.mxu0 }
 0x2e3   :  { %914 = vst.msk [vmem:[%s1355_s3 + $0x18] sm:$0xf] %vm907_vm5, %v855_v18  ;;  %v1051_v19 = vpop.f32.mrf.mxu1 }
 0x2e4   :  { %v1056_v20 = vpop.f32.mrf.mxu0 }
 0x2e5   :  { %v901_v21 = vpop.f32.mrf.mxu1 }
 0x2e6   :  { %v858_v22 = vpop.f32.mrf.mxu0  ;;  %915 = vst.msk [vmem:[%s1355_s3 + $0x1c] sm:$0xf] %vm907_vm5, %v901_v21 }
 0x2e7   :  { %v1062_v23 = vpop.f32.mrf.mxu1 }
 0x2e8   :  { %v1057_v24 = vpop.f32.mrf.mxu0 }
 0x2e9   :  { %v904_v25 = vpop.f32.mrf.mxu1 }
 0x2eb   :  { %v1063_v26 = vpop.f32.mrf.mxu1 }

</bundles_post_ra>
